<compile_context>
chip_gen: v5e
topology: v5e:2x2
jax: 0.10.0
libtpu: 0.0.40
codegen_flags: <defaults>
</compile_context>

<pallas_src>
import functools

import jax
import jax.numpy as jnp
from jax import lax
from jax.experimental import pallas as pl
from jax.experimental.pallas import tpu as pltpu

EPS = 1e-5  # nn.BatchNorm1d default eps


# ---------------------------------------------------------------------------
# The single fused kernel: all 12 ConvNormRelu layers + skip adds.
# ---------------------------------------------------------------------------
def unet1d_gan_kernel(x_ref, w_nd_ref, g_nd_ref, b_nd_ref,
                      w_ds_ref, g_ds_ref, b_ds_ref, o_ref, stage_ref,
                      *, N, L, C, mxu_dtype):
    f32 = jnp.float32
    iota_cache = {}

    def row_iota(rows):
        # Build each (rows, 1) iota once and reuse (JAX does not CSE these).
        if rows not in iota_cache:
            iota_cache[rows] = lax.broadcasted_iota(jnp.int32, (rows, 1), 0)
        return iota_cache[rows]

    def shift_block(v, delta, blk):
        """w[r] = v[r + delta] within each per-sample block of `blk` rows, else 0.

        Pure sublane data movement (slice + concat + boundary mask) instead of
        an (M, M) selection matmul.
        """
        rows = v.shape[0]
        zero_row = jnp.zeros((1, C), v.dtype)
        if delta == -1:                                   # previous row
            shifted = jnp.concatenate([zero_row, v[:rows - 1]], axis=0)
            kill = [n * blk for n in range(1, N)]         # first row of samples 1..N-1
        else:                                             # delta == +1, next row
            shifted = jnp.concatenate([v[1:], zero_row], axis=0)
            kill = [n * blk - 1 for n in range(1, N)]     # last row of samples 0..N-2
        if kill:
            row = row_iota(rows)
            keep = None
            for r in kill:
                cond = row != r
                keep = cond if keep is None else (keep & cond)
            shifted = jnp.where(keep, shifted, 0.0)
        return shifted

    def bn_relu(y, gamma, beta):
        # Training-mode BatchNorm1d: biased batch stats over all (n, l) rows.
        m = y.shape[0]
        mean = jnp.sum(y, axis=0, keepdims=True) * (1.0 / m)
        d = y - mean
        var = jnp.sum(d * d, axis=0, keepdims=True) * (1.0 / m)
        yhat = d * lax.rsqrt(var + EPS)
        return jnp.maximum(yhat * gamma + beta, 0.0)
        # TODO(synk): BatchNorm running-mean/var updates are a training-time
        # side effect and do not affect this forward's output; not modeled.

    def conv_dot(window, w):
        # Weights already live in mxu_dtype (cast once wrapper-side); only the
        # activation window is cast here.  f32 accumulation on the MXU.
        return jnp.dot(window.astype(mxu_dtype), w, preferred_element_type=f32)

    def cnr_same(v, lc, idx):
        # (N*lc, C) -> (N*lc, C): k=3, s=1, pad=1 conv as ONE im2col matmul.
        # Conv bias omitted: it is cancelled exactly by the BN mean subtraction.
        slab_p = shift_block(v, -1, lc)                   # x[l-1]
        slab_n = shift_block(v, +1, lc)                   # x[l+1]
        window = jnp.concatenate([slab_p, v, slab_n], axis=-1)       # (M, 3C)
        y = conv_dot(window, w_nd_ref[idx])
        return bn_relu(y, g_nd_ref[idx], b_nd_ref[idx])

    def cnr_down(v, lc, idx):
        # (N*lc, C) -> (N*lo, C), lo = lc//2: k=4, s=2, pad=1 conv.  Even/odd
        # de-interleave via sublane-strided reads of a VMEM staging scratch
        # (no O(M^2) selection matmuls), then one im2col matmul.
        lo = lc // 2
        m_in, m_out = N * lc, N * lo
        stage_ref[pl.ds(0, m_in), :] = v
        even = stage_ref[pl.ds(0, m_out, stride=2), :]    # x[2j]
        odd = stage_ref[pl.ds(1, m_out, stride=2), :]     # x[2j+1]
        tap0 = shift_block(odd, -1, lo)                   # x_pad[2j+0] = x[2j-1]
        tap3 = shift_block(even, +1, lo)                  # x_pad[2j+3] = x[2j+2]
        window = jnp.concatenate([tap0, even, odd, tap3], axis=-1)   # (Mo, 4C)
        y = conv_dot(window, w_ds_ref[idx])
        return bn_relu(y, g_ds_ref[idx], b_ds_ref[idx])

    def up_add(lo_v, src_len, hi_v):
        # UpSampling1D (per-sample 2x tile along L) + skip add: pure block
        # copies, no selection matmul.
        blocks = []
        for n in range(N):
            blk = lo_v[n * src_len:(n + 1) * src_len]
            blocks += [blk, blk]
        return jnp.concatenate(blocks, axis=0) + hi_v

    x = x_ref[...]                                        # (N*L, C) f32

    x1 = cnr_same(x, L, 0)
    x1 = cnr_same(x1, L, 1)
    x2 = cnr_down(x1, L, 0)                               # length L/2
    x3 = cnr_down(x2, L // 2, 1)                          # L/4
    x4 = cnr_down(x3, L // 4, 2)                          # L/8
    x5 = cnr_down(x4, L // 8, 3)                          # L/16
    x6 = cnr_down(x5, L // 16, 4)                         # L/32
    x5 = cnr_same(up_add(x6, L // 32, x5), L // 16, 2)
    x4 = cnr_same(up_add(x5, L // 16, x4), L // 8, 3)
    x3 = cnr_same(up_add(x4, L // 8, x3), L // 4, 4)
    x2 = cnr_same(up_add(x3, L // 4, x2), L // 2, 5)
    x1 = cnr_same(up_add(x2, L // 2, x1), L, 6)

    o_ref[...] = x1                                       # single output store
    # TODO(synk): with C=32 this final store is 32-lane masked; a packed
    # (N*L*C/128, 128) lane-dense output layout is left as a follow-up.
    # TODO(synk): v7x dual-TensorCore split (grid over N/L with a cross-core
    # BatchNorm partial-stat reduction) is not implemented at this toy size.


# ---------------------------------------------------------------------------
# Wrapper: parameter re-layout + the single pallas_call.
# ---------------------------------------------------------------------------
def _stack_params(layers, K, C, w_dtype):
    # torch Conv1d weight (Cout, Cin, K) -> stacked (K*Cin, Cout), row = t*C+cin.
    # Weights are cast to the MXU dtype ONCE here (bf16 at rest by default).
    w = jnp.stack([jnp.transpose(p["w"], (2, 1, 0)).reshape(K * C, C)
                   for p in layers]).astype(w_dtype)
    g = jnp.stack([p["gamma"].reshape(1, C) for p in layers])
    b = jnp.stack([p["beta"].reshape(1, C) for p in layers])
    return w, g, b


def _cost_estimate(N, L, C):
    flops = 0
    same_lens = [L, L, L // 16, L // 8, L // 4, L // 2, L]
    for lc in same_lens:
        flops += 2 * (N * lc) * (3 * C) * C           # fused 3-tap conv matmul
    lc = L
    for _ in range(5):
        lo = lc // 2
        flops += 2 * (N * lo) * (4 * C) * C           # fused 4-tap conv matmul
        lc = lo
    bytes_accessed = (4 * 2 * N * L * C               # activations in/out (f32)
                      + 2 * (7 * 3 + 5 * 4) * C * C   # bf16 weights at rest
                      + 4 * 24 * C)                   # gamma/beta
    return pl.CostEstimate(flops=int(flops), transcendentals=12 * C,
                           bytes_accessed=int(bytes_accessed))


def _live_vmem_bytes(N, L, C, w_bytes_per_el):
    # Rough resident-set bound: input + output + staging scratch + skip
    # activations (x1..x5 ~ 2*M*C) + largest im2col window + working values.
    M = N * L
    acts = 4 * C * M * 8
    window = 4 * 4 * C * M
    weights = w_bytes_per_el * (7 * 3 + 5 * 4) * C * C + 4 * 24 * C
    io_scr = 4 * C * M * 3
    return int(acts + window + weights + io_scr)


def unet1d_gan_forward(x_ncl, params, *, use_bf16_matmul=True):
    """x_ncl: (N, C, L) like the PyTorch module; returns (N, C, L)."""
    N, C, L = x_ncl.shape
    assert L % 32 == 0, "L must be divisible by 2**5 for the 5 downsamples"
    mxu_dtype = jnp.bfloat16 if use_bf16_matmul else jnp.float32

    live = _live_vmem_bytes(N, L, C, 2 if use_bf16_matmul else 4)
    assert live < 48 * 1024 * 1024, (
        f"resident working set ~{live} B will not fit v7x VMEM (64 MiB); "
        "tile the fused kernel over L before scaling up")
    vmem_limit = int(min(max(2 * live, 32 * 1024 * 1024), 64 * 1024 * 1024))

    x_flat = jnp.transpose(x_ncl, (0, 2, 1)).reshape(N * L, C)
    w_nd, g_nd, b_nd = _stack_params(params["nd"], 3, C, mxu_dtype)
    w_ds, g_ds, b_ds = _stack_params(params["ds"], 4, C, mxu_dtype)

    kern = functools.partial(unet1d_gan_kernel, N=N, L=L, C=C,
                             mxu_dtype=mxu_dtype)

    out = pl.pallas_call(
        kern,
        out_shape=jax.ShapeDtypeStruct((N * L, C), jnp.float32),
        in_specs=[pl.BlockSpec(memory_space=pltpu.MemorySpace.VMEM)] * 7,
        out_specs=pl.BlockSpec(memory_space=pltpu.MemorySpace.VMEM),
        scratch_shapes=[pltpu.VMEM((N * L, C), jnp.float32)],
        compiler_params=pltpu.CompilerParams(vmem_limit_bytes=vmem_limit),
        cost_estimate=_cost_estimate(N, L, C),
    )(x_flat, w_nd, g_nd, b_nd, w_ds, g_ds, b_ds)

    return jnp.transpose(out.reshape(N, L, C), (0, 2, 1))


# ---------------------------------------------------------------------------
# Pure-JAX reference (NCL layout, lax.conv) for correctness checking.
# Keeps the conv bias (PyTorch-faithful); inside the kernel it is dropped
# because training-mode BatchNorm cancels it exactly.
# ---------------------------------------------------------------------------
def _ref_cnr(x, p, stride, pad, matmul_dtype):
    y = lax.conv_general_dilated(
        x.astype(matmul_dtype), p["w"].astype(matmul_dtype),
        (stride,), [(pad, pad)],
        dimension_numbers=("NCH", "OIH", "NCH"),
        preferred_element_type=jnp.float32)
    y = y + p["cb"][None, :, None]
    mean = jnp.mean(y, axis=(0, 2), keepdims=True)
    var = jnp.mean((y - mean) ** 2, axis=(0, 2), keepdims=True)
    y = (y - mean) * lax.rsqrt(var + EPS)
    y = y * p["gamma"][None, :, None] + p["beta"][None, :, None]
    return jnp.maximum(y, 0.0)


def unet1d_gan_reference(x, params, matmul_dtype=jnp.float32):
    nd, ds = params["nd"], params["ds"]
    cnr = functools.partial(_ref_cnr, matmul_dtype=matmul_dtype)
    up = lambda a: jnp.tile(a, (1, 1, 2))      # == torch .repeat(1, 1, 2)
    x1 = cnr(x, nd[0], 1, 1)
    x1 = cnr(x1, nd[1], 1, 1)
    x2 = cnr(x1, ds[0], 2, 1)
    x3 = cnr(x2, ds[1], 2, 1)
    x4 = cnr(x3, ds[2], 2, 1)
    x5 = cnr(x4, ds[3], 2, 1)
    x6 = cnr(x5, ds[4], 2, 1)
    x5 = cnr(up(x6) + x5, nd[2], 1, 1)
    x4 = cnr(up(x5) + x4, nd[3], 1, 1)
    x3 = cnr(up(x4) + x3, nd[4], 1, 1)
    x2 = cnr(up(x3) + x2, nd[5], 1, 1)
    x1 = cnr(up(x2) + x1, nd[6], 1, 1)
    return x1


# ---------------------------------------------------------------------------
# Deterministic parameter init
# ---------------------------------------------------------------------------
def init_params(key, C):
    def conv_p(k, K):
        kw, kb, kg, kbt = jax.random.split(k, 4)
        return {
            "w": jax.random.normal(kw, (C, C, K), jnp.float32) / jnp.sqrt(C * K),
            "cb": 0.1 * jax.random.normal(kb, (C,), jnp.float32),
            "gamma": 1.0 + 0.1 * jax.random.normal(kg, (C,), jnp.float32),
            "beta": 0.1 * jax.random.normal(kbt, (C,), jnp.float32),
        }
    keys = jax.random.split(key, 12)
    nd = [conv_p(keys[i], 3) for i in range(7)]       # 7 non-downsample, k=3
    ds = [conv_p(keys[7 + i], 4) for i in range(5)]   # 5 downsample, k=4 s=2
    return {"nd": nd, "ds": ds}


if __name__ == "__main__":
    key = jax.random.PRNGKey(0)
    kx, kp = jax.random.split(key)

    # Small shapes: L must be divisible by 2**5 = 32 for the 5 downsamples.
    N, C, L = 2, 32, 64
    x = jax.random.normal(kx, (N, C, L), jnp.float32)   # PyTorch-style (N, C, L)
    params = init_params(kp, C)

    # Exact-path check (f32 conv matmuls) vs f32 reference.
    fwd_f32 = jax.jit(functools.partial(unet1d_gan_forward, use_bf16_matmul=False))
    out_f32 = jax.block_until_ready(fwd_f32(x, params))
    assert out_f32.shape == (N, C, L)
    ref_f32 = unet1d_gan_reference(x, params, jnp.float32)
    err_f32 = float(jnp.max(jnp.abs(out_f32 - ref_f32)))
    assert err_f32 < 2e-3, f"f32 mismatch vs reference: {err_f32}"

    # bf16-MXU path (default), checked against a bf16-conv reference.
    fwd_bf16 = jax.jit(functools.partial(unet1d_gan_forward, use_bf16_matmul=True))
    out_bf16 = jax.block_until_ready(fwd_bf16(x, params))
    ref_bf16 = unet1d_gan_reference(x, params, jnp.bfloat16)
    err_bf16 = float(jnp.max(jnp.abs(out_bf16 - ref_bf16)))
    assert err_bf16 < 5e-2, f"bf16 mismatch vs bf16 reference: {err_bf16}"

    print("KERNEL_OK")
</pallas_src>

<mosaic_0001>
module attributes {stable_mosaic.version = 11 : i64} {
  func.func @unet1d_gan_kernel(%arg0: memref<128x32xf32, #tpu.memory_space<vmem>>, %arg1: memref<7x96x32xf32, #tpu.memory_space<vmem>>, %arg2: memref<7x1x32xf32, #tpu.memory_space<vmem>>, %arg3: memref<7x1x32xf32, #tpu.memory_space<vmem>>, %arg4: memref<5x128x32xf32, #tpu.memory_space<vmem>>, %arg5: memref<5x1x32xf32, #tpu.memory_space<vmem>>, %arg6: memref<5x1x32xf32, #tpu.memory_space<vmem>>, %arg7: memref<128x32xf32, #tpu.memory_space<vmem>>, %arg8: memref<128x32xf32, #tpu.memory_space<vmem>>) attributes {dimension_semantics = [], scalar_prefetch = 0 : i64, scratch_operands = 1 : i64, tpu.core_type = #tpu.core_type<tc>} {
    %c0 = arith.constant 0 : index
    %c0_0 = arith.constant 0 : index
    %0 = vector.load %arg0[%c0, %c0_0] : memref<128x32xf32, #tpu.memory_space<vmem>>, vector<128x32xf32>
    %cst = arith.constant 0.000000e+00 : f32
    %1 = vector.broadcast %cst : f32 to vector<1x32xf32>
    %2 = vector.extract_strided_slice %0 {offsets = [0, 0], sizes = [127, 32], strides = [1, 1]} : vector<128x32xf32> to vector<127x32xf32>
    %3 = tpu.concatenate %1, %2 in 0 : vector<1x32xf32>, vector<127x32xf32> -> vector<128x32xf32>
    %4 = tpu.iota {dimensions = array<i32: 0>} : vector<128x1xi32>
    %c64_i32 = arith.constant 64 : i32
    %5 = vector.broadcast %c64_i32 : i32 to vector<128x1xi32>
    %6 = arith.cmpi ne, %4, %5 : vector<128x1xi32>
    %cst_1 = arith.constant 0.000000e+00 : f32
    %7 = vector.shape_cast %6 : vector<128x1xi1> to vector<128x1xi1>
    %8 = vector.broadcast %7 : vector<128x1xi1> to vector<128x32xi1>
    %9 = vector.broadcast %cst_1 : f32 to vector<128x32xf32>
    %10 = arith.select %8, %3, %9 : vector<128x32xi1>, vector<128x32xf32>
    %cst_2 = arith.constant 0.000000e+00 : f32
    %11 = vector.broadcast %cst_2 : f32 to vector<1x32xf32>
    %12 = vector.extract_strided_slice %0 {offsets = [1, 0], sizes = [127, 32], strides = [1, 1]} : vector<128x32xf32> to vector<127x32xf32>
    %13 = tpu.concatenate %12, %11 in 0 : vector<127x32xf32>, vector<1x32xf32> -> vector<128x32xf32>
    %c63_i32 = arith.constant 63 : i32
    %14 = vector.broadcast %c63_i32 : i32 to vector<128x1xi32>
    %15 = arith.cmpi ne, %4, %14 : vector<128x1xi32>
    %cst_3 = arith.constant 0.000000e+00 : f32
    %16 = vector.shape_cast %15 : vector<128x1xi1> to vector<128x1xi1>
    %17 = vector.broadcast %16 : vector<128x1xi1> to vector<128x32xi1>
    %18 = vector.broadcast %cst_3 : f32 to vector<128x32xf32>
    %19 = arith.select %17, %13, %18 : vector<128x32xi1>, vector<128x32xf32>
    %20 = tpu.concatenate %10, %0, %19 in 1 : vector<128x32xf32>, vector<128x32xf32>, vector<128x32xf32> -> vector<128x96xf32>
    %c0_4 = arith.constant 0 : index
    %c0_5 = arith.constant 0 : index
    %c0_6 = arith.constant 0 : index
    %21 = vector.load %arg1[%c0_4, %c0_5, %c0_6] : memref<7x96x32xf32, #tpu.memory_space<vmem>>, vector<1x96x32xf32>
    %22 = vector.shape_cast %21 : vector<1x96x32xf32> to vector<96x32xf32>
    %cst_7 = arith.constant dense<0.000000e+00> : vector<128x32xf32>
    %23 = tpu.matmul %20, %22, %cst_7 {dimension_numbers = #tpu.dot_dimension_numbers<[1], [0], [0], [1], [0, 0, 1, 1], [], []>} : vector<128x96xf32>, vector<96x32xf32>, vector<128x32xf32> -> vector<128x32xf32>
    %c0_8 = arith.constant 0 : index
    %c0_9 = arith.constant 0 : index
    %c0_10 = arith.constant 0 : index
    %24 = vector.load %arg2[%c0_8, %c0_9, %c0_10] : memref<7x1x32xf32, #tpu.memory_space<vmem>>, vector<1x1x32xf32>
    %25 = vector.shape_cast %24 : vector<1x1x32xf32> to vector<1x32xf32>
    %c0_11 = arith.constant 0 : index
    %c0_12 = arith.constant 0 : index
    %c0_13 = arith.constant 0 : index
    %26 = vector.load %arg3[%c0_11, %c0_12, %c0_13] : memref<7x1x32xf32, #tpu.memory_space<vmem>>, vector<1x1x32xf32>
    %27 = vector.shape_cast %26 : vector<1x1x32xf32> to vector<1x32xf32>
    %cst_14 = arith.constant dense<0.000000e+00> : vector<32xf32>
    %28 = vector.multi_reduction <add>, %23, %cst_14 [0] : vector<128x32xf32> to vector<32xf32>
    %29 = vector.shape_cast %28 : vector<32xf32> to vector<1x32xf32>
    %cst_15 = arith.constant 7.812500e-03 : f32
    %30 = vector.broadcast %cst_15 : f32 to vector<1x32xf32>
    %31 = arith.mulf %29, %30 : vector<1x32xf32>
    %32 = vector.broadcast %31 : vector<1x32xf32> to vector<128x32xf32>
    %33 = arith.subf %23, %32 : vector<128x32xf32>
    %34 = arith.mulf %33, %33 : vector<128x32xf32>
    %cst_16 = arith.constant dense<0.000000e+00> : vector<32xf32>
    %35 = vector.multi_reduction <add>, %34, %cst_16 [0] : vector<128x32xf32> to vector<32xf32>
    %36 = vector.shape_cast %35 : vector<32xf32> to vector<1x32xf32>
    %cst_17 = arith.constant 7.812500e-03 : f32
    %37 = vector.broadcast %cst_17 : f32 to vector<1x32xf32>
    %38 = arith.mulf %36, %37 : vector<1x32xf32>
    %cst_18 = arith.constant 9.99999974E-6 : f32
    %39 = vector.broadcast %cst_18 : f32 to vector<1x32xf32>
    %40 = arith.addf %38, %39 : vector<1x32xf32>
    %41 = math.rsqrt %40 : vector<1x32xf32>
    %42 = vector.broadcast %41 : vector<1x32xf32> to vector<128x32xf32>
    %43 = arith.mulf %33, %42 : vector<128x32xf32>
    %44 = vector.broadcast %25 : vector<1x32xf32> to vector<128x32xf32>
    %45 = arith.mulf %43, %44 : vector<128x32xf32>
    %46 = vector.broadcast %27 : vector<1x32xf32> to vector<128x32xf32>
    %47 = arith.addf %45, %46 : vector<128x32xf32>
    %cst_19 = arith.constant 0.000000e+00 : f32
    %48 = vector.broadcast %cst_19 : f32 to vector<128x32xf32>
    %49 = arith.maximumf %47, %48 : vector<128x32xf32>
    %cst_20 = arith.constant 0.000000e+00 : f32
    %50 = vector.broadcast %cst_20 : f32 to vector<1x32xf32>
    %51 = vector.extract_strided_slice %49 {offsets = [0, 0], sizes = [127, 32], strides = [1, 1]} : vector<128x32xf32> to vector<127x32xf32>
    %52 = tpu.concatenate %50, %51 in 0 : vector<1x32xf32>, vector<127x32xf32> -> vector<128x32xf32>
    %c64_i32_21 = arith.constant 64 : i32
    %53 = vector.broadcast %c64_i32_21 : i32 to vector<128x1xi32>
    %54 = arith.cmpi ne, %4, %53 : vector<128x1xi32>
    %cst_22 = arith.constant 0.000000e+00 : f32
    %55 = vector.shape_cast %54 : vector<128x1xi1> to vector<128x1xi1>
    %56 = vector.broadcast %55 : vector<128x1xi1> to vector<128x32xi1>
    %57 = vector.broadcast %cst_22 : f32 to vector<128x32xf32>
    %58 = arith.select %56, %52, %57 : vector<128x32xi1>, vector<128x32xf32>
    %cst_23 = arith.constant 0.000000e+00 : f32
    %59 = vector.broadcast %cst_23 : f32 to vector<1x32xf32>
    %60 = vector.extract_strided_slice %49 {offsets = [1, 0], sizes = [127, 32], strides = [1, 1]} : vector<128x32xf32> to vector<127x32xf32>
    %61 = tpu.concatenate %60, %59 in 0 : vector<127x32xf32>, vector<1x32xf32> -> vector<128x32xf32>
    %c63_i32_24 = arith.constant 63 : i32
    %62 = vector.broadcast %c63_i32_24 : i32 to vector<128x1xi32>
    %63 = arith.cmpi ne, %4, %62 : vector<128x1xi32>
    %cst_25 = arith.constant 0.000000e+00 : f32
    %64 = vector.shape_cast %63 : vector<128x1xi1> to vector<128x1xi1>
    %65 = vector.broadcast %64 : vector<128x1xi1> to vector<128x32xi1>
    %66 = vector.broadcast %cst_25 : f32 to vector<128x32xf32>
    %67 = arith.select %65, %61, %66 : vector<128x32xi1>, vector<128x32xf32>
    %68 = tpu.concatenate %58, %49, %67 in 1 : vector<128x32xf32>, vector<128x32xf32>, vector<128x32xf32> -> vector<128x96xf32>
    %c1 = arith.constant 1 : index
    %c0_26 = arith.constant 0 : index
    %c0_27 = arith.constant 0 : index
    %69 = vector.load %arg1[%c1, %c0_26, %c0_27] : memref<7x96x32xf32, #tpu.memory_space<vmem>>, vector<1x96x32xf32>
    %70 = vector.shape_cast %69 : vector<1x96x32xf32> to vector<96x32xf32>
    %cst_28 = arith.constant dense<0.000000e+00> : vector<128x32xf32>
    %71 = tpu.matmul %68, %70, %cst_28 {dimension_numbers = #tpu.dot_dimension_numbers<[1], [0], [0], [1], [0, 0, 1, 1], [], []>} : vector<128x96xf32>, vector<96x32xf32>, vector<128x32xf32> -> vector<128x32xf32>
    %c1_29 = arith.constant 1 : index
    %c0_30 = arith.constant 0 : index
    %c0_31 = arith.constant 0 : index
    %72 = vector.load %arg2[%c1_29, %c0_30, %c0_31] : memref<7x1x32xf32, #tpu.memory_space<vmem>>, vector<1x1x32xf32>
    %73 = vector.shape_cast %72 : vector<1x1x32xf32> to vector<1x32xf32>
    %c1_32 = arith.constant 1 : index
    %c0_33 = arith.constant 0 : index
    %c0_34 = arith.constant 0 : index
    %74 = vector.load %arg3[%c1_32, %c0_33, %c0_34] : memref<7x1x32xf32, #tpu.memory_space<vmem>>, vector<1x1x32xf32>
    %75 = vector.shape_cast %74 : vector<1x1x32xf32> to vector<1x32xf32>
    %cst_35 = arith.constant dense<0.000000e+00> : vector<32xf32>
    %76 = vector.multi_reduction <add>, %71, %cst_35 [0] : vector<128x32xf32> to vector<32xf32>
    %77 = vector.shape_cast %76 : vector<32xf32> to vector<1x32xf32>
    %cst_36 = arith.constant 7.812500e-03 : f32
    %78 = vector.broadcast %cst_36 : f32 to vector<1x32xf32>
    %79 = arith.mulf %77, %78 : vector<1x32xf32>
    %80 = vector.broadcast %79 : vector<1x32xf32> to vector<128x32xf32>
    %81 = arith.subf %71, %80 : vector<128x32xf32>
    %82 = arith.mulf %81, %81 : vector<128x32xf32>
    %cst_37 = arith.constant dense<0.000000e+00> : vector<32xf32>
    %83 = vector.multi_reduction <add>, %82, %cst_37 [0] : vector<128x32xf32> to vector<32xf32>
    %84 = vector.shape_cast %83 : vector<32xf32> to vector<1x32xf32>
    %cst_38 = arith.constant 7.812500e-03 : f32
    %85 = vector.broadcast %cst_38 : f32 to vector<1x32xf32>
    %86 = arith.mulf %84, %85 : vector<1x32xf32>
    %cst_39 = arith.constant 9.99999974E-6 : f32
    %87 = vector.broadcast %cst_39 : f32 to vector<1x32xf32>
    %88 = arith.addf %86, %87 : vector<1x32xf32>
    %89 = math.rsqrt %88 : vector<1x32xf32>
    %90 = vector.broadcast %89 : vector<1x32xf32> to vector<128x32xf32>
    %91 = arith.mulf %81, %90 : vector<128x32xf32>
    %92 = vector.broadcast %73 : vector<1x32xf32> to vector<128x32xf32>
    %93 = arith.mulf %91, %92 : vector<128x32xf32>
    %94 = vector.broadcast %75 : vector<1x32xf32> to vector<128x32xf32>
    %95 = arith.addf %93, %94 : vector<128x32xf32>
    %cst_40 = arith.constant 0.000000e+00 : f32
    %96 = vector.broadcast %cst_40 : f32 to vector<128x32xf32>
    %97 = arith.maximumf %95, %96 : vector<128x32xf32>
    %c0_41 = arith.constant 0 : index
    %c0_42 = arith.constant 0 : index
    %98 = vector.load %arg8[%c0_41, %c0_42] : memref<128x32xf32, #tpu.memory_space<vmem>>, vector<128x32xf32>
    tpu.vector_store %arg8[%c0_41, %c0_42], %97 {strides = array<i32>} : memref<128x32xf32, #tpu.memory_space<vmem>>, vector<128x32xf32>,
    %c0_43 = arith.constant 0 : index
    %c0_44 = arith.constant 0 : index
    %99 = tpu.strided_load %arg8[%c0_43, %c0_44] {strides = array<i32: 2, 1>} : memref<128x32xf32, #tpu.memory_space<vmem>>, vector<64x32xf32>
    %c1_45 = arith.constant 1 : index
    %c0_46 = arith.constant 0 : index
    %100 = tpu.strided_load %arg8[%c1_45, %c0_46] {strides = array<i32: 2, 1>} : memref<128x32xf32, #tpu.memory_space<vmem>>, vector<64x32xf32>
    %cst_47 = arith.constant 0.000000e+00 : f32
    %101 = vector.broadcast %cst_47 : f32 to vector<1x32xf32>
    %102 = vector.extract_strided_slice %100 {offsets = [0, 0], sizes = [63, 32], strides = [1, 1]} : vector<64x32xf32> to vector<63x32xf32>
    %103 = tpu.concatenate %101, %102 in 0 : vector<1x32xf32>, vector<63x32xf32> -> vector<64x32xf32>
    %104 = tpu.iota {dimensions = array<i32: 0>} : vector<64x1xi32>
    %c32_i32 = arith.constant 32 : i32
    %105 = vector.broadcast %c32_i32 : i32 to vector<64x1xi32>
    %106 = arith.cmpi ne, %104, %105 : vector<64x1xi32>
    %cst_48 = arith.constant 0.000000e+00 : f32
    %107 = vector.shape_cast %106 : vector<64x1xi1> to vector<64x1xi1>
    %108 = vector.broadcast %107 : vector<64x1xi1> to vector<64x32xi1>
    %109 = vector.broadcast %cst_48 : f32 to vector<64x32xf32>
    %110 = arith.select %108, %103, %109 : vector<64x32xi1>, vector<64x32xf32>
    %cst_49 = arith.constant 0.000000e+00 : f32
    %111 = vector.broadcast %cst_49 : f32 to vector<1x32xf32>
    %112 = vector.extract_strided_slice %99 {offsets = [1, 0], sizes = [63, 32], strides = [1, 1]} : vector<64x32xf32> to vector<63x32xf32>
    %113 = tpu.concatenate %112, %111 in 0 : vector<63x32xf32>, vector<1x32xf32> -> vector<64x32xf32>
    %c31_i32 = arith.constant 31 : i32
    %114 = vector.broadcast %c31_i32 : i32 to vector<64x1xi32>
    %115 = arith.cmpi ne, %104, %114 : vector<64x1xi32>
    %cst_50 = arith.constant 0.000000e+00 : f32
    %116 = vector.shape_cast %115 : vector<64x1xi1> to vector<64x1xi1>
    %117 = vector.broadcast %116 : vector<64x1xi1> to vector<64x32xi1>
    %118 = vector.broadcast %cst_50 : f32 to vector<64x32xf32>
    %119 = arith.select %117, %113, %118 : vector<64x32xi1>, vector<64x32xf32>
    %120 = tpu.concatenate %110, %99, %100, %119 in 1 : vector<64x32xf32>, vector<64x32xf32>, vector<64x32xf32>, vector<64x32xf32> -> vector<64x128xf32>
    %c0_51 = arith.constant 0 : index
    %c0_52 = arith.constant 0 : index
    %c0_53 = arith.constant 0 : index
    %121 = vector.load %arg4[%c0_51, %c0_52, %c0_53] : memref<5x128x32xf32, #tpu.memory_space<vmem>>, vector<1x128x32xf32>
    %122 = vector.shape_cast %121 : vector<1x128x32xf32> to vector<128x32xf32>
    %cst_54 = arith.constant dense<0.000000e+00> : vector<64x32xf32>
    %123 = tpu.matmul %120, %122, %cst_54 {dimension_numbers = #tpu.dot_dimension_numbers<[1], [0], [0], [1], [0, 0, 1, 1], [], []>} : vector<64x128xf32>, vector<128x32xf32>, vector<64x32xf32> -> vector<64x32xf32>
    %c0_55 = arith.constant 0 : index
    %c0_56 = arith.constant 0 : index
    %c0_57 = arith.constant 0 : index
    %124 = vector.load %arg5[%c0_55, %c0_56, %c0_57] : memref<5x1x32xf32, #tpu.memory_space<vmem>>, vector<1x1x32xf32>
    %125 = vector.shape_cast %124 : vector<1x1x32xf32> to vector<1x32xf32>
    %c0_58 = arith.constant 0 : index
    %c0_59 = arith.constant 0 : index
    %c0_60 = arith.constant 0 : index
    %126 = vector.load %arg6[%c0_58, %c0_59, %c0_60] : memref<5x1x32xf32, #tpu.memory_space<vmem>>, vector<1x1x32xf32>
    %127 = vector.shape_cast %126 : vector<1x1x32xf32> to vector<1x32xf32>
    %cst_61 = arith.constant dense<0.000000e+00> : vector<32xf32>
    %128 = vector.multi_reduction <add>, %123, %cst_61 [0] : vector<64x32xf32> to vector<32xf32>
    %129 = vector.shape_cast %128 : vector<32xf32> to vector<1x32xf32>
    %cst_62 = arith.constant 1.562500e-02 : f32
    %130 = vector.broadcast %cst_62 : f32 to vector<1x32xf32>
    %131 = arith.mulf %129, %130 : vector<1x32xf32>
    %132 = vector.broadcast %131 : vector<1x32xf32> to vector<64x32xf32>
    %133 = arith.subf %123, %132 : vector<64x32xf32>
    %134 = arith.mulf %133, %133 : vector<64x32xf32>
    %cst_63 = arith.constant dense<0.000000e+00> : vector<32xf32>
    %135 = vector.multi_reduction <add>, %134, %cst_63 [0] : vector<64x32xf32> to vector<32xf32>
    %136 = vector.shape_cast %135 : vector<32xf32> to vector<1x32xf32>
    %cst_64 = arith.constant 1.562500e-02 : f32
    %137 = vector.broadcast %cst_64 : f32 to vector<1x32xf32>
    %138 = arith.mulf %136, %137 : vector<1x32xf32>
    %cst_65 = arith.constant 9.99999974E-6 : f32
    %139 = vector.broadcast %cst_65 : f32 to vector<1x32xf32>
    %140 = arith.addf %138, %139 : vector<1x32xf32>
    %141 = math.rsqrt %140 : vector<1x32xf32>
    %142 = vector.broadcast %141 : vector<1x32xf32> to vector<64x32xf32>
    %143 = arith.mulf %133, %142 : vector<64x32xf32>
    %144 = vector.broadcast %125 : vector<1x32xf32> to vector<64x32xf32>
    %145 = arith.mulf %143, %144 : vector<64x32xf32>
    %146 = vector.broadcast %127 : vector<1x32xf32> to vector<64x32xf32>
    %147 = arith.addf %145, %146 : vector<64x32xf32>
    %cst_66 = arith.constant 0.000000e+00 : f32
    %148 = vector.broadcast %cst_66 : f32 to vector<64x32xf32>
    %149 = arith.maximumf %147, %148 : vector<64x32xf32>
    %c0_67 = arith.constant 0 : index
    %c0_68 = arith.constant 0 : index
    %150 = vector.load %arg8[%c0_67, %c0_68] : memref<128x32xf32, #tpu.memory_space<vmem>>, vector<64x32xf32>
    tpu.vector_store %arg8[%c0_67, %c0_68], %149 {strides = array<i32>} : memref<128x32xf32, #tpu.memory_space<vmem>>, vector<64x32xf32>,
    %c0_69 = arith.constant 0 : index
    %c0_70 = arith.constant 0 : index
    %151 = tpu.strided_load %arg8[%c0_69, %c0_70] {strides = array<i32: 2, 1>} : memref<128x32xf32, #tpu.memory_space<vmem>>, vector<32x32xf32>
    %c1_71 = arith.constant 1 : index
    %c0_72 = arith.constant 0 : index
    %152 = tpu.strided_load %arg8[%c1_71, %c0_72] {strides = array<i32: 2, 1>} : memref<128x32xf32, #tpu.memory_space<vmem>>, vector<32x32xf32>
    %cst_73 = arith.constant 0.000000e+00 : f32
    %153 = vector.broadcast %cst_73 : f32 to vector<1x32xf32>
    %154 = vector.extract_strided_slice %152 {offsets = [0, 0], sizes = [31, 32], strides = [1, 1]} : vector<32x32xf32> to vector<31x32xf32>
    %155 = tpu.concatenate %153, %154 in 0 : vector<1x32xf32>, vector<31x32xf32> -> vector<32x32xf32>
    %156 = tpu.iota {dimensions = array<i32: 0>} : vector<32x1xi32>
    %c16_i32 = arith.constant 16 : i32
    %157 = vector.broadcast %c16_i32 : i32 to vector<32x1xi32>
    %158 = arith.cmpi ne, %156, %157 : vector<32x1xi32>
    %cst_74 = arith.constant 0.000000e+00 : f32
    %159 = vector.shape_cast %158 : vector<32x1xi1> to vector<32x1xi1>
    %160 = vector.broadcast %159 : vector<32x1xi1> to vector<32x32xi1>
    %161 = vector.broadcast %cst_74 : f32 to vector<32x32xf32>
    %162 = arith.select %160, %155, %161 : vector<32x32xi1>, vector<32x32xf32>
    %cst_75 = arith.constant 0.000000e+00 : f32
    %163 = vector.broadcast %cst_75 : f32 to vector<1x32xf32>
    %164 = vector.extract_strided_slice %151 {offsets = [1, 0], sizes = [31, 32], strides = [1, 1]} : vector<32x32xf32> to vector<31x32xf32>
    %165 = tpu.concatenate %164, %163 in 0 : vector<31x32xf32>, vector<1x32xf32> -> vector<32x32xf32>
    %c15_i32 = arith.constant 15 : i32
    %166 = vector.broadcast %c15_i32 : i32 to vector<32x1xi32>
    %167 = arith.cmpi ne, %156, %166 : vector<32x1xi32>
    %cst_76 = arith.constant 0.000000e+00 : f32
    %168 = vector.shape_cast %167 : vector<32x1xi1> to vector<32x1xi1>
    %169 = vector.broadcast %168 : vector<32x1xi1> to vector<32x32xi1>
    %170 = vector.broadcast %cst_76 : f32 to vector<32x32xf32>
    %171 = arith.select %169, %165, %170 : vector<32x32xi1>, vector<32x32xf32>
    %172 = tpu.concatenate %162, %151, %152, %171 in 1 : vector<32x32xf32>, vector<32x32xf32>, vector<32x32xf32>, vector<32x32xf32> -> vector<32x128xf32>
    %c1_77 = arith.constant 1 : index
    %c0_78 = arith.constant 0 : index
    %c0_79 = arith.constant 0 : index
    %173 = vector.load %arg4[%c1_77, %c0_78, %c0_79] : memref<5x128x32xf32, #tpu.memory_space<vmem>>, vector<1x128x32xf32>
    %174 = vector.shape_cast %173 : vector<1x128x32xf32> to vector<128x32xf32>
    %cst_80 = arith.constant dense<0.000000e+00> : vector<32x32xf32>
    %175 = tpu.matmul %172, %174, %cst_80 {dimension_numbers = #tpu.dot_dimension_numbers<[1], [0], [0], [1], [0, 0, 1, 1], [], []>} : vector<32x128xf32>, vector<128x32xf32>, vector<32x32xf32> -> vector<32x32xf32>
    %c1_81 = arith.constant 1 : index
    %c0_82 = arith.constant 0 : index
    %c0_83 = arith.constant 0 : index
    %176 = vector.load %arg5[%c1_81, %c0_82, %c0_83] : memref<5x1x32xf32, #tpu.memory_space<vmem>>, vector<1x1x32xf32>
    %177 = vector.shape_cast %176 : vector<1x1x32xf32> to vector<1x32xf32>
    %c1_84 = arith.constant 1 : index
    %c0_85 = arith.constant 0 : index
    %c0_86 = arith.constant 0 : index
    %178 = vector.load %arg6[%c1_84, %c0_85, %c0_86] : memref<5x1x32xf32, #tpu.memory_space<vmem>>, vector<1x1x32xf32>
    %179 = vector.shape_cast %178 : vector<1x1x32xf32> to vector<1x32xf32>
    %cst_87 = arith.constant dense<0.000000e+00> : vector<32xf32>
    %180 = vector.multi_reduction <add>, %175, %cst_87 [0] : vector<32x32xf32> to vector<32xf32>
    %181 = vector.shape_cast %180 : vector<32xf32> to vector<1x32xf32>
    %cst_88 = arith.constant 3.125000e-02 : f32
    %182 = vector.broadcast %cst_88 : f32 to vector<1x32xf32>
    %183 = arith.mulf %181, %182 : vector<1x32xf32>
    %184 = vector.broadcast %183 : vector<1x32xf32> to vector<32x32xf32>
    %185 = arith.subf %175, %184 : vector<32x32xf32>
    %186 = arith.mulf %185, %185 : vector<32x32xf32>
    %cst_89 = arith.constant dense<0.000000e+00> : vector<32xf32>
    %187 = vector.multi_reduction <add>, %186, %cst_89 [0] : vector<32x32xf32> to vector<32xf32>
    %188 = vector.shape_cast %187 : vector<32xf32> to vector<1x32xf32>
    %cst_90 = arith.constant 3.125000e-02 : f32
    %189 = vector.broadcast %cst_90 : f32 to vector<1x32xf32>
    %190 = arith.mulf %188, %189 : vector<1x32xf32>
    %cst_91 = arith.constant 9.99999974E-6 : f32
    %191 = vector.broadcast %cst_91 : f32 to vector<1x32xf32>
    %192 = arith.addf %190, %191 : vector<1x32xf32>
    %193 = math.rsqrt %192 : vector<1x32xf32>
    %194 = vector.broadcast %193 : vector<1x32xf32> to vector<32x32xf32>
    %195 = arith.mulf %185, %194 : vector<32x32xf32>
    %196 = vector.broadcast %177 : vector<1x32xf32> to vector<32x32xf32>
    %197 = arith.mulf %195, %196 : vector<32x32xf32>
    %198 = vector.broadcast %179 : vector<1x32xf32> to vector<32x32xf32>
    %199 = arith.addf %197, %198 : vector<32x32xf32>
    %cst_92 = arith.constant 0.000000e+00 : f32
    %200 = vector.broadcast %cst_92 : f32 to vector<32x32xf32>
    %201 = arith.maximumf %199, %200 : vector<32x32xf32>
    %c0_93 = arith.constant 0 : index
    %c0_94 = arith.constant 0 : index
    %202 = vector.load %arg8[%c0_93, %c0_94] : memref<128x32xf32, #tpu.memory_space<vmem>>, vector<32x32xf32>
    tpu.vector_store %arg8[%c0_93, %c0_94], %201 {strides = array<i32>} : memref<128x32xf32, #tpu.memory_space<vmem>>, vector<32x32xf32>,
    %c0_95 = arith.constant 0 : index
    %c0_96 = arith.constant 0 : index
    %203 = tpu.strided_load %arg8[%c0_95, %c0_96] {strides = array<i32: 2, 1>} : memref<128x32xf32, #tpu.memory_space<vmem>>, vector<16x32xf32>
    %c1_97 = arith.constant 1 : index
    %c0_98 = arith.constant 0 : index
    %204 = tpu.strided_load %arg8[%c1_97, %c0_98] {strides = array<i32: 2, 1>} : memref<128x32xf32, #tpu.memory_space<vmem>>, vector<16x32xf32>
    %cst_99 = arith.constant 0.000000e+00 : f32
    %205 = vector.broadcast %cst_99 : f32 to vector<1x32xf32>
    %206 = vector.extract_strided_slice %204 {offsets = [0, 0], sizes = [15, 32], strides = [1, 1]} : vector<16x32xf32> to vector<15x32xf32>
    %207 = tpu.concatenate %205, %206 in 0 : vector<1x32xf32>, vector<15x32xf32> -> vector<16x32xf32>
    %208 = tpu.iota {dimensions = array<i32: 0>} : vector<16x1xi32>
    %c8_i32 = arith.constant 8 : i32
    %209 = vector.broadcast %c8_i32 : i32 to vector<16x1xi32>
    %210 = arith.cmpi ne, %208, %209 : vector<16x1xi32>
    %cst_100 = arith.constant 0.000000e+00 : f32
    %211 = vector.shape_cast %210 : vector<16x1xi1> to vector<16x1xi1>
    %212 = vector.broadcast %211 : vector<16x1xi1> to vector<16x32xi1>
    %213 = vector.broadcast %cst_100 : f32 to vector<16x32xf32>
    %214 = arith.select %212, %207, %213 : vector<16x32xi1>, vector<16x32xf32>
    %cst_101 = arith.constant 0.000000e+00 : f32
    %215 = vector.broadcast %cst_101 : f32 to vector<1x32xf32>
    %216 = vector.extract_strided_slice %203 {offsets = [1, 0], sizes = [15, 32], strides = [1, 1]} : vector<16x32xf32> to vector<15x32xf32>
    %217 = tpu.concatenate %216, %215 in 0 : vector<15x32xf32>, vector<1x32xf32> -> vector<16x32xf32>
    %c7_i32 = arith.constant 7 : i32
    %218 = vector.broadcast %c7_i32 : i32 to vector<16x1xi32>
    %219 = arith.cmpi ne, %208, %218 : vector<16x1xi32>
    %cst_102 = arith.constant 0.000000e+00 : f32
    %220 = vector.shape_cast %219 : vector<16x1xi1> to vector<16x1xi1>
    %221 = vector.broadcast %220 : vector<16x1xi1> to vector<16x32xi1>
    %222 = vector.broadcast %cst_102 : f32 to vector<16x32xf32>
    %223 = arith.select %221, %217, %222 : vector<16x32xi1>, vector<16x32xf32>
    %224 = tpu.concatenate %214, %203, %204, %223 in 1 : vector<16x32xf32>, vector<16x32xf32>, vector<16x32xf32>, vector<16x32xf32> -> vector<16x128xf32>
    %c2 = arith.constant 2 : index
    %c0_103 = arith.constant 0 : index
    %c0_104 = arith.constant 0 : index
    %225 = vector.load %arg4[%c2, %c0_103, %c0_104] : memref<5x128x32xf32, #tpu.memory_space<vmem>>, vector<1x128x32xf32>
    %226 = vector.shape_cast %225 : vector<1x128x32xf32> to vector<128x32xf32>
    %cst_105 = arith.constant dense<0.000000e+00> : vector<16x32xf32>
    %227 = tpu.matmul %224, %226, %cst_105 {dimension_numbers = #tpu.dot_dimension_numbers<[1], [0], [0], [1], [0, 0, 1, 1], [], []>} : vector<16x128xf32>, vector<128x32xf32>, vector<16x32xf32> -> vector<16x32xf32>
    %c2_106 = arith.constant 2 : index
    %c0_107 = arith.constant 0 : index
    %c0_108 = arith.constant 0 : index
    %228 = vector.load %arg5[%c2_106, %c0_107, %c0_108] : memref<5x1x32xf32, #tpu.memory_space<vmem>>, vector<1x1x32xf32>
    %229 = vector.shape_cast %228 : vector<1x1x32xf32> to vector<1x32xf32>
    %c2_109 = arith.constant 2 : index
    %c0_110 = arith.constant 0 : index
    %c0_111 = arith.constant 0 : index
    %230 = vector.load %arg6[%c2_109, %c0_110, %c0_111] : memref<5x1x32xf32, #tpu.memory_space<vmem>>, vector<1x1x32xf32>
    %231 = vector.shape_cast %230 : vector<1x1x32xf32> to vector<1x32xf32>
    %cst_112 = arith.constant dense<0.000000e+00> : vector<32xf32>
    %232 = vector.multi_reduction <add>, %227, %cst_112 [0] : vector<16x32xf32> to vector<32xf32>
    %233 = vector.shape_cast %232 : vector<32xf32> to vector<1x32xf32>
    %cst_113 = arith.constant 6.250000e-02 : f32
    %234 = vector.broadcast %cst_113 : f32 to vector<1x32xf32>
    %235 = arith.mulf %233, %234 : vector<1x32xf32>
    %236 = vector.broadcast %235 : vector<1x32xf32> to vector<16x32xf32>
    %237 = arith.subf %227, %236 : vector<16x32xf32>
    %238 = arith.mulf %237, %237 : vector<16x32xf32>
    %cst_114 = arith.constant dense<0.000000e+00> : vector<32xf32>
    %239 = vector.multi_reduction <add>, %238, %cst_114 [0] : vector<16x32xf32> to vector<32xf32>
    %240 = vector.shape_cast %239 : vector<32xf32> to vector<1x32xf32>
    %cst_115 = arith.constant 6.250000e-02 : f32
    %241 = vector.broadcast %cst_115 : f32 to vector<1x32xf32>
    %242 = arith.mulf %240, %241 : vector<1x32xf32>
    %cst_116 = arith.constant 9.99999974E-6 : f32
    %243 = vector.broadcast %cst_116 : f32 to vector<1x32xf32>
    %244 = arith.addf %242, %243 : vector<1x32xf32>
    %245 = math.rsqrt %244 : vector<1x32xf32>
    %246 = vector.broadcast %245 : vector<1x32xf32> to vector<16x32xf32>
    %247 = arith.mulf %237, %246 : vector<16x32xf32>
    %248 = vector.broadcast %229 : vector<1x32xf32> to vector<16x32xf32>
    %249 = arith.mulf %247, %248 : vector<16x32xf32>
    %250 = vector.broadcast %231 : vector<1x32xf32> to vector<16x32xf32>
    %251 = arith.addf %249, %250 : vector<16x32xf32>
    %cst_117 = arith.constant 0.000000e+00 : f32
    %252 = vector.broadcast %cst_117 : f32 to vector<16x32xf32>
    %253 = arith.maximumf %251, %252 : vector<16x32xf32>
    %c0_118 = arith.constant 0 : index
    %c0_119 = arith.constant 0 : index
    %254 = vector.load %arg8[%c0_118, %c0_119] : memref<128x32xf32, #tpu.memory_space<vmem>>, vector<16x32xf32>
    tpu.vector_store %arg8[%c0_118, %c0_119], %253 {strides = array<i32>} : memref<128x32xf32, #tpu.memory_space<vmem>>, vector<16x32xf32>,
    %c0_120 = arith.constant 0 : index
    %c0_121 = arith.constant 0 : index
    %255 = tpu.strided_load %arg8[%c0_120, %c0_121] {strides = array<i32: 2, 1>} : memref<128x32xf32, #tpu.memory_space<vmem>>, vector<8x32xf32>
    %c1_122 = arith.constant 1 : index
    %c0_123 = arith.constant 0 : index
    %256 = tpu.strided_load %arg8[%c1_122, %c0_123] {strides = array<i32: 2, 1>} : memref<128x32xf32, #tpu.memory_space<vmem>>, vector<8x32xf32>
    %cst_124 = arith.constant 0.000000e+00 : f32
    %257 = vector.broadcast %cst_124 : f32 to vector<1x32xf32>
    %258 = vector.extract_strided_slice %256 {offsets = [0, 0], sizes = [7, 32], strides = [1, 1]} : vector<8x32xf32> to vector<7x32xf32>
    %259 = tpu.concatenate %257, %258 in 0 : vector<1x32xf32>, vector<7x32xf32> -> vector<8x32xf32>
    %260 = tpu.iota {dimensions = array<i32: 0>} : vector<8x1xi32>
    %c4_i32 = arith.constant 4 : i32
    %261 = vector.broadcast %c4_i32 : i32 to vector<8x1xi32>
    %262 = arith.cmpi ne, %260, %261 : vector<8x1xi32>
    %cst_125 = arith.constant 0.000000e+00 : f32
    %263 = vector.shape_cast %262 : vector<8x1xi1> to vector<8x1xi1>
    %264 = vector.broadcast %263 : vector<8x1xi1> to vector<8x32xi1>
    %265 = vector.broadcast %cst_125 : f32 to vector<8x32xf32>
    %266 = arith.select %264, %259, %265 : vector<8x32xi1>, vector<8x32xf32>
    %cst_126 = arith.constant 0.000000e+00 : f32
    %267 = vector.broadcast %cst_126 : f32 to vector<1x32xf32>
    %268 = vector.extract_strided_slice %255 {offsets = [1, 0], sizes = [7, 32], strides = [1, 1]} : vector<8x32xf32> to vector<7x32xf32>
    %269 = tpu.concatenate %268, %267 in 0 : vector<7x32xf32>, vector<1x32xf32> -> vector<8x32xf32>
    %c3_i32 = arith.constant 3 : i32
    %270 = vector.broadcast %c3_i32 : i32 to vector<8x1xi32>
    %271 = arith.cmpi ne, %260, %270 : vector<8x1xi32>
    %cst_127 = arith.constant 0.000000e+00 : f32
    %272 = vector.shape_cast %271 : vector<8x1xi1> to vector<8x1xi1>
    %273 = vector.broadcast %272 : vector<8x1xi1> to vector<8x32xi1>
    %274 = vector.broadcast %cst_127 : f32 to vector<8x32xf32>
    %275 = arith.select %273, %269, %274 : vector<8x32xi1>, vector<8x32xf32>
    %276 = tpu.concatenate %266, %255, %256, %275 in 1 : vector<8x32xf32>, vector<8x32xf32>, vector<8x32xf32>, vector<8x32xf32> -> vector<8x128xf32>
    %c3 = arith.constant 3 : index
    %c0_128 = arith.constant 0 : index
    %c0_129 = arith.constant 0 : index
    %277 = vector.load %arg4[%c3, %c0_128, %c0_129] : memref<5x128x32xf32, #tpu.memory_space<vmem>>, vector<1x128x32xf32>
    %278 = vector.shape_cast %277 : vector<1x128x32xf32> to vector<128x32xf32>
    %cst_130 = arith.constant dense<0.000000e+00> : vector<8x32xf32>
    %279 = tpu.matmul %276, %278, %cst_130 {dimension_numbers = #tpu.dot_dimension_numbers<[1], [0], [0], [1], [0, 0, 1, 1], [], []>} : vector<8x128xf32>, vector<128x32xf32>, vector<8x32xf32> -> vector<8x32xf32>
    %c3_131 = arith.constant 3 : index
    %c0_132 = arith.constant 0 : index
    %c0_133 = arith.constant 0 : index
    %280 = vector.load %arg5[%c3_131, %c0_132, %c0_133] : memref<5x1x32xf32, #tpu.memory_space<vmem>>, vector<1x1x32xf32>
    %281 = vector.shape_cast %280 : vector<1x1x32xf32> to vector<1x32xf32>
    %c3_134 = arith.constant 3 : index
    %c0_135 = arith.constant 0 : index
    %c0_136 = arith.constant 0 : index
    %282 = vector.load %arg6[%c3_134, %c0_135, %c0_136] : memref<5x1x32xf32, #tpu.memory_space<vmem>>, vector<1x1x32xf32>
    %283 = vector.shape_cast %282 : vector<1x1x32xf32> to vector<1x32xf32>
    %cst_137 = arith.constant dense<0.000000e+00> : vector<32xf32>
    %284 = vector.multi_reduction <add>, %279, %cst_137 [0] : vector<8x32xf32> to vector<32xf32>
    %285 = vector.shape_cast %284 : vector<32xf32> to vector<1x32xf32>
    %cst_138 = arith.constant 1.250000e-01 : f32
    %286 = vector.broadcast %cst_138 : f32 to vector<1x32xf32>
    %287 = arith.mulf %285, %286 : vector<1x32xf32>
    %288 = vector.broadcast %287 : vector<1x32xf32> to vector<8x32xf32>
    %289 = arith.subf %279, %288 : vector<8x32xf32>
    %290 = arith.mulf %289, %289 : vector<8x32xf32>
    %cst_139 = arith.constant dense<0.000000e+00> : vector<32xf32>
    %291 = vector.multi_reduction <add>, %290, %cst_139 [0] : vector<8x32xf32> to vector<32xf32>
    %292 = vector.shape_cast %291 : vector<32xf32> to vector<1x32xf32>
    %cst_140 = arith.constant 1.250000e-01 : f32
    %293 = vector.broadcast %cst_140 : f32 to vector<1x32xf32>
    %294 = arith.mulf %292, %293 : vector<1x32xf32>
    %cst_141 = arith.constant 9.99999974E-6 : f32
    %295 = vector.broadcast %cst_141 : f32 to vector<1x32xf32>
    %296 = arith.addf %294, %295 : vector<1x32xf32>
    %297 = math.rsqrt %296 : vector<1x32xf32>
    %298 = vector.broadcast %297 : vector<1x32xf32> to vector<8x32xf32>
    %299 = arith.mulf %289, %298 : vector<8x32xf32>
    %300 = vector.broadcast %281 : vector<1x32xf32> to vector<8x32xf32>
    %301 = arith.mulf %299, %300 : vector<8x32xf32>
    %302 = vector.broadcast %283 : vector<1x32xf32> to vector<8x32xf32>
    %303 = arith.addf %301, %302 : vector<8x32xf32>
    %cst_142 = arith.constant 0.000000e+00 : f32
    %304 = vector.broadcast %cst_142 : f32 to vector<8x32xf32>
    %305 = arith.maximumf %303, %304 : vector<8x32xf32>
    %c0_143 = arith.constant 0 : index
    %c0_144 = arith.constant 0 : index
    %306 = vector.load %arg8[%c0_143, %c0_144] : memref<128x32xf32, #tpu.memory_space<vmem>>, vector<8x32xf32>
    tpu.vector_store %arg8[%c0_143, %c0_144], %305 {strides = array<i32>} : memref<128x32xf32, #tpu.memory_space<vmem>>, vector<8x32xf32>,
    %c0_145 = arith.constant 0 : index
    %c0_146 = arith.constant 0 : index
    %307 = tpu.strided_load %arg8[%c0_145, %c0_146] {strides = array<i32: 2, 1>} : memref<128x32xf32, #tpu.memory_space<vmem>>, vector<4x32xf32>
    %c1_147 = arith.constant 1 : index
    %c0_148 = arith.constant 0 : index
    %308 = tpu.strided_load %arg8[%c1_147, %c0_148] {strides = array<i32: 2, 1>} : memref<128x32xf32, #tpu.memory_space<vmem>>, vector<4x32xf32>
    %cst_149 = arith.constant 0.000000e+00 : f32
    %309 = vector.broadcast %cst_149 : f32 to vector<1x32xf32>
    %310 = vector.extract_strided_slice %308 {offsets = [0, 0], sizes = [3, 32], strides = [1, 1]} : vector<4x32xf32> to vector<3x32xf32>
    %311 = tpu.concatenate %309, %310 in 0 : vector<1x32xf32>, vector<3x32xf32> -> vector<4x32xf32>
    %312 = tpu.iota {dimensions = array<i32: 0>} : vector<4x1xi32>
    %c2_i32 = arith.constant 2 : i32
    %313 = vector.broadcast %c2_i32 : i32 to vector<4x1xi32>
    %314 = arith.cmpi ne, %312, %313 : vector<4x1xi32>
    %cst_150 = arith.constant 0.000000e+00 : f32
    %315 = vector.shape_cast %314 : vector<4x1xi1> to vector<4x1xi1>
    %316 = vector.broadcast %315 : vector<4x1xi1> to vector<4x32xi1>
    %317 = vector.broadcast %cst_150 : f32 to vector<4x32xf32>
    %318 = arith.select %316, %311, %317 : vector<4x32xi1>, vector<4x32xf32>
    %cst_151 = arith.constant 0.000000e+00 : f32
    %319 = vector.broadcast %cst_151 : f32 to vector<1x32xf32>
    %320 = vector.extract_strided_slice %307 {offsets = [1, 0], sizes = [3, 32], strides = [1, 1]} : vector<4x32xf32> to vector<3x32xf32>
    %321 = tpu.concatenate %320, %319 in 0 : vector<3x32xf32>, vector<1x32xf32> -> vector<4x32xf32>
    %c1_i32 = arith.constant 1 : i32
    %322 = vector.broadcast %c1_i32 : i32 to vector<4x1xi32>
    %323 = arith.cmpi ne, %312, %322 : vector<4x1xi32>
    %cst_152 = arith.constant 0.000000e+00 : f32
    %324 = vector.shape_cast %323 : vector<4x1xi1> to vector<4x1xi1>
    %325 = vector.broadcast %324 : vector<4x1xi1> to vector<4x32xi1>
    %326 = vector.broadcast %cst_152 : f32 to vector<4x32xf32>
    %327 = arith.select %325, %321, %326 : vector<4x32xi1>, vector<4x32xf32>
    %328 = tpu.concatenate %318, %307, %308, %327 in 1 : vector<4x32xf32>, vector<4x32xf32>, vector<4x32xf32>, vector<4x32xf32> -> vector<4x128xf32>
    %c4 = arith.constant 4 : index
    %c0_153 = arith.constant 0 : index
    %c0_154 = arith.constant 0 : index
    %329 = vector.load %arg4[%c4, %c0_153, %c0_154] : memref<5x128x32xf32, #tpu.memory_space<vmem>>, vector<1x128x32xf32>
    %330 = vector.shape_cast %329 : vector<1x128x32xf32> to vector<128x32xf32>
    %cst_155 = arith.constant dense<0.000000e+00> : vector<4x32xf32>
    %331 = tpu.matmul %328, %330, %cst_155 {dimension_numbers = #tpu.dot_dimension_numbers<[1], [0], [0], [1], [0, 0, 1, 1], [], []>} : vector<4x128xf32>, vector<128x32xf32>, vector<4x32xf32> -> vector<4x32xf32>
    %c4_156 = arith.constant 4 : index
    %c0_157 = arith.constant 0 : index
    %c0_158 = arith.constant 0 : index
    %332 = vector.load %arg5[%c4_156, %c0_157, %c0_158] : memref<5x1x32xf32, #tpu.memory_space<vmem>>, vector<1x1x32xf32>
    %333 = vector.shape_cast %332 : vector<1x1x32xf32> to vector<1x32xf32>
    %c4_159 = arith.constant 4 : index
    %c0_160 = arith.constant 0 : index
    %c0_161 = arith.constant 0 : index
    %334 = vector.load %arg6[%c4_159, %c0_160, %c0_161] : memref<5x1x32xf32, #tpu.memory_space<vmem>>, vector<1x1x32xf32>
    %335 = vector.shape_cast %334 : vector<1x1x32xf32> to vector<1x32xf32>
    %cst_162 = arith.constant dense<0.000000e+00> : vector<32xf32>
    %336 = vector.multi_reduction <add>, %331, %cst_162 [0] : vector<4x32xf32> to vector<32xf32>
    %337 = vector.shape_cast %336 : vector<32xf32> to vector<1x32xf32>
    %cst_163 = arith.constant 2.500000e-01 : f32
    %338 = vector.broadcast %cst_163 : f32 to vector<1x32xf32>
    %339 = arith.mulf %337, %338 : vector<1x32xf32>
    %340 = vector.broadcast %339 : vector<1x32xf32> to vector<4x32xf32>
    %341 = arith.subf %331, %340 : vector<4x32xf32>
    %342 = arith.mulf %341, %341 : vector<4x32xf32>
    %cst_164 = arith.constant dense<0.000000e+00> : vector<32xf32>
    %343 = vector.multi_reduction <add>, %342, %cst_164 [0] : vector<4x32xf32> to vector<32xf32>
    %344 = vector.shape_cast %343 : vector<32xf32> to vector<1x32xf32>
    %cst_165 = arith.constant 2.500000e-01 : f32
    %345 = vector.broadcast %cst_165 : f32 to vector<1x32xf32>
    %346 = arith.mulf %344, %345 : vector<1x32xf32>
    %cst_166 = arith.constant 9.99999974E-6 : f32
    %347 = vector.broadcast %cst_166 : f32 to vector<1x32xf32>
    %348 = arith.addf %346, %347 : vector<1x32xf32>
    %349 = math.rsqrt %348 : vector<1x32xf32>
    %350 = vector.broadcast %349 : vector<1x32xf32> to vector<4x32xf32>
    %351 = arith.mulf %341, %350 : vector<4x32xf32>
    %352 = vector.broadcast %333 : vector<1x32xf32> to vector<4x32xf32>
    %353 = arith.mulf %351, %352 : vector<4x32xf32>
    %354 = vector.broadcast %335 : vector<1x32xf32> to vector<4x32xf32>
    %355 = arith.addf %353, %354 : vector<4x32xf32>
    %cst_167 = arith.constant 0.000000e+00 : f32
    %356 = vector.broadcast %cst_167 : f32 to vector<4x32xf32>
    %357 = arith.maximumf %355, %356 : vector<4x32xf32>
    %358 = vector.extract_strided_slice %357 {offsets = [0, 0], sizes = [2, 32], strides = [1, 1]} : vector<4x32xf32> to vector<2x32xf32>
    %359 = vector.extract_strided_slice %357 {offsets = [2, 0], sizes = [2, 32], strides = [1, 1]} : vector<4x32xf32> to vector<2x32xf32>
    %360 = tpu.concatenate %358, %358, %359, %359 in 0 : vector<2x32xf32>, vector<2x32xf32>, vector<2x32xf32>, vector<2x32xf32> -> vector<8x32xf32>
    %361 = arith.addf %360, %305 : vector<8x32xf32>
    %cst_168 = arith.constant 0.000000e+00 : f32
    %362 = vector.broadcast %cst_168 : f32 to vector<1x32xf32>
    %363 = vector.extract_strided_slice %361 {offsets = [0, 0], sizes = [7, 32], strides = [1, 1]} : vector<8x32xf32> to vector<7x32xf32>
    %364 = tpu.concatenate %362, %363 in 0 : vector<1x32xf32>, vector<7x32xf32> -> vector<8x32xf32>
    %c4_i32_169 = arith.constant 4 : i32
    %365 = vector.broadcast %c4_i32_169 : i32 to vector<8x1xi32>
    %366 = arith.cmpi ne, %260, %365 : vector<8x1xi32>
    %cst_170 = arith.constant 0.000000e+00 : f32
    %367 = vector.shape_cast %366 : vector<8x1xi1> to vector<8x1xi1>
    %368 = vector.broadcast %367 : vector<8x1xi1> to vector<8x32xi1>
    %369 = vector.broadcast %cst_170 : f32 to vector<8x32xf32>
    %370 = arith.select %368, %364, %369 : vector<8x32xi1>, vector<8x32xf32>
    %cst_171 = arith.constant 0.000000e+00 : f32
    %371 = vector.broadcast %cst_171 : f32 to vector<1x32xf32>
    %372 = vector.extract_strided_slice %361 {offsets = [1, 0], sizes = [7, 32], strides = [1, 1]} : vector<8x32xf32> to vector<7x32xf32>
    %373 = tpu.concatenate %372, %371 in 0 : vector<7x32xf32>, vector<1x32xf32> -> vector<8x32xf32>
    %c3_i32_172 = arith.constant 3 : i32
    %374 = vector.broadcast %c3_i32_172 : i32 to vector<8x1xi32>
    %375 = arith.cmpi ne, %260, %374 : vector<8x1xi32>
    %cst_173 = arith.constant 0.000000e+00 : f32
    %376 = vector.shape_cast %375 : vector<8x1xi1> to vector<8x1xi1>
    %377 = vector.broadcast %376 : vector<8x1xi1> to vector<8x32xi1>
    %378 = vector.broadcast %cst_173 : f32 to vector<8x32xf32>
    %379 = arith.select %377, %373, %378 : vector<8x32xi1>, vector<8x32xf32>
    %380 = tpu.concatenate %370, %361, %379 in 1 : vector<8x32xf32>, vector<8x32xf32>, vector<8x32xf32> -> vector<8x96xf32>
    %c2_174 = arith.constant 2 : index
    %c0_175 = arith.constant 0 : index
    %c0_176 = arith.constant 0 : index
    %381 = vector.load %arg1[%c2_174, %c0_175, %c0_176] : memref<7x96x32xf32, #tpu.memory_space<vmem>>, vector<1x96x32xf32>
    %382 = vector.shape_cast %381 : vector<1x96x32xf32> to vector<96x32xf32>
    %cst_177 = arith.constant dense<0.000000e+00> : vector<8x32xf32>
    %383 = tpu.matmul %380, %382, %cst_177 {dimension_numbers = #tpu.dot_dimension_numbers<[1], [0], [0], [1], [0, 0, 1, 1], [], []>} : vector<8x96xf32>, vector<96x32xf32>, vector<8x32xf32> -> vector<8x32xf32>
    %c2_178 = arith.constant 2 : index
    %c0_179 = arith.constant 0 : index
    %c0_180 = arith.constant 0 : index
    %384 = vector.load %arg2[%c2_178, %c0_179, %c0_180] : memref<7x1x32xf32, #tpu.memory_space<vmem>>, vector<1x1x32xf32>
    %385 = vector.shape_cast %384 : vector<1x1x32xf32> to vector<1x32xf32>
    %c2_181 = arith.constant 2 : index
    %c0_182 = arith.constant 0 : index
    %c0_183 = arith.constant 0 : index
    %386 = vector.load %arg3[%c2_181, %c0_182, %c0_183] : memref<7x1x32xf32, #tpu.memory_space<vmem>>, vector<1x1x32xf32>
    %387 = vector.shape_cast %386 : vector<1x1x32xf32> to vector<1x32xf32>
    %cst_184 = arith.constant dense<0.000000e+00> : vector<32xf32>
    %388 = vector.multi_reduction <add>, %383, %cst_184 [0] : vector<8x32xf32> to vector<32xf32>
    %389 = vector.shape_cast %388 : vector<32xf32> to vector<1x32xf32>
    %cst_185 = arith.constant 1.250000e-01 : f32
    %390 = vector.broadcast %cst_185 : f32 to vector<1x32xf32>
    %391 = arith.mulf %389, %390 : vector<1x32xf32>
    %392 = vector.broadcast %391 : vector<1x32xf32> to vector<8x32xf32>
    %393 = arith.subf %383, %392 : vector<8x32xf32>
    %394 = arith.mulf %393, %393 : vector<8x32xf32>
    %cst_186 = arith.constant dense<0.000000e+00> : vector<32xf32>
    %395 = vector.multi_reduction <add>, %394, %cst_186 [0] : vector<8x32xf32> to vector<32xf32>
    %396 = vector.shape_cast %395 : vector<32xf32> to vector<1x32xf32>
    %cst_187 = arith.constant 1.250000e-01 : f32
    %397 = vector.broadcast %cst_187 : f32 to vector<1x32xf32>
    %398 = arith.mulf %396, %397 : vector<1x32xf32>
    %cst_188 = arith.constant 9.99999974E-6 : f32
    %399 = vector.broadcast %cst_188 : f32 to vector<1x32xf32>
    %400 = arith.addf %398, %399 : vector<1x32xf32>
    %401 = math.rsqrt %400 : vector<1x32xf32>
    %402 = vector.broadcast %401 : vector<1x32xf32> to vector<8x32xf32>
    %403 = arith.mulf %393, %402 : vector<8x32xf32>
    %404 = vector.broadcast %385 : vector<1x32xf32> to vector<8x32xf32>
    %405 = arith.mulf %403, %404 : vector<8x32xf32>
    %406 = vector.broadcast %387 : vector<1x32xf32> to vector<8x32xf32>
    %407 = arith.addf %405, %406 : vector<8x32xf32>
    %cst_189 = arith.constant 0.000000e+00 : f32
    %408 = vector.broadcast %cst_189 : f32 to vector<8x32xf32>
    %409 = arith.maximumf %407, %408 : vector<8x32xf32>
    %410 = vector.extract_strided_slice %409 {offsets = [0, 0], sizes = [4, 32], strides = [1, 1]} : vector<8x32xf32> to vector<4x32xf32>
    %411 = vector.extract_strided_slice %409 {offsets = [4, 0], sizes = [4, 32], strides = [1, 1]} : vector<8x32xf32> to vector<4x32xf32>
    %412 = tpu.concatenate %410, %410, %411, %411 in 0 : vector<4x32xf32>, vector<4x32xf32>, vector<4x32xf32>, vector<4x32xf32> -> vector<16x32xf32>
    %413 = arith.addf %412, %253 : vector<16x32xf32>
    %cst_190 = arith.constant 0.000000e+00 : f32
    %414 = vector.broadcast %cst_190 : f32 to vector<1x32xf32>
    %415 = vector.extract_strided_slice %413 {offsets = [0, 0], sizes = [15, 32], strides = [1, 1]} : vector<16x32xf32> to vector<15x32xf32>
    %416 = tpu.concatenate %414, %415 in 0 : vector<1x32xf32>, vector<15x32xf32> -> vector<16x32xf32>
    %c8_i32_191 = arith.constant 8 : i32
    %417 = vector.broadcast %c8_i32_191 : i32 to vector<16x1xi32>
    %418 = arith.cmpi ne, %208, %417 : vector<16x1xi32>
    %cst_192 = arith.constant 0.000000e+00 : f32
    %419 = vector.shape_cast %418 : vector<16x1xi1> to vector<16x1xi1>
    %420 = vector.broadcast %419 : vector<16x1xi1> to vector<16x32xi1>
    %421 = vector.broadcast %cst_192 : f32 to vector<16x32xf32>
    %422 = arith.select %420, %416, %421 : vector<16x32xi1>, vector<16x32xf32>
    %cst_193 = arith.constant 0.000000e+00 : f32
    %423 = vector.broadcast %cst_193 : f32 to vector<1x32xf32>
    %424 = vector.extract_strided_slice %413 {offsets = [1, 0], sizes = [15, 32], strides = [1, 1]} : vector<16x32xf32> to vector<15x32xf32>
    %425 = tpu.concatenate %424, %423 in 0 : vector<15x32xf32>, vector<1x32xf32> -> vector<16x32xf32>
    %c7_i32_194 = arith.constant 7 : i32
    %426 = vector.broadcast %c7_i32_194 : i32 to vector<16x1xi32>
    %427 = arith.cmpi ne, %208, %426 : vector<16x1xi32>
    %cst_195 = arith.constant 0.000000e+00 : f32
    %428 = vector.shape_cast %427 : vector<16x1xi1> to vector<16x1xi1>
    %429 = vector.broadcast %428 : vector<16x1xi1> to vector<16x32xi1>
    %430 = vector.broadcast %cst_195 : f32 to vector<16x32xf32>
    %431 = arith.select %429, %425, %430 : vector<16x32xi1>, vector<16x32xf32>
    %432 = tpu.concatenate %422, %413, %431 in 1 : vector<16x32xf32>, vector<16x32xf32>, vector<16x32xf32> -> vector<16x96xf32>
    %c3_196 = arith.constant 3 : index
    %c0_197 = arith.constant 0 : index
    %c0_198 = arith.constant 0 : index
    %433 = vector.load %arg1[%c3_196, %c0_197, %c0_198] : memref<7x96x32xf32, #tpu.memory_space<vmem>>, vector<1x96x32xf32>
    %434 = vector.shape_cast %433 : vector<1x96x32xf32> to vector<96x32xf32>
    %cst_199 = arith.constant dense<0.000000e+00> : vector<16x32xf32>
    %435 = tpu.matmul %432, %434, %cst_199 {dimension_numbers = #tpu.dot_dimension_numbers<[1], [0], [0], [1], [0, 0, 1, 1], [], []>} : vector<16x96xf32>, vector<96x32xf32>, vector<16x32xf32> -> vector<16x32xf32>
    %c3_200 = arith.constant 3 : index
    %c0_201 = arith.constant 0 : index
    %c0_202 = arith.constant 0 : index
    %436 = vector.load %arg2[%c3_200, %c0_201, %c0_202] : memref<7x1x32xf32, #tpu.memory_space<vmem>>, vector<1x1x32xf32>
    %437 = vector.shape_cast %436 : vector<1x1x32xf32> to vector<1x32xf32>
    %c3_203 = arith.constant 3 : index
    %c0_204 = arith.constant 0 : index
    %c0_205 = arith.constant 0 : index
    %438 = vector.load %arg3[%c3_203, %c0_204, %c0_205] : memref<7x1x32xf32, #tpu.memory_space<vmem>>, vector<1x1x32xf32>
    %439 = vector.shape_cast %438 : vector<1x1x32xf32> to vector<1x32xf32>
    %cst_206 = arith.constant dense<0.000000e+00> : vector<32xf32>
    %440 = vector.multi_reduction <add>, %435, %cst_206 [0] : vector<16x32xf32> to vector<32xf32>
    %441 = vector.shape_cast %440 : vector<32xf32> to vector<1x32xf32>
    %cst_207 = arith.constant 6.250000e-02 : f32
    %442 = vector.broadcast %cst_207 : f32 to vector<1x32xf32>
    %443 = arith.mulf %441, %442 : vector<1x32xf32>
    %444 = vector.broadcast %443 : vector<1x32xf32> to vector<16x32xf32>
    %445 = arith.subf %435, %444 : vector<16x32xf32>
    %446 = arith.mulf %445, %445 : vector<16x32xf32>
    %cst_208 = arith.constant dense<0.000000e+00> : vector<32xf32>
    %447 = vector.multi_reduction <add>, %446, %cst_208 [0] : vector<16x32xf32> to vector<32xf32>
    %448 = vector.shape_cast %447 : vector<32xf32> to vector<1x32xf32>
    %cst_209 = arith.constant 6.250000e-02 : f32
    %449 = vector.broadcast %cst_209 : f32 to vector<1x32xf32>
    %450 = arith.mulf %448, %449 : vector<1x32xf32>
    %cst_210 = arith.constant 9.99999974E-6 : f32
    %451 = vector.broadcast %cst_210 : f32 to vector<1x32xf32>
    %452 = arith.addf %450, %451 : vector<1x32xf32>
    %453 = math.rsqrt %452 : vector<1x32xf32>
    %454 = vector.broadcast %453 : vector<1x32xf32> to vector<16x32xf32>
    %455 = arith.mulf %445, %454 : vector<16x32xf32>
    %456 = vector.broadcast %437 : vector<1x32xf32> to vector<16x32xf32>
    %457 = arith.mulf %455, %456 : vector<16x32xf32>
    %458 = vector.broadcast %439 : vector<1x32xf32> to vector<16x32xf32>
    %459 = arith.addf %457, %458 : vector<16x32xf32>
    %cst_211 = arith.constant 0.000000e+00 : f32
    %460 = vector.broadcast %cst_211 : f32 to vector<16x32xf32>
    %461 = arith.maximumf %459, %460 : vector<16x32xf32>
    %462 = vector.extract_strided_slice %461 {offsets = [0, 0], sizes = [8, 32], strides = [1, 1]} : vector<16x32xf32> to vector<8x32xf32>
    %463 = vector.extract_strided_slice %461 {offsets = [8, 0], sizes = [8, 32], strides = [1, 1]} : vector<16x32xf32> to vector<8x32xf32>
    %464 = tpu.concatenate %462, %462, %463, %463 in 0 : vector<8x32xf32>, vector<8x32xf32>, vector<8x32xf32>, vector<8x32xf32> -> vector<32x32xf32>
    %465 = arith.addf %464, %201 : vector<32x32xf32>
    %cst_212 = arith.constant 0.000000e+00 : f32
    %466 = vector.broadcast %cst_212 : f32 to vector<1x32xf32>
    %467 = vector.extract_strided_slice %465 {offsets = [0, 0], sizes = [31, 32], strides = [1, 1]} : vector<32x32xf32> to vector<31x32xf32>
    %468 = tpu.concatenate %466, %467 in 0 : vector<1x32xf32>, vector<31x32xf32> -> vector<32x32xf32>
    %c16_i32_213 = arith.constant 16 : i32
    %469 = vector.broadcast %c16_i32_213 : i32 to vector<32x1xi32>
    %470 = arith.cmpi ne, %156, %469 : vector<32x1xi32>
    %cst_214 = arith.constant 0.000000e+00 : f32
    %471 = vector.shape_cast %470 : vector<32x1xi1> to vector<32x1xi1>
    %472 = vector.broadcast %471 : vector<32x1xi1> to vector<32x32xi1>
    %473 = vector.broadcast %cst_214 : f32 to vector<32x32xf32>
    %474 = arith.select %472, %468, %473 : vector<32x32xi1>, vector<32x32xf32>
    %cst_215 = arith.constant 0.000000e+00 : f32
    %475 = vector.broadcast %cst_215 : f32 to vector<1x32xf32>
    %476 = vector.extract_strided_slice %465 {offsets = [1, 0], sizes = [31, 32], strides = [1, 1]} : vector<32x32xf32> to vector<31x32xf32>
    %477 = tpu.concatenate %476, %475 in 0 : vector<31x32xf32>, vector<1x32xf32> -> vector<32x32xf32>
    %c15_i32_216 = arith.constant 15 : i32
    %478 = vector.broadcast %c15_i32_216 : i32 to vector<32x1xi32>
    %479 = arith.cmpi ne, %156, %478 : vector<32x1xi32>
    %cst_217 = arith.constant 0.000000e+00 : f32
    %480 = vector.shape_cast %479 : vector<32x1xi1> to vector<32x1xi1>
    %481 = vector.broadcast %480 : vector<32x1xi1> to vector<32x32xi1>
    %482 = vector.broadcast %cst_217 : f32 to vector<32x32xf32>
    %483 = arith.select %481, %477, %482 : vector<32x32xi1>, vector<32x32xf32>
    %484 = tpu.concatenate %474, %465, %483 in 1 : vector<32x32xf32>, vector<32x32xf32>, vector<32x32xf32> -> vector<32x96xf32>
    %c4_218 = arith.constant 4 : index
    %c0_219 = arith.constant 0 : index
    %c0_220 = arith.constant 0 : index
    %485 = vector.load %arg1[%c4_218, %c0_219, %c0_220] : memref<7x96x32xf32, #tpu.memory_space<vmem>>, vector<1x96x32xf32>
    %486 = vector.shape_cast %485 : vector<1x96x32xf32> to vector<96x32xf32>
    %cst_221 = arith.constant dense<0.000000e+00> : vector<32x32xf32>
    %487 = tpu.matmul %484, %486, %cst_221 {dimension_numbers = #tpu.dot_dimension_numbers<[1], [0], [0], [1], [0, 0, 1, 1], [], []>} : vector<32x96xf32>, vector<96x32xf32>, vector<32x32xf32> -> vector<32x32xf32>
    %c4_222 = arith.constant 4 : index
    %c0_223 = arith.constant 0 : index
    %c0_224 = arith.constant 0 : index
    %488 = vector.load %arg2[%c4_222, %c0_223, %c0_224] : memref<7x1x32xf32, #tpu.memory_space<vmem>>, vector<1x1x32xf32>
    %489 = vector.shape_cast %488 : vector<1x1x32xf32> to vector<1x32xf32>
    %c4_225 = arith.constant 4 : index
    %c0_226 = arith.constant 0 : index
    %c0_227 = arith.constant 0 : index
    %490 = vector.load %arg3[%c4_225, %c0_226, %c0_227] : memref<7x1x32xf32, #tpu.memory_space<vmem>>, vector<1x1x32xf32>
    %491 = vector.shape_cast %490 : vector<1x1x32xf32> to vector<1x32xf32>
    %cst_228 = arith.constant dense<0.000000e+00> : vector<32xf32>
    %492 = vector.multi_reduction <add>, %487, %cst_228 [0] : vector<32x32xf32> to vector<32xf32>
    %493 = vector.shape_cast %492 : vector<32xf32> to vector<1x32xf32>
    %cst_229 = arith.constant 3.125000e-02 : f32
    %494 = vector.broadcast %cst_229 : f32 to vector<1x32xf32>
    %495 = arith.mulf %493, %494 : vector<1x32xf32>
    %496 = vector.broadcast %495 : vector<1x32xf32> to vector<32x32xf32>
    %497 = arith.subf %487, %496 : vector<32x32xf32>
    %498 = arith.mulf %497, %497 : vector<32x32xf32>
    %cst_230 = arith.constant dense<0.000000e+00> : vector<32xf32>
    %499 = vector.multi_reduction <add>, %498, %cst_230 [0] : vector<32x32xf32> to vector<32xf32>
    %500 = vector.shape_cast %499 : vector<32xf32> to vector<1x32xf32>
    %cst_231 = arith.constant 3.125000e-02 : f32
    %501 = vector.broadcast %cst_231 : f32 to vector<1x32xf32>
    %502 = arith.mulf %500, %501 : vector<1x32xf32>
    %cst_232 = arith.constant 9.99999974E-6 : f32
    %503 = vector.broadcast %cst_232 : f32 to vector<1x32xf32>
    %504 = arith.addf %502, %503 : vector<1x32xf32>
    %505 = math.rsqrt %504 : vector<1x32xf32>
    %506 = vector.broadcast %505 : vector<1x32xf32> to vector<32x32xf32>
    %507 = arith.mulf %497, %506 : vector<32x32xf32>
    %508 = vector.broadcast %489 : vector<1x32xf32> to vector<32x32xf32>
    %509 = arith.mulf %507, %508 : vector<32x32xf32>
    %510 = vector.broadcast %491 : vector<1x32xf32> to vector<32x32xf32>
    %511 = arith.addf %509, %510 : vector<32x32xf32>
    %cst_233 = arith.constant 0.000000e+00 : f32
    %512 = vector.broadcast %cst_233 : f32 to vector<32x32xf32>
    %513 = arith.maximumf %511, %512 : vector<32x32xf32>
    %514 = vector.extract_strided_slice %513 {offsets = [0, 0], sizes = [16, 32], strides = [1, 1]} : vector<32x32xf32> to vector<16x32xf32>
    %515 = vector.extract_strided_slice %513 {offsets = [16, 0], sizes = [16, 32], strides = [1, 1]} : vector<32x32xf32> to vector<16x32xf32>
    %516 = tpu.concatenate %514, %514, %515, %515 in 0 : vector<16x32xf32>, vector<16x32xf32>, vector<16x32xf32>, vector<16x32xf32> -> vector<64x32xf32>
    %517 = arith.addf %516, %149 : vector<64x32xf32>
    %cst_234 = arith.constant 0.000000e+00 : f32
    %518 = vector.broadcast %cst_234 : f32 to vector<1x32xf32>
    %519 = vector.extract_strided_slice %517 {offsets = [0, 0], sizes = [63, 32], strides = [1, 1]} : vector<64x32xf32> to vector<63x32xf32>
    %520 = tpu.concatenate %518, %519 in 0 : vector<1x32xf32>, vector<63x32xf32> -> vector<64x32xf32>
    %c32_i32_235 = arith.constant 32 : i32
    %521 = vector.broadcast %c32_i32_235 : i32 to vector<64x1xi32>
    %522 = arith.cmpi ne, %104, %521 : vector<64x1xi32>
    %cst_236 = arith.constant 0.000000e+00 : f32
    %523 = vector.shape_cast %522 : vector<64x1xi1> to vector<64x1xi1>
    %524 = vector.broadcast %523 : vector<64x1xi1> to vector<64x32xi1>
    %525 = vector.broadcast %cst_236 : f32 to vector<64x32xf32>
    %526 = arith.select %524, %520, %525 : vector<64x32xi1>, vector<64x32xf32>
    %cst_237 = arith.constant 0.000000e+00 : f32
    %527 = vector.broadcast %cst_237 : f32 to vector<1x32xf32>
    %528 = vector.extract_strided_slice %517 {offsets = [1, 0], sizes = [63, 32], strides = [1, 1]} : vector<64x32xf32> to vector<63x32xf32>
    %529 = tpu.concatenate %528, %527 in 0 : vector<63x32xf32>, vector<1x32xf32> -> vector<64x32xf32>
    %c31_i32_238 = arith.constant 31 : i32
    %530 = vector.broadcast %c31_i32_238 : i32 to vector<64x1xi32>
    %531 = arith.cmpi ne, %104, %530 : vector<64x1xi32>
    %cst_239 = arith.constant 0.000000e+00 : f32
    %532 = vector.shape_cast %531 : vector<64x1xi1> to vector<64x1xi1>
    %533 = vector.broadcast %532 : vector<64x1xi1> to vector<64x32xi1>
    %534 = vector.broadcast %cst_239 : f32 to vector<64x32xf32>
    %535 = arith.select %533, %529, %534 : vector<64x32xi1>, vector<64x32xf32>
    %536 = tpu.concatenate %526, %517, %535 in 1 : vector<64x32xf32>, vector<64x32xf32>, vector<64x32xf32> -> vector<64x96xf32>
    %c5 = arith.constant 5 : index
    %c0_240 = arith.constant 0 : index
    %c0_241 = arith.constant 0 : index
    %537 = vector.load %arg1[%c5, %c0_240, %c0_241] : memref<7x96x32xf32, #tpu.memory_space<vmem>>, vector<1x96x32xf32>
    %538 = vector.shape_cast %537 : vector<1x96x32xf32> to vector<96x32xf32>
    %cst_242 = arith.constant dense<0.000000e+00> : vector<64x32xf32>
    %539 = tpu.matmul %536, %538, %cst_242 {dimension_numbers = #tpu.dot_dimension_numbers<[1], [0], [0], [1], [0, 0, 1, 1], [], []>} : vector<64x96xf32>, vector<96x32xf32>, vector<64x32xf32> -> vector<64x32xf32>
    %c5_243 = arith.constant 5 : index
    %c0_244 = arith.constant 0 : index
    %c0_245 = arith.constant 0 : index
    %540 = vector.load %arg2[%c5_243, %c0_244, %c0_245] : memref<7x1x32xf32, #tpu.memory_space<vmem>>, vector<1x1x32xf32>
    %541 = vector.shape_cast %540 : vector<1x1x32xf32> to vector<1x32xf32>
    %c5_246 = arith.constant 5 : index
    %c0_247 = arith.constant 0 : index
    %c0_248 = arith.constant 0 : index
    %542 = vector.load %arg3[%c5_246, %c0_247, %c0_248] : memref<7x1x32xf32, #tpu.memory_space<vmem>>, vector<1x1x32xf32>
    %543 = vector.shape_cast %542 : vector<1x1x32xf32> to vector<1x32xf32>
    %cst_249 = arith.constant dense<0.000000e+00> : vector<32xf32>
    %544 = vector.multi_reduction <add>, %539, %cst_249 [0] : vector<64x32xf32> to vector<32xf32>
    %545 = vector.shape_cast %544 : vector<32xf32> to vector<1x32xf32>
    %cst_250 = arith.constant 1.562500e-02 : f32
    %546 = vector.broadcast %cst_250 : f32 to vector<1x32xf32>
    %547 = arith.mulf %545, %546 : vector<1x32xf32>
    %548 = vector.broadcast %547 : vector<1x32xf32> to vector<64x32xf32>
    %549 = arith.subf %539, %548 : vector<64x32xf32>
    %550 = arith.mulf %549, %549 : vector<64x32xf32>
    %cst_251 = arith.constant dense<0.000000e+00> : vector<32xf32>
    %551 = vector.multi_reduction <add>, %550, %cst_251 [0] : vector<64x32xf32> to vector<32xf32>
    %552 = vector.shape_cast %551 : vector<32xf32> to vector<1x32xf32>
    %cst_252 = arith.constant 1.562500e-02 : f32
    %553 = vector.broadcast %cst_252 : f32 to vector<1x32xf32>
    %554 = arith.mulf %552, %553 : vector<1x32xf32>
    %cst_253 = arith.constant 9.99999974E-6 : f32
    %555 = vector.broadcast %cst_253 : f32 to vector<1x32xf32>
    %556 = arith.addf %554, %555 : vector<1x32xf32>
    %557 = math.rsqrt %556 : vector<1x32xf32>
    %558 = vector.broadcast %557 : vector<1x32xf32> to vector<64x32xf32>
    %559 = arith.mulf %549, %558 : vector<64x32xf32>
    %560 = vector.broadcast %541 : vector<1x32xf32> to vector<64x32xf32>
    %561 = arith.mulf %559, %560 : vector<64x32xf32>
    %562 = vector.broadcast %543 : vector<1x32xf32> to vector<64x32xf32>
    %563 = arith.addf %561, %562 : vector<64x32xf32>
    %cst_254 = arith.constant 0.000000e+00 : f32
    %564 = vector.broadcast %cst_254 : f32 to vector<64x32xf32>
    %565 = arith.maximumf %563, %564 : vector<64x32xf32>
    %566 = vector.extract_strided_slice %565 {offsets = [0, 0], sizes = [32, 32], strides = [1, 1]} : vector<64x32xf32> to vector<32x32xf32>
    %567 = vector.extract_strided_slice %565 {offsets = [32, 0], sizes = [32, 32], strides = [1, 1]} : vector<64x32xf32> to vector<32x32xf32>
    %568 = tpu.concatenate %566, %566, %567, %567 in 0 : vector<32x32xf32>, vector<32x32xf32>, vector<32x32xf32>, vector<32x32xf32> -> vector<128x32xf32>
    %569 = arith.addf %568, %97 : vector<128x32xf32>
    %cst_255 = arith.constant 0.000000e+00 : f32
    %570 = vector.broadcast %cst_255 : f32 to vector<1x32xf32>
    %571 = vector.extract_strided_slice %569 {offsets = [0, 0], sizes = [127, 32], strides = [1, 1]} : vector<128x32xf32> to vector<127x32xf32>
    %572 = tpu.concatenate %570, %571 in 0 : vector<1x32xf32>, vector<127x32xf32> -> vector<128x32xf32>
    %c64_i32_256 = arith.constant 64 : i32
    %573 = vector.broadcast %c64_i32_256 : i32 to vector<128x1xi32>
    %574 = arith.cmpi ne, %4, %573 : vector<128x1xi32>
    %cst_257 = arith.constant 0.000000e+00 : f32
    %575 = vector.shape_cast %574 : vector<128x1xi1> to vector<128x1xi1>
    %576 = vector.broadcast %575 : vector<128x1xi1> to vector<128x32xi1>
    %577 = vector.broadcast %cst_257 : f32 to vector<128x32xf32>
    %578 = arith.select %576, %572, %577 : vector<128x32xi1>, vector<128x32xf32>
    %cst_258 = arith.constant 0.000000e+00 : f32
    %579 = vector.broadcast %cst_258 : f32 to vector<1x32xf32>
    %580 = vector.extract_strided_slice %569 {offsets = [1, 0], sizes = [127, 32], strides = [1, 1]} : vector<128x32xf32> to vector<127x32xf32>
    %581 = tpu.concatenate %580, %579 in 0 : vector<127x32xf32>, vector<1x32xf32> -> vector<128x32xf32>
    %c63_i32_259 = arith.constant 63 : i32
    %582 = vector.broadcast %c63_i32_259 : i32 to vector<128x1xi32>
    %583 = arith.cmpi ne, %4, %582 : vector<128x1xi32>
    %cst_260 = arith.constant 0.000000e+00 : f32
    %584 = vector.shape_cast %583 : vector<128x1xi1> to vector<128x1xi1>
    %585 = vector.broadcast %584 : vector<128x1xi1> to vector<128x32xi1>
    %586 = vector.broadcast %cst_260 : f32 to vector<128x32xf32>
    %587 = arith.select %585, %581, %586 : vector<128x32xi1>, vector<128x32xf32>
    %588 = tpu.concatenate %578, %569, %587 in 1 : vector<128x32xf32>, vector<128x32xf32>, vector<128x32xf32> -> vector<128x96xf32>
    %c6 = arith.constant 6 : index
    %c0_261 = arith.constant 0 : index
    %c0_262 = arith.constant 0 : index
    %589 = vector.load %arg1[%c6, %c0_261, %c0_262] : memref<7x96x32xf32, #tpu.memory_space<vmem>>, vector<1x96x32xf32>
    %590 = vector.shape_cast %589 : vector<1x96x32xf32> to vector<96x32xf32>
    %cst_263 = arith.constant dense<0.000000e+00> : vector<128x32xf32>
    %591 = tpu.matmul %588, %590, %cst_263 {dimension_numbers = #tpu.dot_dimension_numbers<[1], [0], [0], [1], [0, 0, 1, 1], [], []>} : vector<128x96xf32>, vector<96x32xf32>, vector<128x32xf32> -> vector<128x32xf32>
    %c6_264 = arith.constant 6 : index
    %c0_265 = arith.constant 0 : index
    %c0_266 = arith.constant 0 : index
    %592 = vector.load %arg2[%c6_264, %c0_265, %c0_266] : memref<7x1x32xf32, #tpu.memory_space<vmem>>, vector<1x1x32xf32>
    %593 = vector.shape_cast %592 : vector<1x1x32xf32> to vector<1x32xf32>
    %c6_267 = arith.constant 6 : index
    %c0_268 = arith.constant 0 : index
    %c0_269 = arith.constant 0 : index
    %594 = vector.load %arg3[%c6_267, %c0_268, %c0_269] : memref<7x1x32xf32, #tpu.memory_space<vmem>>, vector<1x1x32xf32>
    %595 = vector.shape_cast %594 : vector<1x1x32xf32> to vector<1x32xf32>
    %cst_270 = arith.constant dense<0.000000e+00> : vector<32xf32>
    %596 = vector.multi_reduction <add>, %591, %cst_270 [0] : vector<128x32xf32> to vector<32xf32>
    %597 = vector.shape_cast %596 : vector<32xf32> to vector<1x32xf32>
    %cst_271 = arith.constant 7.812500e-03 : f32
    %598 = vector.broadcast %cst_271 : f32 to vector<1x32xf32>
    %599 = arith.mulf %597, %598 : vector<1x32xf32>
    %600 = vector.broadcast %599 : vector<1x32xf32> to vector<128x32xf32>
    %601 = arith.subf %591, %600 : vector<128x32xf32>
    %602 = arith.mulf %601, %601 : vector<128x32xf32>
    %cst_272 = arith.constant dense<0.000000e+00> : vector<32xf32>
    %603 = vector.multi_reduction <add>, %602, %cst_272 [0] : vector<128x32xf32> to vector<32xf32>
    %604 = vector.shape_cast %603 : vector<32xf32> to vector<1x32xf32>
    %cst_273 = arith.constant 7.812500e-03 : f32
    %605 = vector.broadcast %cst_273 : f32 to vector<1x32xf32>
    %606 = arith.mulf %604, %605 : vector<1x32xf32>
    %cst_274 = arith.constant 9.99999974E-6 : f32
    %607 = vector.broadcast %cst_274 : f32 to vector<1x32xf32>
    %608 = arith.addf %606, %607 : vector<1x32xf32>
    %609 = math.rsqrt %608 : vector<1x32xf32>
    %610 = vector.broadcast %609 : vector<1x32xf32> to vector<128x32xf32>
    %611 = arith.mulf %601, %610 : vector<128x32xf32>
    %612 = vector.broadcast %593 : vector<1x32xf32> to vector<128x32xf32>
    %613 = arith.mulf %611, %612 : vector<128x32xf32>
    %614 = vector.broadcast %595 : vector<1x32xf32> to vector<128x32xf32>
    %615 = arith.addf %613, %614 : vector<128x32xf32>
    %cst_275 = arith.constant 0.000000e+00 : f32
    %616 = vector.broadcast %cst_275 : f32 to vector<128x32xf32>
    %617 = arith.maximumf %615, %616 : vector<128x32xf32>
    %c0_276 = arith.constant 0 : index
    %c0_277 = arith.constant 0 : index
    %618 = vector.load %arg7[%c0_276, %c0_277] : memref<128x32xf32, #tpu.memory_space<vmem>>, vector<128x32xf32>
    tpu.vector_store %arg7[%c0_276, %c0_277], %617 {strides = array<i32>} : memref<128x32xf32, #tpu.memory_space<vmem>>, vector<128x32xf32>,
    return
  }
}

</mosaic_0001>

<bundles_post_ra>
// kernel: unet1d_gan_forward.1
= control target key start
LH: loop header
LB: loop body
LE: loop exit
PB: predicated region body
PF: predicated region fallthrough
CT: control target
= control target key end

     0   :  { %s4220_s30 = smov 32   ;;  %vm188_vm0 = vcmask 1046528   ;;  %s4221_s14 = smov 64   ;;  %v107_v24 = vlaneseq  ;;  %vm58_vm2 = vcmask 1040384   ;;  %vm413_vm3 = vcmask 261120   ;;  %s6752_s0 = inlined_call_operand.vmem [shape: f32[128,32], index: 0, kind: input, shape index: {}]   ;;  %s6753_s1 = inlined_call_operand.vmem [shape: f32[7,96,32], index: 1, kind: input, shape index: {}]   ;;  %s6754_s2 = inlined_call_operand.vmem [shape: f32[7,1,32], index: 2, kind: input, shape index: {}]   ;;  %s6755_s3 = inlined_call_operand.vmem [shape: f32[7,1,32], index: 3, kind: input, shape index: {}]   ;;  %s6756_s4 = inlined_call_operand.vmem [shape: f32[5,128,32], index: 4, kind: input, shape index: {}]   ;;  %s6757_s5 = inlined_call_operand.vmem [shape: f32[5,1,32], index: 5, kind: input, shape index: {}]   ;;  %s6758_s6 = inlined_call_operand.vmem [shape: f32[5,1,32], index: 6, kind: input, shape index: {}]   ;;  %s6759_s7 = inlined_call_operand.vmem [shape: f32[128,32], index: 7, kind: output, shape index: {}]  }
   0x1   :  { %v4266_v0 = vld [vmem:[%s6752_s0 + $0x8] sm:$0xff]  ;;  %v4271_v1 = vld [vmem:[%s6752_s0] sm:$0xff]  ;;  %v4276_v2 = vld [vmem:[%s6752_s0 + $0x10] sm:$0xff]  ;;  %vm459_vm4 = vcmask 785408   ;;  %vm430_vm5 = vcmask 523264   ;;  %s4222_s26 = smov 96  }
   0x2   :  { %303 = vrot.lane.b32.xlu1 %v4266_v0, %s4220_s30  ;;  %301 = vrot.lane.b32.xlu0 %v4271_v1, %s4220_s30  ;;  %v190_v3 = vrot.slane %v4266_v0, 1  ;;  %v189_v4 = vrot.slane %v4271_v1, 1  ;;  %v192_v5 = vrot.slane %v4276_v2, 1  ;;  %v4290_v6 = vld [vmem:[%s6752_s0 + $0x18] sm:$0xff]  ;;  %v4298_v10 = vld [vmem:[%s6752_s0 + $0x50] sm:$0xff]  ;;  %v4343_v25 = vshrl.u32 %v107_v24, 7 }
   0x3   :  { %305 = vrot.lane.b32.xlu2 %v4276_v2, %s4220_s30  ;;  %v194_v7 = vrot.slane %v4290_v6, 1  ;;  %v4303_v11 = vld [vmem:[%s6752_s0 + $0x58] sm:$0xff]  ;;  %v208_v13 = vrot.slane %v4298_v10, 1  ;;  %v4317_v16 = vld [vmem:[%s6752_s0 + $0x20] sm:$0xff]  ;;  %v4335_v21 = vld [vmem:[%s6752_s0 + $0x28] sm:$0xff]  ;;  %v60_v51 = vrot.slane %v4266_v0, 7 }
   0x4   :  { %v193_v8 = vsel %vm188_vm0, %v190_v3, %v192_v5  ;;  %v191_v9 = vsel %vm188_vm0, %v189_v4, %v190_v3  ;;  %v210_v14 = vrot.slane %v4303_v11, 1  ;;  %v196_v17 = vrot.slane %v4317_v16, 1  ;;  %v4326_v18 = vld [vmem:[%s6752_s0 + $0x60] sm:$0xff]  ;;  %v4349_v27 = vld [vmem:[%s6752_s0 + $0x38] sm:$0xff]  ;;  %v4354_v28 = vld [vmem:[%s6752_s0 + $0x68] sm:$0xff] }
   0x5   :  { %v195_v12 = vsel %vm188_vm0, %v192_v5, %v194_v7  ;;  %v212_v19 = vrot.slane %v4326_v18, 1  ;;  %v198_v23 = vrot.slane %v4335_v21, 1  ;;  %v4359_v29 = vld [vmem:[%s6752_s0 + $0x40] sm:$0xff]  ;;  %v202_v30 = vrot.slane %v4349_v27, 1  ;;  %v4378_v36 = vld [vmem:[%s6752_s0 + $0x30] sm:$0xff]  ;;  %v458_v41 = vld [vmem:[%s6753_s1 + $0x58] sm:$0xff] }
   0x6   :  { %v211_v15 = vsel %vm188_vm0, %v208_v13, %v210_v14  ;;  %v197_v20 = vsel %vm188_vm0, %v194_v7, %v196_v17  ;;  %v204_v31 = vrot.slane %v4359_v29, 1  ;;  %v4364_v32 = vadd.s32 56, %v4343_v25  ;;  %v4391_v40 = vld [vmem:[%s6752_s0 + $0x70] sm:$0xff]  ;;  %v4406_v44 = vld [vmem:[%s6752_s0 + $0x48] sm:$0xff]  ;;  %512 = vmatpush.msra.mxu0 %v458_v41  ;;  %4111 = vmatpush.msra.mxu2 %v458_v41  ;;  %v455_v47 = vld [vmem:[%s6753_s1 + $0x40] sm:$0xff] }
   0x7   :  { %v213_v22 = vsel %vm188_vm0, %v210_v14, %v212_v19  ;;  %v199_v26 = vsel %vm188_vm0, %v196_v17, %v198_v23  ;;  %v214_v33 = vrot.slane %v4354_v28, 1  ;;  %v200_v38 = vrot.slane %v4378_v36, 1  ;;  %v457_v42 = vld [vmem:[%s6753_s1 + $0x50] sm:$0xff]  ;;  %v456_v46 = vld [vmem:[%s6753_s1 + $0x48] sm:$0xff]  ;;  %4110 = vmatpush.msra.mxu1 %v458_v41  ;;  %v454_v50 = vld [vmem:[%s6753_s1 + $0x38] sm:$0xff] }
   0x8   :  { %v205_v34 = vsel %vm188_vm0, %v202_v30, %v204_v31  ;;  %vm6785_vm1 = vcmp.ne.s32.totalorder %v4364_v32, 63  ;;  %v216_v43 = vrot.slane %v4391_v40, 1  ;;  %v206_v45 = vrot.slane %v4406_v44, 1  ;;  %513 = vmatpush.msra.mxu0 %v457_v42  ;;  %4113 = vmatpush.msra.mxu2 %v457_v42  ;;  %v453_v53 = vld [vmem:[%s6753_s1 + $0x30] sm:$0xff]  ;;  %v452_v54 = vld [vmem:[%s6753_s1 + $0x28] sm:$0xff]  ;;  %v4443_v57 = vld [vmem:[%s6752_s0 + $0x78] sm:$0xff] }
   0x9   :  { %v215_v35 = vsel %vm188_vm0, %v212_v19, %v214_v33  ;;  %v292_v37 = vsel %vm6785_vm1, %v205_v34, 0.0  ;;  %v201_v39 = vsel %vm188_vm0, %v198_v23, %v200_v38  ;;  %4112 = vmatpush.msra.mxu1 %v457_v42  ;;  %v62_v52 = vrot.slane %v4276_v2, 7  ;;  %v451_v0 = vld [vmem:[%s6753_s1 + $0x20] sm:$0xff]  ;;  %v450_v3 = vld [vmem:[%s6753_s1 + $0x18] sm:$0xff]  ;;  %v448_v4 = vld [vmem:[%s6753_s1 + $0x8] sm:$0xff] }
   0xa   :  { %367 = vrot.lane.b32.xlu1 %v193_v8, %s4221_s14  ;;  %365 = vrot.lane.b32.xlu0 %v191_v9, %s4221_s14  ;;  %v217_v48 = vsel %vm188_vm0, %v214_v33, %v216_v43  ;;  %v207_v49 = vsel %vm188_vm0, %v204_v31, %v206_v45  ;;  %v203_v55 = vsel %vm188_vm0, %v200_v38, %v202_v30  ;;  %v218_v58 = vrot.slane %v4443_v57, 1  ;;  %v447_v5 = vld [vmem:[%s6753_s1] sm:$0xff] }
   0xb   :  { %369 = vrot.lane.b32.xlu2 %v195_v12, %s4221_s14  ;;  %514 = vmatpush.msra.mxu0 %v456_v46  ;;  %v4438_v56 = vsel %vm58_vm2, %v60_v51, %v62_v52  ;;  %v209_v60 = vsel %vm188_vm0, %v206_v45, %v208_v13  ;;  %v59_v62 = vrot.slane %v4271_v1, 7  ;;  %v449_v1 = vld [vmem:[%s6753_s1 + $0x10] sm:$0xff]  ;;  %v78_v23 = vrot.slane %v4298_v10, 7 }
   0xc   :  { %4115 = vmatpush.msra.mxu2 %v456_v46  ;;  %4114 = vmatpush.msra.mxu1 %v456_v46  ;;  %v219_v59 = vsel %vm188_vm0, %v216_v43, %v218_v58  ;;  %v236_v61 = vsel %vm188_vm0, %v218_v58, 0.0  ;;  %v74_v30 = vrot.slane %v4359_v29, 7  ;;  %v64_v45 = vrot.slane %v4290_v6, 7 }
   0xd   :  { %515 = vmatpush.msra.mxu0 %v455_v47  ;;  %v61_v63 = vsel %vm58_vm2, %v59_v62, %v60_v51  ;;  %v106_v14 = vsel %vm58_vm2, 0.0, %v59_v62 }
   0xe   :  { %4117 = vmatpush.msra.mxu2 %v455_v47  ;;  %4116 = vmatpush.msra.mxu1 %v455_v47 }
   0xf   :  { %516 = vmatpush.msra.mxu0 %v454_v50 }
  0x10   :  { %4119 = vmatpush.msra.mxu2 %v454_v50  ;;  %4118 = vmatpush.msra.mxu1 %v454_v50 }
  0x11   :  { %517 = vmatpush.msra.mxu0 %v453_v53 }
  0x12   :  { %385 = vrot.lane.b32.xlu1 %v211_v15, %s4221_s14  ;;  %321 = vrot.lane.b32.xlu0 %v4298_v10, %s4220_s30  ;;  %v80_v10 = vrot.slane %v4303_v11, 7 }
  0x13   :  { %307 = vrot.lane.b32.xlu2 %v4290_v6, %s4220_s30  ;;  %4121 = vmatpush.msra.mxu2 %v453_v53 }
  0x14   :  { %4120 = vmatpush.msra.mxu1 %v453_v53  ;;  %518 = vmatpush.msra.mxu0 %v452_v54 }
  0x15   :  { %4123 = vmatpush.msra.mxu2 %v452_v54 }
  0x16   :  { %4122 = vmatpush.msra.mxu1 %v452_v54  ;;  %519 = vmatpush.msra.mxu0 %v451_v0  ;;  %v82_v54 = vrot.slane %v4326_v18, 7 }
  0x17   :  { %4125 = vmatpush.msra.mxu2 %v451_v0 }
  0x18   :  { %4124 = vmatpush.msra.mxu1 %v451_v0  ;;  %520 = vmatpush.msra.mxu0 %v450_v3 }
  0x19   :  { %4127 = vmatpush.msra.mxu2 %v450_v3 }
  0x1a   :  { %323 = vrot.lane.b32.xlu1 %v4303_v11, %s4220_s30  ;;  %371 = vrot.lane.b32.xlu0 %v197_v20, %s4221_s14 }
  0x1b   :  { %387 = vrot.lane.b32.xlu2 %v213_v22, %s4221_s14  ;;  %4126 = vmatpush.msra.mxu1 %v450_v3  ;;  %v76_v22 = vrot.slane %v4406_v44, 7 }
  0x1c   :  { %521 = vmatpush.msra.mxu0 %v449_v1  ;;  %4129 = vmatpush.msra.mxu2 %v449_v1 }
  0x1d   :  { %4128 = vmatpush.msra.mxu1 %v449_v1  ;;  %v77_v2 = vsel %vm58_vm2, %v74_v30, %v76_v22  ;;  %v68_v1 = vrot.slane %v4335_v21, 7 }
  0x1e   :  { %522 = vmatpush.msra.mxu0 %v448_v4  ;;  %4131 = vmatpush.msra.mxu2 %v448_v4 }
  0x1f   :  { %4130 = vmatpush.msra.mxu1 %v448_v4 }
  0x20   :  { %523 = vmatpush.msra.mxu0 %v447_v5  ;;  %4133 = vmatpush.msra.mxu2 %v447_v5 }
  0x21   :  { %4132 = vmatpush.msra.mxu1 %v447_v5  ;;  %v4531_v5 = vadd.s32 64, %v4343_v25 }
  0x22   :  { %373 = vrot.lane.b32.xlu1 %v199_v26, %s4221_s14  ;;  %309 = vrot.lane.b32.xlu0 %v4317_v16, %s4220_s30  ;;  %v79_v26 = vsel %vm58_vm2, %v76_v22, %v78_v23 }
  0x23   :  { %325 = vrot.lane.b32.xlu2 %v4326_v18, %s4220_s30  ;;  %vm6784_vm6 = vcmp.ne.s32.totalorder %v4531_v5, 64 }
  0x2a   :  { %315 = vrot.lane.b32.xlu1 %v4349_v27, %s4220_s30  ;;  %389 = vrot.lane.b32.xlu0 %v215_v35, %s4221_s14  ;;  %v72_v35 = vrot.slane %v4349_v27, 7  ;;  %v81_v27 = vsel %vm58_vm2, %v78_v23, %v80_v10 }
  0x2b   :  { %379 = vrot.lane.b32.xlu2 %v292_v37, %s4221_s14 }
  0x32   :  { %375 = vrot.lane.b32.xlu1 %v201_v39, %s4221_s14  ;;  %311 = vrot.lane.b32.xlu0 %v4335_v21, %s4220_s30 }
  0x33   :  { %327 = vrot.lane.b32.xlu2 %v4354_v28, %s4220_s30 }
  0x3a   :  { %317 = vrot.lane.b32.xlu1 %v4359_v29, %s4220_s30  ;;  %391 = vrot.lane.b32.xlu0 %v217_v48, %s4221_s14  ;;  %v75_v29 = vsel %vm58_vm2, %v72_v35, %v74_v30  ;;  %v65_v48 = vsel %vm58_vm2, %v62_v52, %v64_v45  ;;  %v83_v52 = vsel %vm58_vm2, %v80_v10, %v82_v54 }
  0x3b   :  { %381 = vrot.lane.b32.xlu2 %v207_v49, %s4221_s14  ;;  %v66_v49 = vrot.slane %v4317_v16, 7 }
  0x3d   :  { %v67_v58 = vsel %vm58_vm2, %v64_v45, %v66_v49  ;;  %v69_v4 = vsel %vm58_vm2, %v66_v49, %v68_v1 }
  0x42   :  { %377 = vrot.lane.b32.xlu1 %v203_v55, %s4221_s14  ;;  %313 = vrot.lane.b32.xlu0 %v4378_v36, %s4220_s30 }
  0x43   :  { %329 = vrot.lane.b32.xlu2 %v4391_v40, %s4220_s30 }
  0x4a   :  { %319 = vrot.lane.b32.xlu1 %v4406_v44, %s4220_s30  ;;  %393 = vrot.lane.b32.xlu0 %v219_v59, %s4221_s14 }
  0x4b   :  { %383 = vrot.lane.b32.xlu2 %v209_v60, %s4221_s14 }
  0x52   :  { %331 = vrot.lane.b32.xlu0 %v4443_v57, %s4220_s30  ;;  %395 = vrot.lane.b32.xlu1 %v236_v61, %s4221_s14 }
  0x5d   :  { %v306_v7 = vpop.permute.xlu2 %305 }
  0x5e   :  { %v416_v42 = vsel %vm413_vm3, %v4438_v56, %v306_v7  ;;  %v70_v56 = vrot.slane %v4378_v36, 7 }
  0x60   :  { %v73_v59 = vsel %vm58_vm2, %v70_v56, %v72_v35 }
  0x65   :  { %v370_v8 = vpop.permute.xlu2 %369 }
  0x66   :  { %v433_v47 = vsel %vm430_vm5, %v416_v42, %v370_v8 }
  0x6d   :  { %v308_v13 = vpop.permute.xlu2 %307 }
  0x6e   :  { %v417_v51 = vsel %vm413_vm3, %v65_v48, %v308_v13 }
  0x74   :  { %v304_v9 = vpop.permute.xlu1 %303  ;;  %v302_v12 = vpop.permute.xlu0 %301 }
  0x75   :  { %v414_v15 = vsel %vm413_vm3, %v106_v14, %v302_v12  ;;  %v388_v24 = vpop.permute.xlu2 %387  ;;  %v415_v31 = vsel %vm413_vm3, %v61_v63, %v304_v9  ;;  %v84_v12 = vrot.slane %v4354_v28, 7 }
  0x77   :  { %v85_v14 = vsel %vm58_vm2, %v82_v54, %v84_v12 }
  0x7c   :  { %v368_v17 = vpop.permute.xlu1 %367  ;;  %v366_v19 = vpop.permute.xlu0 %365 }
  0x7d   :  { %v431_v20 = vsel %vm430_vm5, %v414_v15, %v366_v19  ;;  %v432_v38 = vsel %vm430_vm5, %v415_v31, %v368_v17  ;;  %v326_v41 = vpop.permute.xlu2 %325  ;;  %v180_v15 = vsel %vm6784_vm6, %v75_v29, 0.0 }
  0x7e   :  { %3891 = vmatmul.msk.f32.vlgmr.msra.gmra.mxu0 %vm459_vm4, %v431_v20  ;;  %v426_v60 = vsel %vm413_vm3, %v83_v52, %v326_v41 }
  0x84   :  { %v386_v33 = vpop.permute.xlu1 %385  ;;  %v322_v34 = vpop.permute.xlu0 %321 }
  0x85   :  { %v424_v37 = vsel %vm413_vm3, %v79_v26, %v322_v34  ;;  %v380_v50 = vpop.permute.xlu2 %379  ;;  %v71_v26 = vsel %vm58_vm2, %v68_v1, %v70_v56  ;;  %v86_v34 = vrot.slane %v4391_v40, 7  ;;  %v88_v40 = vrot.slane %v4443_v57, 7 }
  0x86   :  { %3892 = vmatmul.msk.f32.gmra.mxu0 %vm459_vm4, %v432_v38  ;;  %v441_v39 = vsel %vm430_vm5, %v424_v37, %v386_v33 }
  0x87   :  { %3901 = vmatmul.msk.f32.vlgmr.msra.gmra.mxu2 %vm459_vm4, %v441_v39  ;;  %v87_v37 = vsel %vm58_vm2, %v84_v12, %v86_v34 }
  0x8c   :  { %v324_v43 = vpop.permute.xlu1 %323  ;;  %v372_v44 = vpop.permute.xlu0 %371 }
  0x8d   :  { %v425_v46 = vsel %vm413_vm3, %v81_v27, %v324_v43  ;;  %v434_v55 = vsel %vm430_vm5, %v417_v51, %v372_v44  ;;  %v328_v0 = vpop.permute.xlu2 %327  ;;  %v89_v43 = vsel %vm58_vm2, %v86_v34, %v88_v40 }
  0x8e   :  { %3893 = vmatmul.msk.f32.gmra.mxu0 %vm459_vm4, %v433_v47  ;;  %v442_v11 = vsel %vm430_vm5, %v425_v46, %v388_v24  ;;  %v427_v17 = vsel %vm413_vm3, %v85_v14, %v328_v0 }
  0x8f   :  { %3902 = vmatmul.msk.f32.gmra.mxu2 %vm459_vm4, %v442_v11 }
  0x94   :  { %v374_v6 = vpop.permute.xlu1 %373  ;;  %v310_v53 = vpop.permute.xlu0 %309 }
  0x95   :  { %v418_v16 = vsel %vm413_vm3, %v67_v58, %v310_v53  ;;  %v382_v21 = vpop.permute.xlu2 %381 }
  0x96   :  { %3894 = vmatmul.msk.f32.gmra.mxu0 %vm459_vm4, %v434_v55  ;;  %v435_v63 = vsel %vm430_vm5, %v418_v16, %v374_v6 }
  0x9c   :  { %v316_v61 = vpop.permute.xlu1 %315  ;;  %v390_v18 = vpop.permute.xlu0 %389 }
  0x9d   :  { %v421_v62 = vsel %vm413_vm3, %v73_v59, %v316_v61  ;;  %v443_v36 = vsel %vm430_vm5, %v426_v60, %v390_v18  ;;  %v330_v24 = vpop.permute.xlu2 %329 }
  0x9e   :  { %3895 = vmatmul.msk.f32.gmra.mxu0 %vm459_vm4, %v435_v63  ;;  %3903 = vmatmul.msk.f32.gmra.mxu2 %vm459_vm4, %v443_v36  ;;  %v438_v3 = vsel %vm430_vm5, %v421_v62, %v380_v50  ;;  %v428_v39 = vsel %vm413_vm3, %v87_v37, %v330_v24 }
  0x9f   :  { %3898 = vmatmul.msk.f32.vlgmr.msra.gmra.mxu1 %vm459_vm4, %v438_v3 }
  0xa4   :  { %v376_v7 = vpop.permute.xlu1 %375  ;;  %v312_v8 = vpop.permute.xlu0 %311 }
  0xa5   :  { %v419_v9 = vsel %vm413_vm3, %v69_v4, %v312_v8  ;;  %v384_v38 = vpop.permute.xlu2 %383 }
  0xa6   :  { %v436_v13 = vsel %vm430_vm5, %v419_v9, %v376_v7 }
  0xa7   :  { %3896 = vmatmul.msk.f32.gmra.mxu0 %vm459_vm4, %v436_v13 }
  0xac   :  { %v318_v19 = vpop.permute.xlu1 %317  ;;  %v392_v20 = vpop.permute.xlu0 %391 }
  0xad   :  { %v422_v22 = vsel %vm413_vm3, %v180_v15, %v318_v19  ;;  %v444_v28 = vsel %vm430_vm5, %v427_v17, %v392_v20 }
  0xae   :  { %3904 = vmatmul.msk.f32.gmra.mxu2 %vm459_vm4, %v444_v28  ;;  %v439_v23 = vsel %vm430_vm5, %v422_v22, %v382_v21 }
  0xaf   :  { %3899 = vmatmul.msk.f32.gmra.mxu1 %vm459_vm4, %v439_v23 }
  0xb4   :  { %v378_v30 = vpop.permute.xlu1 %377  ;;  %v314_v31 = vpop.permute.xlu0 %313 }
  0xb5   :  { %v420_v33 = vsel %vm413_vm3, %v71_v26, %v314_v31 }
  0xb6   :  { %v437_v35 = vsel %vm430_vm5, %v420_v33, %v378_v30 }
  0xb7   :  { %3897 = vmatmul.msk.f32.gmra.mxu0 %vm459_vm4, %v437_v35 }
  0xbc   :  { %v320_v10 = vpop.permute.xlu1 %319  ;;  %v394_v29 = vpop.permute.xlu0 %393 }
  0xbd   :  { %v423_v41 = vsel %vm413_vm3, %v77_v2, %v320_v10  ;;  %v445_v42 = vsel %vm430_vm5, %v428_v39, %v394_v29 }
  0xbe   :  { %3905 = vmatmul.msk.f32.gmra.mxu2 %vm459_vm4, %v445_v42  ;;  %v440_v27 = vsel %vm430_vm5, %v423_v41, %v384_v38 }
  0xbf   :  { %3900 = vmatmul.msk.f32.gmra.mxu1 %vm459_vm4, %v440_v27 }
  0xc4   :  { %v332_v44 = vpop.permute.xlu0 %331  ;;  %v396_v45 = vpop.permute.xlu1 %395 }
  0xc5   :  { %v429_v46 = vsel %vm413_vm3, %v89_v43, %v332_v44 }
  0xc6   :  { %v446_v47 = vsel %vm430_vm5, %v429_v46, %v396_v45 }
  0xc7   :  { %3906 = vmatmul.msk.f32.gmra.mxu2 %vm459_vm4, %v446_v47 }
  0xfb   :  { %v525_v11 = vpop.f32.mrf.mxu0 }
  0xfc   :  { %v575_v54 = vsel %vm413_vm3, %v525_v11, 0.0 }
 0x103   :  { %v528_v48 = vpop.f32.mrf.mxu0 }
 0x104   :  { %v576_v57 = vsel %vm413_vm3, %v528_v48, 0.0 }
 0x105   :  { %v577_v56 = vadd.f32 %v576_v57, %v575_v54 }
 0x10a   :  { %v4564_v51 = vpop.f32.mrf.mxu2 }
 0x10b   :  { %v531_v49 = vpop.f32.mrf.mxu0  ;;  %v594_v15 = vsel %vm413_vm3, %v4564_v51, 0.0 }
 0x10c   :  { %v578_v55 = vsel %vm413_vm3, %v531_v49, 0.0 }
 0x10d   :  { %v579_v16 = vadd.f32 %v578_v55, %v577_v56 }
 0x112   :  { %v4567_v53 = vpop.f32.mrf.mxu2 }
 0x113   :  { %v534_v50 = vpop.f32.mrf.mxu0  ;;  %v596_v19 = vsel %vm413_vm3, %v4567_v53, 0.0 }
 0x114   :  { %v580_v52 = vsel %vm413_vm3, %v534_v50, 0.0 }
 0x115   :  { %v581_v60 = vadd.f32 %v580_v52, %v579_v16 }
 0x11b   :  { %v537_v6 = vpop.f32.mrf.mxu0 }
 0x11c   :  { %v546_v58 = vpop.f32.mrf.mxu1  ;;  %v582_v59 = vsel %vm413_vm3, %v537_v6, 0.0 }
 0x11d   :  { %v583_v62 = vadd.f32 %v582_v59, %v581_v60  ;;  %v588_v4 = vsel %vm413_vm3, %v546_v58, 0.0 }
 0x121   :  { %v4573_v61 = vpop.f32.mrf.mxu2 }
 0x122   :  { %v598_v28 = vsel %vm413_vm3, %v4573_v61, 0.0 }
 0x124   :  { %v540_v2 = vpop.f32.mrf.mxu0 }
 0x125   :  { %v584_v18 = vsel %vm413_vm3, %v540_v2, 0.0 }
 0x126   :  { %v585_v63 = vadd.f32 %v584_v18, %v583_v62 }
 0x12c   :  { %v549_v36 = vpop.f32.mrf.mxu1 }
 0x12d   :  { %v590_v9 = vsel %vm413_vm3, %v549_v36, 0.0 }
 0x131   :  { %v4578_v8 = vpop.f32.mrf.mxu2 }
 0x132   :  { %v600_v24 = vsel %vm413_vm3, %v4578_v8, 0.0 }
 0x134   :  { %v543_v0 = vpop.f32.mrf.mxu0 }
 0x135   :  { %v586_v3 = vsel %vm413_vm3, %v543_v0, 0.0 }
 0x136   :  { %v587_v1 = vadd.f32 %v586_v3, %v585_v63 }
 0x138   :  { %v589_v7 = vadd.f32 %v588_v4, %v587_v1 }
 0x13a   :  { %v591_v13 = vadd.f32 %v590_v9, %v589_v7 }
 0x13c   :  { %v552_v12 = vpop.f32.mrf.mxu1 }
 0x13d   :  { %v592_v21 = vsel %vm413_vm3, %v552_v12, 0.0 }
 0x13e   :  { %v593_v14 = vadd.f32 %v592_v21, %v591_v13 }
 0x140   :  { %v595_v17 = vadd.f32 %v594_v15, %v593_v14 }
 0x141   :  { %v4586_v20 = vpop.f32.mrf.mxu2 }
 0x142   :  { %v597_v22 = vadd.f32 %v596_v19, %v595_v17  ;;  %v602_v30 = vsel %vm413_vm3, %v4586_v20, 0.0 }
 0x144   :  { %v599_v23 = vadd.f32 %v598_v28, %v597_v22 }
 0x146   :  { %v601_v26 = vadd.f32 %v600_v24, %v599_v23 }
 0x148   :  { %v603_v31 = vadd.f32 %v602_v30, %v601_v26 }
 0x14a   :  { %v570_v33 = vpop.f32.mrf.mxu2 }
 0x14b   :  { %v604_v34 = vsel %vm413_vm3, %v570_v33, 0.0 }
 0x14c   :  { %v605_v35 = vadd.f32 %v604_v34, %v603_v31 }
 0x14e   :  { %v606_v37 = vrot.slane %v605_v35, 4 }
 0x150   :  { %v607_v38 = vadd.f32 %v606_v37, %v605_v35 }
 0x152   :  { %v608_v39 = vrot.slane %v607_v38, 2 }
 0x154   :  { %v609_v10 = vadd.f32 %v608_v39, %v607_v38 }
 0x156   :  { %v610_v29 = vrot.slane %v609_v10, 1 }
 0x158   :  { %v611_v41 = vadd.f32 %v610_v29, %v609_v10 }
 0x15a   :  { %v612_v42 = vmul.f32 0.0078125, %v611_v41 }
 0x15c   :  { %v4595_v27 = vsub.f32 %v525_v11, %v612_v42  ;;  %v4597_v40 = vsub.f32 %v528_v48, %v612_v42  ;;  %v4599_v43 = vsub.f32 %v531_v49, %v612_v42  ;;  %v4601_v44 = vsub.f32 %v534_v50, %v612_v42 }
 0x15d   :  { %v4607_v47 = vsub.f32 %v537_v6, %v612_v42  ;;  %v4611_v54 = vsub.f32 %v540_v2, %v612_v42  ;;  %v4617_v55 = vsub.f32 %v543_v0, %v612_v42  ;;  %v4622_v16 = vsub.f32 %v546_v58, %v612_v42 }
 0x15e   :  { %v629_v45 = vmul.f32 %v4595_v27, %v4595_v27  ;;  %v630_v46 = vmul.f32 %v4597_v40, %v4597_v40  ;;  %v631_v57 = vmul.f32 %v4599_v43, %v4599_v43  ;;  %v632_v11 = vmul.f32 %v4601_v44, %v4601_v44 }
 0x15f   :  { %v633_v56 = vmul.f32 %v4607_v47, %v4607_v47  ;;  %v634_v2 = vmul.f32 %v4611_v54, %v4611_v54  ;;  %v4627_v18 = vsub.f32 %v549_v36, %v612_v42  ;;  %v635_v62 = vmul.f32 %v4617_v55, %v4617_v55 }
 0x160   :  { %v645_v48 = vsel %vm413_vm3, %v629_v45, 0.0  ;;  %v646_v49 = vsel %vm413_vm3, %v630_v46, 0.0  ;;  %v648_v6 = vsel %vm413_vm3, %v631_v57, 0.0  ;;  %v650_v59 = vsel %vm413_vm3, %v632_v11, 0.0 }
 0x161   :  { %v647_v50 = vadd.f32 %v646_v49, %v645_v48  ;;  %v652_v63 = vsel %vm413_vm3, %v633_v56, 0.0  ;;  %v4632_v3 = vsub.f32 %v552_v12, %v612_v42  ;;  %v636_v58 = vmul.f32 %v4622_v16, %v4622_v16 }
 0x162   :  { %v654_v1 = vsel %vm413_vm3, %v634_v2, 0.0  ;;  %v4638_v7 = vsub.f32 %v4564_v51, %v612_v42  ;;  %v637_v36 = vmul.f32 %v4627_v18, %v4627_v18  ;;  %v656_v9 = vsel %vm413_vm3, %v635_v62, 0.0 }
 0x163   :  { %v649_v52 = vadd.f32 %v648_v6, %v647_v50  ;;  %v4644_v21 = vsub.f32 %v4567_v53, %v612_v42  ;;  %v638_v12 = vmul.f32 %v4632_v3, %v4632_v3  ;;  %v658_v14 = vsel %vm413_vm3, %v636_v58, 0.0  ;;  %v4172_v58 = vld [vmem:[%s6754_s2] ss:$0 sm:$0xff] }
 0x164   :  { %v4650_v17 = vsub.f32 %v4573_v61, %v612_v42  ;;  %v639_v51 = vmul.f32 %v4638_v7, %v4638_v7  ;;  %v660_v19 = vsel %vm413_vm3, %v637_v36, 0.0  ;;  %v4656_v28 = vsub.f32 %v4578_v8, %v612_v42  ;;  %v4682_v36 = vld [vmem:[%s6755_s3] ss:$0 sm:$0xff] }
 0x165   :  { %v651_v60 = vadd.f32 %v650_v59, %v649_v52  ;;  %v640_v53 = vmul.f32 %v4644_v21, %v4644_v21  ;;  %v662_v23 = vsel %vm413_vm3, %v638_v12, 0.0  ;;  %v4662_v26 = vsub.f32 %v4586_v20, %v612_v42 }
 0x166   :  { %v641_v61 = vmul.f32 %v4650_v17, %v4650_v17  ;;  %v664_v30 = vsel %vm413_vm3, %v639_v51, 0.0  ;;  %v628_v34 = vsub.f32 %v570_v33, %v612_v42  ;;  %v642_v8 = vmul.f32 %v4656_v28, %v4656_v28 }
 0x167   :  { %v653_v0 = vadd.f32 %v652_v63, %v651_v60  ;;  %v666_v35 = vsel %vm413_vm3, %v640_v53, 0.0  ;;  %v643_v38 = vmul.f32 %v4662_v26, %v4662_v26 }
 0x168   :  { %v668_v39 = vsel %vm413_vm3, %v641_v61, 0.0  ;;  %v644_v10 = vmul.f32 %v628_v34, %v628_v34  ;;  %v670_v29 = vsel %vm413_vm3, %v642_v8, 0.0 }
 0x169   :  { %v655_v4 = vadd.f32 %v654_v1, %v653_v0  ;;  %v672_v45 = vsel %vm413_vm3, %v643_v38, 0.0 }
 0x16a   :  { %v674_v33 = vsel %vm413_vm3, %v644_v10, 0.0 }
 0x16b   :  { %v657_v13 = vadd.f32 %v656_v9, %v655_v4 }
 0x16d   :  { %v659_v15 = vadd.f32 %v658_v14, %v657_v13 }
 0x16f   :  { %v661_v22 = vadd.f32 %v660_v19, %v659_v15 }
 0x171   :  { %v663_v24 = vadd.f32 %v662_v23, %v661_v22 }
 0x173   :  { %v665_v31 = vadd.f32 %v664_v30, %v663_v24 }
 0x175   :  { %v667_v37 = vadd.f32 %v666_v35, %v665_v31 }
 0x177   :  { %v669_v20 = vadd.f32 %v668_v39, %v667_v37 }
 0x179   :  { %v671_v41 = vadd.f32 %v670_v29, %v669_v20 }
 0x17b   :  { %v673_v46 = vadd.f32 %v672_v45, %v671_v41 }
 0x17d   :  { %v675_v42 = vadd.f32 %v674_v33, %v673_v46 }
 0x17f   :  { %v676_v57 = vrot.slane %v675_v42, 4 }
 0x181   :  { %v677_v11 = vadd.f32 %v676_v57, %v675_v42 }
 0x183   :  { %v678_v48 = vrot.slane %v677_v11, 2 }
 0x185   :  { %v679_v49 = vadd.f32 %v678_v48, %v677_v11 }
 0x187   :  { %v680_v50 = vrot.slane %v679_v49, 1 }
 0x189   :  { %v681_v56 = vadd.f32 %v680_v50, %v679_v49 }
 0x18b   :  { %v682_v6 = vmul.f32 0.0078125, %v681_v56 }
 0x18d   :  { %v683_v52 = vadd.f32 1e-05, %v682_v6 }
 0x18f   :  { %4196 = vrsqrt.f32 %v683_v52  ;;  %vm690_vm8 = vweird.f32 %v683_v52 }
 0x195   :  { %v4197_v2 = vpop.eup %4196 }
 0x196   :  { %v685_v59 = vmul.f32 %v4197_v2, %v683_v52  ;;  %vm691_vm7 = vweird.f32 %v4197_v2 }
 0x197   :  { %vm692_vm9 = vmor %vm690_vm8, %vm691_vm7 }
 0x198   :  { %v686_v60 = vmul.f32 %v4197_v2, %v685_v59 }
 0x19a   :  { %v687_v62 = vmul.f32 0.5, %v686_v60 }
 0x19c   :  { %v688_v63 = vsub.f32 1.5, %v687_v62 }
 0x19e   :  { %v689_v0 = vmul.f32 %v4197_v2, %v688_v63 }
 0x1a0   :  { %v693_v1 = vsel %vm692_vm9, %v4197_v2, %v689_v0 }
 0x1a1   :  { %v709_v4 = vmul.f32 %v693_v1, %v628_v34  ;;  %v695_v9 = vmul.f32 %v693_v1, %v4597_v40  ;;  %v694_v13 = vmul.f32 %v693_v1, %v4595_v27  ;;  %v696_v12 = vmul.f32 %v693_v1, %v4599_v43 }
 0x1a2   :  { %v697_v14 = vmul.f32 %v693_v1, %v4601_v44  ;;  %v698_v15 = vmul.f32 %v693_v1, %v4607_v47  ;;  %v699_v61 = vmul.f32 %v693_v1, %v4611_v54  ;;  %v700_v30 = vmul.f32 %v693_v1, %v4617_v55 }
 0x1a3   :  { %v728_v51 = vmul.f32 %v4172_v58, %v709_v4  ;;  %v714_v19 = vmul.f32 %v4172_v58, %v695_v9  ;;  %v713_v22 = vmul.f32 %v4172_v58, %v694_v13  ;;  %v715_v53 = vmul.f32 %v4172_v58, %v696_v12 }
 0x1a4   :  { %v716_v23 = vmul.f32 %v4172_v58, %v697_v14  ;;  %v717_v24 = vmul.f32 %v4172_v58, %v698_v15  ;;  %v718_v55 = vmul.f32 %v4172_v58, %v699_v61  ;;  %v719_v39 = vmul.f32 %v4172_v58, %v700_v30 }
 0x1a5   :  { %v4692_v40 = vadd.f32 %v4682_v36, %v728_v51  ;;  %v733_v27 = vadd.f32 %v4682_v36, %v714_v19  ;;  %v732_v43 = vadd.f32 %v4682_v36, %v713_v22  ;;  %v734_v44 = vadd.f32 %v4682_v36, %v715_v53 }
 0x1a6   :  { %v735_v47 = vadd.f32 %v4682_v36, %v716_v23  ;;  %v736_v38 = vadd.f32 %v4682_v36, %v717_v24  ;;  %v701_v29 = vmul.f32 %v693_v1, %v4622_v16  ;;  %v702_v41 = vmul.f32 %v693_v1, %v4627_v18 }
 0x1a7   :  { %v4698_v31 = vmax.f32 %v733_v27, 0.0  ;;  %v4700_v34 = vmax.f32 %v732_v43, 0.0  ;;  %v4702_v8 = vmax.f32 %v734_v44, 0.0  ;;  %v737_v46 = vadd.f32 %v4682_v36, %v718_v55 }
 0x1a8   :  { %v4704_v54 = vmax.f32 %v735_v47, 0.0  ;;  %v4720_v33 = vmax.f32 %v736_v38, 0.0  ;;  %v738_v42 = vadd.f32 %v4682_v36, %v719_v39  ;;  %v703_v57 = vmul.f32 %v693_v1, %v4632_v3 }
 0x1a9   :  { %910 = vrot.lane.b32.xlu1 %v4698_v31, %s4220_s30  ;;  %908 = vrot.lane.b32.xlu2 %v4700_v34, %s4220_s30  ;;  %v844_v35 = vrot.slane %v4700_v34, 1  ;;  %v845_v37 = vrot.slane %v4698_v31, 1  ;;  %v847_v10 = vrot.slane %v4702_v8, 1  ;;  %v704_v11 = vmul.f32 %v693_v1, %v4638_v7 }
 0x1aa   :  { %v849_v45 = vrot.slane %v4704_v54, 1  ;;  %v705_v48 = vmul.f32 %v693_v1, %v4644_v21  ;;  %v706_v16 = vmul.f32 %v693_v1, %v4650_v17  ;;  %v707_v18 = vmul.f32 %v693_v1, %v4656_v28 }
 0x1ab   :  { %v846_v20 = vsel %vm188_vm0, %v844_v35, %v845_v37  ;;  %v708_v49 = vmul.f32 %v693_v1, %v4662_v26  ;;  %v848_v50 = vsel %vm188_vm0, %v845_v37, %v847_v10  ;;  %v720_v56 = vmul.f32 %v4172_v58, %v701_v29 }
 0x1ac   :  { %972 = vrot.lane.b32.xlu0 %v846_v20, %s4221_s14  ;;  %v721_v6 = vmul.f32 %v4172_v58, %v702_v41  ;;  %v722_v52 = vmul.f32 %v4172_v58, %v703_v57  ;;  %v850_v2 = vsel %vm188_vm0, %v847_v10, %v849_v45  ;;  %v723_v59 = vmul.f32 %v4172_v58, %v704_v11 }
 0x1ad   :  { %v726_v60 = vmul.f32 %v4172_v58, %v707_v18  ;;  %v727_v3 = vmul.f32 %v4172_v58, %v708_v49  ;;  %v724_v7 = vmul.f32 %v4172_v58, %v705_v48  ;;  %v4733_v21 = vmax.f32 %v737_v46, 0.0 }
 0x1ae   :  { %v725_v17 = vmul.f32 %v4172_v58, %v706_v16  ;;  %v851_v62 = vrot.slane %v4720_v33, 1  ;;  %v4738_v63 = vmax.f32 %v738_v42, 0.0  ;;  %v740_v0 = vadd.f32 %v4682_v36, %v721_v6 }
 0x1af   :  { %v745_v28 = vadd.f32 %v4682_v36, %v726_v60  ;;  %v746_v26 = vadd.f32 %v4682_v36, %v727_v3  ;;  %v741_v1 = vadd.f32 %v4682_v36, %v722_v52  ;;  %v739_v4 = vadd.f32 %v4682_v36, %v720_v56 }
 0x1b0   :  { %v742_v9 = vadd.f32 %v4682_v36, %v723_v59  ;;  %v743_v12 = vadd.f32 %v4682_v36, %v724_v7  ;;  %v853_v14 = vrot.slane %v4733_v21, 1  ;;  %v744_v15 = vadd.f32 %v4682_v36, %v725_v17 }
 0x1b1   :  { %976 = vrot.lane.b32.xlu1 %v850_v2, %s4221_s14  ;;  %974 = vrot.lane.b32.xlu2 %v848_v50, %s4221_s14  ;;  %v4746_v58 = vmax.f32 %v745_v28, 0.0  ;;  %v4748_v13 = vmax.f32 %v746_v26, 0.0  ;;  %v855_v19 = vrot.slane %v4738_v63, 1  ;;  %v756_v22 = vmax.f32 %v740_v0, 0.0 }
 0x1b2   :  { %v4755_v53 = vmax.f32 %v741_v1, 0.0  ;;  %v852_v24 = vsel %vm188_vm0, %v849_v45, %v851_v62  ;;  %v755_v61 = vmax.f32 %v739_v4, 0.0  ;;  %v4759_v30 = vmax.f32 %v742_v9, 0.0 }
 0x1b3   :  { %v869_v51 = vrot.slane %v4746_v58, 1  ;;  %v871_v23 = vrot.slane %v4748_v13, 1  ;;  %v780_v27 = vrot.slane %v4700_v34, 7  ;;  %v759_v36 = vmax.f32 %v743_v12, 0.0 }
 0x1b4   :  { %912 = vrot.lane.b32.xlu0 %v4702_v8, %s4220_s30  ;;  %v783_v44 = vrot.slane %v4702_v8, 7  ;;  %v785_v47 = vrot.slane %v4704_v54, 7  ;;  %v4775_v55 = vmax.f32 %v744_v15, 0.0  ;;  %v781_v35 = vrot.slane %v4698_v31, 7  ;;  %v3917_v15 = vld [vmem:[%s6753_s1 + $0xb0] sm:$0xff] }
 0x1b5   :  { %v4771_v43 = vsel %vm188_vm0, %v869_v51, %v871_v23  ;;  %v789_v37 = vrot.slane %v4733_v21, 7  ;;  %v791_v38 = vrot.slane %v4738_v63, 7  ;;  %v787_v20 = vrot.slane %v4720_v33, 7 }
 0x1b6   :  { %v4781_v39 = vsel %vm58_vm2, %v783_v44, %v785_v47  ;;  %v795_v10 = vrot.slane %v756_v22, 7  ;;  %v797_v29 = vrot.slane %v4755_v53, 7  ;;  %v4789_v8 = vsel %vm58_vm2, %v780_v27, %v781_v35 }
 0x1b7   :  { %v4792_v31 = vsel %vm58_vm2, %v789_v37, %v791_v38  ;;  %v793_v41 = vrot.slane %v755_v61, 7  ;;  %v4798_v45 = vsel %vm58_vm2, %v785_v47, %v787_v20  ;;  %v801_v42 = vrot.slane %v759_v36, 7  ;;  %v3908_v47 = vld [vmem:[%s6753_s1 + $0x68] sm:$0xff] }
 0x1b8   :  { %v4801_v46 = vsel %vm58_vm2, %v795_v10, %v797_v29  ;;  %v803_v11 = vrot.slane %v4775_v55, 7  ;;  %v799_v16 = vrot.slane %v4759_v30, 7  ;;  %v856_v18 = vsel %vm188_vm0, %v853_v14, %v855_v19 }
 0x1b9   :  { %916 = vrot.lane.b32.xlu1 %v4720_v33, %s4220_s30  ;;  %914 = vrot.lane.b32.xlu2 %v4704_v54, %s4220_s30  ;;  %v4795_v54 = vsel %vm58_vm2, %v781_v35, %v783_v44  ;;  %v4804_v33 = vsel %vm58_vm2, %v787_v20, %v789_v37  ;;  %v4807_v57 = vsel %vm58_vm2, %v791_v38, %v793_v41  ;;  %v807_v49 = vrot.slane %v4748_v13, 7 }
 0x1ba   :  { %v4811_v48 = vsel %vm58_vm2, %v793_v41, %v795_v10  ;;  %v805_v50 = vrot.slane %v4746_v58, 7  ;;  %v854_v56 = vsel %vm188_vm0, %v851_v62, %v853_v14  ;;  %v4819_v6 = vsel %vm58_vm2, %v801_v42, %v803_v11  ;;  %v3918_v14 = vld [vmem:[%s6753_s1 + $0xb8] sm:$0xff] }
 0x1bb   :  { %v4822_v52 = vsel %vm58_vm2, %v797_v29, %v799_v16  ;;  %v4825_v2 = vsel %vm58_vm2, %v799_v16, %v801_v42  ;;  %v857_v3 = vrot.slane %v755_v61, 1  ;;  %v859_v7 = vrot.slane %v756_v22, 1  ;;  %1117 = vmatpush.msrb.mxu1 %v3918_v14 }
 0x1bc   :  { %978 = vrot.lane.b32.xlu0 %v852_v24, %s4221_s14  ;;  %v4830_v59 = vsel %vm58_vm2, %v803_v11, %v805_v50  ;;  %v4835_v60 = vsel %vm58_vm2, %v805_v50, %v807_v49  ;;  %v861_v28 = vrot.slane %v4755_v53, 1  ;;  %v865_v1 = vrot.slane %v759_v36, 1  ;;  %v3915_v24 = vld [vmem:[%s6753_s1 + $0xa0] sm:$0xff] }
 0x1bd   :  { %v858_v17 = vsel %vm188_vm0, %v855_v19, %v857_v3  ;;  %v860_v26 = vsel %vm188_vm0, %v857_v3, %v859_v7  ;;  %v867_v4 = vrot.slane %v4775_v55, 1  ;;  %1118 = vmatpush.msrb.mxu1 %v3917_v15  ;;  %v4872_v19 = vmax.f32 %v4692_v40, 0.0 }
 0x1be   :  { %v862_v62 = vsel %vm188_vm0, %v859_v7, %v861_v28  ;;  %v827_v37 = vsel %vm58_vm2, 0.0, %v780_v27  ;;  %v836_v15 = vsel %vm6784_vm6, %v4811_v48, 0.0 }
 0x1bf   :  { %v868_v9 = vsel %vm188_vm0, %v865_v1, %v867_v4  ;;  %v873_v40 = vrot.slane %v4872_v19, 1 }
 0x1c1   :  { %982 = vrot.lane.b32.xlu1 %v856_v18, %s4221_s14  ;;  %980 = vrot.lane.b32.xlu2 %v854_v56, %s4221_s14  ;;  %v891_v44 = vsel %vm188_vm0, %v873_v40, 0.0 }
 0x1c4   :  { %918 = vrot.lane.b32.xlu0 %v4733_v21, %s4220_s30  ;;  %v899_v21 = vsel %vm6785_vm1, %v860_v26, 0.0 }
 0x1c9   :  { %922 = vrot.lane.b32.xlu1 %v755_v61, %s4220_s30  ;;  %920 = vrot.lane.b32.xlu2 %v4738_v63, %s4220_s30  ;;  %v863_v63 = vrot.slane %v4759_v30, 1  ;;  %v3914_v61 = vld [vmem:[%s6753_s1 + $0x98] sm:$0xff] }
 0x1cb   :  { %v864_v0 = vsel %vm188_vm0, %v861_v28, %v863_v63  ;;  %v866_v12 = vsel %vm188_vm0, %v863_v63, %v865_v1 }
 0x1cc   :  { %984 = vrot.lane.b32.xlu0 %v858_v17, %s4221_s14 }
 0x1d1   :  { %988 = vrot.lane.b32.xlu1 %v862_v62, %s4221_s14  ;;  %986 = vrot.lane.b32.xlu2 %v899_v21, %s4221_s14 }
 0x1d4   :  { %924 = vrot.lane.b32.xlu0 %v756_v22, %s4220_s30  ;;  %v870_v22 = vsel %vm188_vm0, %v867_v4, %v869_v51  ;;  %v874_v51 = vsel %vm188_vm0, %v871_v23, %v873_v40  ;;  %v3910_v23 = vld [vmem:[%s6753_s1 + $0x78] sm:$0xff] }
 0x1d9   :  { %928 = vrot.lane.b32.xlu1 %v4759_v30, %s4220_s30  ;;  %926 = vrot.lane.b32.xlu2 %v4755_v53, %s4220_s30  ;;  %v3916_v53 = vld [vmem:[%s6753_s1 + $0xa8] sm:$0xff] }
 0x1da   :  { %1119 = vmatpush.msrb.mxu1 %v3916_v53  ;;  %v3912_v30 = vld [vmem:[%s6753_s1 + $0x88] sm:$0xff] }
 0x1dc   :  { %990 = vrot.lane.b32.xlu0 %v864_v0, %s4221_s14  ;;  %1120 = vmatpush.msrb.mxu1 %v3915_v24 }
 0x1de   :  { %1121 = vmatpush.msrb.mxu1 %v3914_v61 }
 0x1e1   :  { %994 = vrot.lane.b32.xlu1 %v868_v9, %s4221_s14  ;;  %992 = vrot.lane.b32.xlu2 %v866_v12, %s4221_s14 }
 0x1e4   :  { %930 = vrot.lane.b32.xlu0 %v759_v36, %s4220_s30  ;;  %v3911_v36 = vld [vmem:[%s6753_s1 + $0x80] sm:$0xff] }
 0x1e9   :  { %934 = vrot.lane.b32.xlu1 %v4746_v58, %s4220_s30  ;;  %932 = vrot.lane.b32.xlu2 %v4775_v55, %s4220_s30  ;;  %v3913_v58 = vld [vmem:[%s6753_s1 + $0x90] sm:$0xff]  ;;  %v3907_v55 = vld [vmem:[%s6753_s1 + $0x60] sm:$0xff] }
 0x1ea   :  { %1122 = vmatpush.msrb.mxu1 %v3913_v58 }
 0x1ec   :  { %996 = vrot.lane.b32.xlu0 %v870_v22, %s4221_s14  ;;  %1123 = vmatpush.msrb.mxu1 %v3912_v30 }
 0x1ee   :  { %1124 = vmatpush.msrb.mxu1 %v3911_v36 }
 0x1f0   :  { %1125 = vmatpush.msrb.mxu1 %v3910_v23 }
 0x1f1   :  { %1000 = vrot.lane.b32.xlu1 %v874_v51, %s4221_s14  ;;  %998 = vrot.lane.b32.xlu2 %v4771_v43, %s4221_s14  ;;  %v3909_v43 = vld [vmem:[%s6753_s1 + $0x70] sm:$0xff] }
 0x1f2   :  { %1126 = vmatpush.msrb.mxu1 %v3909_v43 }
 0x1f4   :  { %936 = vrot.lane.b32.xlu0 %v4748_v13, %s4220_s30  ;;  %1127 = vmatpush.msrb.mxu1 %v3908_v47 }
 0x1f6   :  { %1128 = vmatpush.msrb.mxu1 %v3907_v55 }
 0x1f9   :  { %938 = vrot.lane.b32.xlu2 %v4872_v19, %s4220_s30 }
 0x1fc   :  { %1002 = vrot.lane.b32.xlu0 %v891_v44, %s4221_s14 }
 0x203   :  { %v909_v35 = vpop.permute.xlu2 %908 }
 0x204   :  { %v1020_v38 = vsel %vm413_vm3, %v827_v37, %v909_v35 }
 0x20b   :  { %v975_v42 = vpop.permute.xlu2 %974 }
 0x213   :  { %v915_v50 = vpop.permute.xlu2 %914 }
 0x214   :  { %v1023_v3 = vsel %vm413_vm3, %v4781_v39, %v915_v50 }
 0x21b   :  { %v911_v29 = vpop.permute.xlu1 %910  ;;  %v981_v28 = vpop.permute.xlu2 %980 }
 0x21c   :  { %v1021_v41 = vsel %vm413_vm3, %v4789_v8, %v911_v29 }
 0x21d   :  { %v1037_v11 = vsel %vm430_vm5, %v1021_v41, %v975_v42  ;;  %v809_v41 = vrot.slane %v4872_v19, 7 }
 0x21e   :  { %v973_v20 = vpop.permute.xlu0 %972 }
 0x21f   :  { %v1036_v10 = vsel %vm430_vm5, %v1020_v38, %v973_v20 }
 0x220   :  { %3919 = vmatmul.msk.f32.vlgmr.msrb.gmra.mxu1 %vm459_vm4, %v1036_v10 }
 0x223   :  { %v977_v27 = vpop.permute.xlu1 %976  ;;  %v921_v63 = vpop.permute.xlu2 %920 }
 0x224   :  { %v1026_v1 = vsel %vm413_vm3, %v4792_v31, %v921_v63 }
 0x226   :  { %v913_v16 = vpop.permute.xlu0 %912 }
 0x227   :  { %v1022_v34 = vsel %vm413_vm3, %v4795_v54, %v913_v16 }
 0x228   :  { %3920 = vmatmul.msk.f32.gmra.mxu1 %vm459_vm4, %v1037_v11  ;;  %v1038_v18 = vsel %vm430_vm5, %v1022_v34, %v977_v27 }
 0x22b   :  { %v917_v7 = vpop.permute.xlu1 %916  ;;  %v987_v12 = vpop.permute.xlu2 %986 }
 0x22c   :  { %v1024_v17 = vsel %vm413_vm3, %v4798_v45, %v917_v7 }
 0x22d   :  { %v1040_v54 = vsel %vm430_vm5, %v1024_v17, %v981_v28 }
 0x22e   :  { %v979_v56 = vpop.permute.xlu0 %978 }
 0x22f   :  { %v1039_v8 = vsel %vm430_vm5, %v1023_v3, %v979_v56 }
 0x230   :  { %3921 = vmatmul.msk.f32.gmra.mxu1 %vm459_vm4, %v1038_v18 }
 0x233   :  { %v983_v21 = vpop.permute.xlu1 %982  ;;  %v927_v24 = vpop.permute.xlu2 %926 }
 0x236   :  { %v919_v26 = vpop.permute.xlu0 %918 }
 0x237   :  { %v1025_v62 = vsel %vm413_vm3, %v4804_v33, %v919_v26 }
 0x238   :  { %3922 = vmatmul.msk.f32.gmra.mxu1 %vm459_vm4, %v1039_v8  ;;  %v1041_v39 = vsel %vm430_vm5, %v1025_v62, %v983_v21 }
 0x23b   :  { %v923_v4 = vpop.permute.xlu1 %922  ;;  %v993_v51 = vpop.permute.xlu2 %992 }
 0x23c   :  { %v1027_v9 = vsel %vm413_vm3, %v4807_v57, %v923_v4  ;;  %v1029_v57 = vsel %vm413_vm3, %v4801_v46, %v927_v24 }
 0x23d   :  { %v1043_v33 = vsel %vm430_vm5, %v1027_v9, %v987_v12 }
 0x23e   :  { %v985_v0 = vpop.permute.xlu0 %984 }
 0x23f   :  { %v1042_v45 = vsel %vm430_vm5, %v1026_v1, %v985_v0 }
 0x240   :  { %3923 = vmatmul.msk.f32.gmra.mxu1 %vm459_vm4, %v1040_v54 }
 0x243   :  { %v989_v22 = vpop.permute.xlu1 %988  ;;  %v933_v44 = vpop.permute.xlu2 %932 }
 0x244   :  { %v1032_v55 = vsel %vm413_vm3, %v4819_v6, %v933_v44 }
 0x246   :  { %v925_v14 = vpop.permute.xlu0 %924 }
 0x247   :  { %v1028_v31 = vsel %vm413_vm3, %v836_v15, %v925_v14 }
 0x248   :  { %3924 = vmatmul.msk.f32.gmra.mxu1 %vm459_vm4, %v1041_v39  ;;  %v1044_v53 = vsel %vm430_vm5, %v1028_v31, %v989_v22 }
 0x24b   :  { %v929_v58 = vpop.permute.xlu1 %928  ;;  %v999_v38 = vpop.permute.xlu2 %998 }
 0x24c   :  { %v1030_v48 = vsel %vm413_vm3, %v4822_v52, %v929_v58 }
 0x24d   :  { %v1046_v30 = vsel %vm430_vm5, %v1030_v48, %v993_v51 }
 0x24e   :  { %v991_v40 = vpop.permute.xlu0 %990 }
 0x24f   :  { %v1045_v61 = vsel %vm430_vm5, %v1029_v57, %v991_v40 }
 0x250   :  { %3925 = vmatmul.msk.f32.gmra.mxu1 %vm459_vm4, %v1042_v45 }
 0x253   :  { %v995_v43 = vpop.permute.xlu1 %994  ;;  %v939_v42 = vpop.permute.xlu2 %938 }
 0x256   :  { %v931_v36 = vpop.permute.xlu0 %930 }
 0x257   :  { %v1031_v23 = vsel %vm413_vm3, %v4825_v2, %v931_v36 }
 0x258   :  { %3926 = vmatmul.msk.f32.gmra.mxu1 %vm459_vm4, %v1043_v33  ;;  %v1047_v46 = vsel %vm430_vm5, %v1031_v23, %v995_v43 }
 0x25b   :  { %v935_v35 = vpop.permute.xlu1 %934 }
 0x25c   :  { %v1033_v37 = vsel %vm413_vm3, %v4830_v59, %v935_v35  ;;  %v810_v59 = vsel %vm58_vm2, %v807_v49, %v809_v41 }
 0x25d   :  { %v1049_v2 = vsel %vm430_vm5, %v1033_v37, %v999_v38  ;;  %v1035_v16 = vsel %vm413_vm3, %v810_v59, %v939_v42 }
 0x25e   :  { %v997_v47 = vpop.permute.xlu0 %996 }
 0x25f   :  { %v1048_v52 = vsel %vm430_vm5, %v1032_v55, %v997_v47 }
 0x260   :  { %3927 = vmatmul.msk.f32.gmra.mxu1 %vm459_vm4, %v1044_v53 }
 0x263   :  { %v1001_v29 = vpop.permute.xlu1 %1000 }
 0x266   :  { %v937_v20 = vpop.permute.xlu0 %936 }
 0x267   :  { %v1034_v10 = vsel %vm413_vm3, %v4835_v60, %v937_v20 }
 0x268   :  { %3928 = vmatmul.msk.f32.gmra.mxu1 %vm459_vm4, %v1045_v61  ;;  %v1050_v6 = vsel %vm430_vm5, %v1034_v10, %v1001_v29 }
 0x26e   :  { %v1003_v11 = vpop.permute.xlu0 %1002 }
 0x26f   :  { %v1051_v34 = vsel %vm430_vm5, %v1035_v16, %v1003_v11 }
 0x270   :  { %3929 = vmatmul.msk.f32.gmra.mxu1 %vm459_vm4, %v1046_v30 }
 0x278   :  { %3930 = vmatmul.msk.f32.gmra.mxu1 %vm459_vm4, %v1047_v46 }
 0x280   :  { %3931 = vmatmul.msk.f32.gmra.mxu1 %vm459_vm4, %v1048_v52 }
 0x288   :  { %3932 = vmatmul.msk.f32.gmra.mxu1 %vm459_vm4, %v1049_v2 }
 0x290   :  { %3933 = vmatmul.msk.f32.gmra.mxu1 %vm459_vm4, %v1050_v6 }
 0x298   :  { %3934 = vmatmul.msk.f32.gmra.mxu1 %vm459_vm4, %v1051_v34 }
 0x29d   :  { %v1130_v60 = vpop.f32.mrf.mxu1 }
 0x29e   :  { %v1182_v54 = vsel %vm413_vm3, %v1130_v60, 0.0 }
 0x2a5   :  { %v1133_v27 = vpop.f32.mrf.mxu1 }
 0x2a6   :  { %v1183_v28 = vsel %vm413_vm3, %v1133_v27, 0.0 }
 0x2a7   :  { %v1184_v62 = vadd.f32 %v1183_v28, %v1182_v54 }
 0x2ad   :  { %v1136_v18 = vpop.f32.mrf.mxu1 }
 0x2ae   :  { %v1185_v26 = vsel %vm413_vm3, %v1136_v18, 0.0 }
 0x2af   :  { %v1186_v39 = vadd.f32 %v1185_v26, %v1184_v62 }
 0x2b5   :  { %v1139_v50 = vpop.f32.mrf.mxu1 }
 0x2b6   :  { %v1187_v21 = vsel %vm413_vm3, %v1139_v50, 0.0 }
 0x2b7   :  { %v1188_v1 = vadd.f32 %v1187_v21, %v1186_v39 }
 0x2bd   :  { %v1142_v56 = vpop.f32.mrf.mxu1 }
 0x2be   :  { %v1189_v0 = vsel %vm413_vm3, %v1142_v56, 0.0 }
 0x2bf   :  { %v1190_v4 = vadd.f32 %v1189_v0, %v1188_v1 }
 0x2c5   :  { %v1145_v3 = vpop.f32.mrf.mxu1 }
 0x2c6   :  { %v1191_v45 = vsel %vm413_vm3, %v1145_v3, 0.0 }
 0x2c7   :  { %v1192_v12 = vadd.f32 %v1191_v45, %v1190_v4 }
 0x2cd   :  { %v1148_v8 = vpop.f32.mrf.mxu1 }
 0x2ce   :  { %v1193_v9 = vsel %vm413_vm3, %v1148_v8, 0.0 }
 0x2cf   :  { %v1194_v14 = vadd.f32 %v1193_v9, %v1192_v12 }
 0x2d5   :  { %v4996_v19 = vpop.f32.mrf.mxu1 }
 0x2d6   :  { %v1195_v33 = vsel %vm413_vm3, %v4996_v19, 0.0 }
 0x2d7   :  { %v1196_v22 = vadd.f32 %v1195_v33, %v1194_v14 }
 0x2dd   :  { %v4998_v7 = vpop.f32.mrf.mxu1 }
 0x2de   :  { %v1197_v31 = vsel %vm413_vm3, %v4998_v7, 0.0 }
 0x2df   :  { %v1198_v24 = vadd.f32 %v1197_v31, %v1196_v22 }
 0x2e5   :  { %v5000_v13 = vpop.f32.mrf.mxu1 }
 0x2e6   :  { %v1199_v53 = vsel %vm413_vm3, %v5000_v13, 0.0 }
 0x2e7   :  { %v1200_v57 = vadd.f32 %v1199_v53, %v1198_v24 }
 0x2ed   :  { %v5002_v49 = vpop.f32.mrf.mxu1 }
 0x2ee   :  { %v1201_v40 = vsel %vm413_vm3, %v5002_v49, 0.0 }
 0x2ef   :  { %v1202_v58 = vadd.f32 %v1201_v40, %v1200_v57 }
 0x2f5   :  { %v5004_v17 = vpop.f32.mrf.mxu1 }
 0x2f6   :  { %v1203_v61 = vsel %vm413_vm3, %v5004_v17, 0.0 }
 0x2f7   :  { %v1204_v30 = vadd.f32 %v1203_v61, %v1202_v58 }
 0x2fd   :  { %v5010_v63 = vpop.f32.mrf.mxu1 }
 0x2fe   :  { %v1205_v51 = vsel %vm413_vm3, %v5010_v63, 0.0 }
 0x2ff   :  { %v1206_v23 = vadd.f32 %v1205_v51, %v1204_v30 }
 0x305   :  { %v5017_v15 = vpop.f32.mrf.mxu1 }
 0x306   :  { %v1207_v36 = vsel %vm413_vm3, %v5017_v15, 0.0 }
 0x307   :  { %v1208_v46 = vadd.f32 %v1207_v36, %v1206_v23 }
 0x30d   :  { %v5027_v48 = vpop.f32.mrf.mxu1 }
 0x30e   :  { %v1209_v43 = vsel %vm413_vm3, %v5027_v48, 0.0 }
 0x30f   :  { %v1210_v44 = vadd.f32 %v1209_v43, %v1208_v46 }
 0x315   :  { %v1175_v47 = vpop.f32.mrf.mxu1 }
 0x316   :  { %v1211_v55 = vsel %vm413_vm3, %v1175_v47, 0.0 }
 0x317   :  { %v1212_v52 = vadd.f32 %v1211_v55, %v1210_v44 }
 0x319   :  { %v1213_v35 = vrot.slane %v1212_v52, 4 }
 0x31b   :  { %v1214_v37 = vadd.f32 %v1213_v35, %v1212_v52 }
 0x31d   :  { %v1215_v38 = vrot.slane %v1214_v37, 2 }
 0x31f   :  { %v1216_v2 = vadd.f32 %v1215_v38, %v1214_v37 }
 0x321   :  { %v1217_v20 = vrot.slane %v1216_v2, 1 }
 0x323   :  { %v1218_v10 = vadd.f32 %v1217_v20, %v1216_v2 }
 0x325   :  { %v1219_v29 = vmul.f32 0.0078125, %v1218_v10 }
 0x327   :  { %v5036_v6 = vsub.f32 %v1130_v60, %v1219_v29  ;;  %v5038_v41 = vsub.f32 %v1133_v27, %v1219_v29  ;;  %v5040_v42 = vsub.f32 %v1136_v18, %v1219_v29  ;;  %v5042_v11 = vsub.f32 %v1139_v50, %v1219_v29 }
 0x328   :  { %v5048_v34 = vsub.f32 %v1142_v56, %v1219_v29  ;;  %v5052_v54 = vsub.f32 %v1145_v3, %v1219_v29  ;;  %v5058_v26 = vsub.f32 %v1148_v8, %v1219_v29  ;;  %v5064_v39 = vsub.f32 %v4996_v19, %v1219_v29 }
 0x329   :  { %v1236_v59 = vmul.f32 %v5036_v6, %v5036_v6  ;;  %v1237_v16 = vmul.f32 %v5038_v41, %v5038_v41  ;;  %v1238_v28 = vmul.f32 %v5040_v42, %v5040_v42  ;;  %v1239_v60 = vmul.f32 %v5042_v11, %v5042_v11 }
 0x32a   :  { %v1240_v62 = vmul.f32 %v5048_v34, %v5048_v34  ;;  %v1241_v3 = vmul.f32 %v5052_v54, %v5052_v54  ;;  %v5070_v45 = vsub.f32 %v4998_v7, %v1219_v29  ;;  %v1242_v8 = vmul.f32 %v5058_v26, %v5058_v26 }
 0x32b   :  { %v1252_v27 = vsel %vm413_vm3, %v1236_v59, 0.0  ;;  %v1253_v18 = vsel %vm413_vm3, %v1237_v16, 0.0  ;;  %v1255_v56 = vsel %vm413_vm3, %v1238_v28, 0.0  ;;  %v1257_v0 = vsel %vm413_vm3, %v1239_v60, 0.0 }
 0x32c   :  { %v1254_v50 = vadd.f32 %v1253_v18, %v1252_v27  ;;  %v1259_v4 = vsel %vm413_vm3, %v1240_v62, 0.0  ;;  %v5076_v12 = vsub.f32 %v5000_v13, %v1219_v29  ;;  %v1243_v19 = vmul.f32 %v5064_v39, %v5064_v39 }
 0x32d   :  { %v1261_v33 = vsel %vm413_vm3, %v1241_v3, 0.0  ;;  %v1230_v31 = vsub.f32 %v5002_v49, %v1219_v29  ;;  %v1244_v7 = vmul.f32 %v5070_v45, %v5070_v45  ;;  %v1263_v22 = vsel %vm413_vm3, %v1242_v8, 0.0 }
 0x32e   :  { %v1256_v21 = vadd.f32 %v1255_v56, %v1254_v50  ;;  %v1231_v24 = vsub.f32 %v5004_v17, %v1219_v29  ;;  %v1245_v13 = vmul.f32 %v5076_v12, %v5076_v12  ;;  %v1265_v40 = vsel %vm413_vm3, %v1243_v19, 0.0 }
 0x32f   :  { %v5090_v61 = vsub.f32 %v5010_v63, %v1219_v29  ;;  %v1246_v58 = vmul.f32 %v1230_v31, %v1230_v31  ;;  %v1267_v49 = vsel %vm413_vm3, %v1244_v7, 0.0  ;;  %v5094_v30 = vsub.f32 %v5017_v15, %v1219_v29 }
 0x330   :  { %v1258_v1 = vadd.f32 %v1257_v0, %v1256_v21  ;;  %v1247_v36 = vmul.f32 %v1231_v24, %v1231_v24  ;;  %v1269_v23 = vsel %vm413_vm3, %v1245_v13, 0.0  ;;  %v5098_v43 = vsub.f32 %v5027_v48, %v1219_v29 }
 0x331   :  { %v1248_v46 = vmul.f32 %v5090_v61, %v5090_v61  ;;  %v1271_v63 = vsel %vm413_vm3, %v1246_v58, 0.0  ;;  %v5103_v55 = vsub.f32 %v1175_v47, %v1219_v29  ;;  %v1249_v52 = vmul.f32 %v5094_v30, %v5094_v30 }
 0x332   :  { %v1260_v9 = vadd.f32 %v1259_v4, %v1258_v1  ;;  %v1273_v15 = vsel %vm413_vm3, %v1247_v36, 0.0  ;;  %v1250_v37 = vmul.f32 %v5098_v43, %v5098_v43 }
 0x333   :  { %v1275_v48 = vsel %vm413_vm3, %v1248_v46, 0.0  ;;  %v1251_v2 = vmul.f32 %v5103_v55, %v5103_v55  ;;  %v1277_v20 = vsel %vm413_vm3, %v1249_v52, 0.0 }
 0x334   :  { %v1262_v14 = vadd.f32 %v1261_v33, %v1260_v9  ;;  %v1279_v47 = vsel %vm413_vm3, %v1250_v37, 0.0 }
 0x335   :  { %v1281_v59 = vsel %vm413_vm3, %v1251_v2, 0.0 }
 0x336   :  { %v1264_v53 = vadd.f32 %v1263_v22, %v1262_v14  ;;  %v4174_v22 = vld [vmem:[%s6754_s2 + $0x1] ss:$0 sm:$0xff] }
 0x338   :  { %v1266_v57 = vadd.f32 %v1265_v40, %v1264_v53 }
 0x33a   :  { %v1268_v51 = vadd.f32 %v1267_v49, %v1266_v57 }
 0x33c   :  { %v1270_v17 = vadd.f32 %v1269_v23, %v1268_v51 }
 0x33e   :  { %v1272_v44 = vadd.f32 %v1271_v63, %v1270_v17 }
 0x340   :  { %v1274_v35 = vadd.f32 %v1273_v15, %v1272_v44 }
 0x342   :  { %v1276_v38 = vadd.f32 %v1275_v48, %v1274_v35 }
 0x344   :  { %v1278_v10 = vadd.f32 %v1277_v20, %v1276_v38 }
 0x346   :  { %v1280_v29 = vadd.f32 %v1279_v47, %v1278_v10 }
 0x348   :  { %v1282_v16 = vadd.f32 %v1281_v59, %v1280_v29 }
 0x34a   :  { %v1283_v28 = vrot.slane %v1282_v16, 4 }
 0x34c   :  { %v1284_v60 = vadd.f32 %v1283_v28, %v1282_v16 }
 0x34e   :  { %v1285_v27 = vrot.slane %v1284_v60, 2 }
 0x350   :  { %v1286_v18 = vadd.f32 %v1285_v27, %v1284_v60 }
 0x352   :  { %v1287_v50 = vrot.slane %v1286_v18, 1 }
 0x354   :  { %v1288_v62 = vadd.f32 %v1287_v50, %v1286_v18 }
 0x356   :  { %v1289_v56 = vmul.f32 0.0078125, %v1288_v62 }
 0x358   :  { %v1290_v21 = vadd.f32 1e-05, %v1289_v56 }
 0x35a   :  { %4198 = vrsqrt.f32 %v1290_v21  ;;  %vm1297_vm11 = vweird.f32 %v1290_v21 }
 0x360   :  { %v4199_v3 = vpop.eup %4198 }
 0x361   :  { %v1292_v0 = vmul.f32 %v4199_v3, %v1290_v21  ;;  %vm1298_vm10 = vweird.f32 %v4199_v3 }
 0x362   :  { %vm1299_vm12 = vmor %vm1297_vm11, %vm1298_vm10 }
 0x363   :  { %v1293_v1 = vmul.f32 %v4199_v3, %v1292_v0 }
 0x365   :  { %v1294_v8 = vmul.f32 0.5, %v1293_v1 }
 0x367   :  { %v1295_v4 = vsub.f32 1.5, %v1294_v8 }
 0x369   :  { %v1296_v9 = vmul.f32 %v4199_v3, %v1295_v4 }
 0x36b   :  { %v1300_v19 = vsel %vm1299_vm12, %v4199_v3, %v1296_v9 }
 0x36c   :  { %v1301_v33 = vmul.f32 %v1300_v19, %v5036_v6  ;;  %v1302_v14 = vmul.f32 %v1300_v19, %v5038_v41  ;;  %v1304_v7 = vmul.f32 %v1300_v19, %v5042_v11  ;;  %v1305_v53 = vmul.f32 %v1300_v19, %v5048_v34  ;;  %v4175_v41 = vld [vmem:[%s6755_s3 + $0x1] ss:$0 sm:$0xff] }
 0x36d   :  { %v1306_v13 = vmul.f32 %v1300_v19, %v5052_v54  ;;  %v1311_v40 = vmul.f32 %v1300_v19, %v1230_v31  ;;  %v1312_v57 = vmul.f32 %v1300_v19, %v1231_v24  ;;  %v1307_v58 = vmul.f32 %v1300_v19, %v5058_v26 }
 0x36e   :  { %v1308_v49 = vmul.f32 %v1300_v19, %v5064_v39  ;;  %v1320_v51 = vmul.f32 %v4174_v22, %v1301_v33  ;;  %v1321_v6 = vmul.f32 %v4174_v22, %v1302_v14  ;;  %v1323_v36 = vmul.f32 %v4174_v22, %v1304_v7 }
 0x36f   :  { %v1309_v11 = vmul.f32 %v1300_v19, %v5070_v45  ;;  %v1324_v23 = vmul.f32 %v4174_v22, %v1305_v53  ;;  %v1310_v34 = vmul.f32 %v1300_v19, %v5076_v12  ;;  %v1325_v17 = vmul.f32 %v4174_v22, %v1306_v13 }
 0x370   :  { %v1326_v54 = vmul.f32 %v4174_v22, %v1307_v58  ;;  %v1327_v31 = vmul.f32 %v4174_v22, %v1308_v49  ;;  %v5131_v24 = vadd.f32 %v4175_v41, %v1320_v51  ;;  %v5133_v26 = vadd.f32 %v4175_v41, %v1321_v6 }
 0x371   :  { %v5135_v39 = vadd.f32 %v4175_v41, %v1323_v36  ;;  %v1313_v46 = vmul.f32 %v1300_v19, %v5090_v61  ;;  %v1328_v63 = vmul.f32 %v4174_v22, %v1309_v11  ;;  %v5138_v44 = vadd.f32 %v4175_v41, %v1324_v23 }
 0x372   :  { %v1314_v52 = vmul.f32 %v1300_v19, %v5094_v30  ;;  %v1315_v45 = vmul.f32 %v1300_v19, %v5098_v43  ;;  %v1329_v15 = vmul.f32 %v4174_v22, %v1310_v34  ;;  %v5142_v12 = vadd.f32 %v4175_v41, %v1325_v17 }
 0x373   :  { %v1316_v35 = vmul.f32 %v1300_v19, %v5103_v55  ;;  %v1330_v37 = vmul.f32 %v4174_v22, %v1311_v40  ;;  %v1331_v48 = vmul.f32 %v4174_v22, %v1312_v57  ;;  %v5145_v38 = vadd.f32 %v4175_v41, %v1326_v54 }
 0x374   :  { %v5147_v2 = vadd.f32 %v4175_v41, %v1327_v31  ;;  %v6774_v61 = vmax.f32 %v5131_v24, 0.0  ;;  %v6775_v20 = vmax.f32 %v5133_v26, 0.0  ;;  %v6772_v10 = vmax.f32 %v5135_v39, 0.0 }
 0x375   :  { %v1303_v30 = vmul.f32 %v1300_v19, %v5040_v42  ;;  %v1332_v43 = vmul.f32 %v4174_v22, %v1313_v46  ;;  %v5153_v47 = vadd.f32 %v4175_v41, %v1328_v63  ;;  %v6767_v29 = vmax.f32 %v5138_v44, 0.0 }
 0x376   :  { %v1333_v55 = vmul.f32 %v4174_v22, %v1314_v52  ;;  %v5156_v59 = vadd.f32 %v4175_v41, %v1329_v15  ;;  %v6762_v16 = vmax.f32 %v5142_v12, 0.0  ;;  %1371 = vst.msk [vmem:[#allocation2] sm:$0xff] %vm413_vm3, %v6774_v61  ;;  %v1334_v28 = vmul.f32 %v4174_v22, %v1315_v45 }
 0x377   :  { %v5162_v60 = vadd.f32 %v4175_v41, %v1330_v37  ;;  %v6764_v27 = vmax.f32 %v5145_v38, 0.0  ;;  %1372 = vst.msk [vmem:[#allocation2 + $0x8] sm:$0xff] %vm413_vm3, %v6775_v20  ;;  %v1335_v42 = vmul.f32 %v4174_v22, %v1316_v35  ;;  %v5168_v18 = vadd.f32 %v4175_v41, %v1331_v48 }
 0x378   :  { %v6771_v50 = vmax.f32 %v5147_v2, 0.0  ;;  %1374 = vst.msk [vmem:[#allocation2 + $0x18] sm:$0xff] %vm413_vm3, %v6772_v10  ;;  %v1322_v62 = vmul.f32 %v4174_v22, %v1303_v30  ;;  %v5174_v56 = vadd.f32 %v4175_v41, %v1332_v43  ;;  %v6769_v21 = vmax.f32 %v5153_v47, 0.0 }
 0x379   :  { %1375 = vst.msk [vmem:[#allocation2 + $0x20] sm:$0xff] %vm413_vm3, %v6767_v29  ;;  %v5180_v3 = vadd.f32 %v4175_v41, %v1333_v55  ;;  %v6768_v0 = vmax.f32 %v5156_v59, 0.0  ;;  %v5186_v1 = vadd.f32 %v4175_v41, %v1334_v28  ;;  %v6766_v8 = vmax.f32 %v5162_v60, 0.0 }
 0x37a   :  { %1376 = vst.msk [vmem:[#allocation2 + $0x28] sm:$0xff] %vm413_vm3, %v6762_v16  ;;  %v5192_v4 = vadd.f32 %v4175_v41, %v1335_v42  ;;  %v6770_v9 = vmax.f32 %v5168_v18, 0.0  ;;  %v5198_v19 = vadd.f32 %v4175_v41, %v1322_v62  ;;  %v6765_v33 = vmax.f32 %v5174_v56, 0.0 }
 0x37b   :  { %1377 = vst.msk [vmem:[#allocation2 + $0x30] sm:$0xff] %vm413_vm3, %v6764_v27  ;;  %v6763_v14 = vmax.f32 %v5180_v3, 0.0  ;;  %v6760_v7 = vmax.f32 %v5186_v1, 0.0 }
 0x37c   :  { %1378 = vst.msk [vmem:[#allocation2 + $0x38] sm:$0xff] %vm413_vm3, %v6771_v50  ;;  %v6761_v22 = vmax.f32 %v5192_v4, 0.0  ;;  %v6773_v53 = vmax.f32 %v5198_v19, 0.0 }
 0x37d   :  { %1379 = vst.msk [vmem:[#allocation2 + $0x40] sm:$0xff] %vm413_vm3, %v6769_v21  ;;  %v5558_v21 = vadd.s32 16, %v4343_v25 }
 0x37e   :  { %1380 = vst.msk [vmem:[#allocation2 + $0x48] sm:$0xff] %vm413_vm3, %v6768_v0  ;;  %v1387_v58 = vld [vmem:[#allocation2] ss:$2 sm:$0xff]  ;;  %v5240_v36 = vld [vmem:[#allocation2 + $0x1] ss:$2 sm:$0xff] }
 0x37f   :  { %1381 = vst.msk [vmem:[#allocation2 + $0x50] sm:$0xff] %vm413_vm3, %v6766_v8  ;;  %v1490_v23 = vrot.slane %v1387_v58, 1  ;;  %vm1852_vm10 = vcmp.ne.s32.totalorder %v5558_v21, 16 }
 0x380   :  { %1382 = vst.msk [vmem:[#allocation2 + $0x58] sm:$0xff] %vm413_vm3, %v6770_v9 }
 0x381   :  { %1383 = vst.msk [vmem:[#allocation2 + $0x60] sm:$0xff] %vm413_vm3, %v6765_v33  ;;  %v1391_v49 = vld [vmem:[#allocation2 + $0x20] ss:$2 sm:$0xff]  ;;  %v5266_v43 = vld [vmem:[#allocation2 + $0x21] ss:$2 sm:$0xff] }
 0x382   :  { %1384 = vst.msk [vmem:[#allocation2 + $0x68] sm:$0xff] %vm413_vm3, %v6763_v14  ;;  %v1493_v34 = vrot.slane %v1391_v49, 1 }
 0x383   :  { %1385 = vst.msk [vmem:[#allocation2 + $0x70] sm:$0xff] %vm413_vm3, %v6760_v7  ;;  %v5268_v55 = vld [vmem:[#allocation2 + $0x31] ss:$2 sm:$0xff]  ;;  %v1393_v28 = vld [vmem:[#allocation2 + $0x30] ss:$2 sm:$0xff] }
 0x384   :  { %1386 = vst.msk [vmem:[#allocation2 + $0x78] sm:$0xff] %vm413_vm3, %v6761_v22  ;;  %v4157_v62 = vpack.i.bf16 %v5268_v55, %v5266_v43 }
 0x385   :  { %1373 = vst.msk [vmem:[#allocation2 + $0x10] sm:$0xff] %vm413_vm3, %v6773_v53  ;;  %v5232_v13 = vld [vmem:[#allocation2 + $0x41] ss:$2 sm:$0xff]  ;;  %v1395_v42 = vld [vmem:[#allocation2 + $0x40] ss:$2 sm:$0xff] }
 0x386   :  { %v1433_v40 = vrot.slane %v5232_v13, 7 }
 0x387   :  { %v5235_v57 = vld [vmem:[#allocation2 + $0x51] ss:$2 sm:$0xff] }
 0x388   :  { %v1435_v51 = vrot.slane %v5235_v57, 7 }
 0x389   :  { %v5238_v6 = vld [vmem:[#allocation2 + $0x61] ss:$2 sm:$0xff] }
 0x38a   :  { %v1437_v41 = vrot.slane %v5238_v6, 7  ;;  %v5246_v11 = vsel %vm58_vm2, %v1433_v40, %v1435_v51 }
 0x38b   :  { %v5248_v17 = vld [vmem:[#allocation2 + $0x71] ss:$2 sm:$0xff] }
 0x38c   :  { %v5250_v54 = vld [vmem:[#allocation2 + $0x11] ss:$2 sm:$0xff]  ;;  %v1389_v31 = vld [vmem:[#allocation2 + $0x10] ss:$2 sm:$0xff]  ;;  %v1439_v46 = vrot.slane %v5248_v17, 7  ;;  %v5254_v63 = vsel %vm58_vm2, %v1435_v51, %v1437_v41  ;;  %v1495_v51 = vrot.slane %v1393_v28, 1 }
 0x38d   :  { %v4142_v52 = vpack.i.bf16 %v5250_v54, %v5240_v36  ;;  %v4137_v45 = vpack.i.bf16 %v1389_v31, %v1387_v58  ;;  %v1491_v15 = vrot.slane %v1389_v31, 1  ;;  %v4152_v58 = vpack.i.bf16 %v1393_v28, %v1391_v49  ;;  %v1664_v49 = vld [vmem:[%s6756_s4 + $0x70] sm:$0xff] }
 0x38e   :  { %v5259_v35 = vsel %vm58_vm2, %v1437_v41, %v1439_v46  ;;  %v1497_v41 = vrot.slane %v1395_v42, 1  ;;  %v1496_v31 = vsel %vm188_vm0, %v1493_v34, %v1495_v51  ;;  %v1397_v46 = vld [vmem:[#allocation2 + $0x50] ss:$2 sm:$0xff] }
 0x38f   :  { %4143 = vrot.lane.b32.xlu2 %v4142_v52, %s4221_s14  ;;  %4138 = vrot.lane.b32.xlu1 %v4137_v45, %s4220_s30  ;;  %v1492_v37 = vsel %vm188_vm0, %v1490_v23, %v1491_v15  ;;  %v1494_v48 = vsel %vm188_vm0, %v1491_v15, %v1493_v34  ;;  %v5275_v23 = vadd.s32 24, %v4343_v25  ;;  %v1665_v52 = vld [vmem:[%s6756_s4 + $0x78] sm:$0xff]  ;;  %v4162_v15 = vpack.i.bf16 %v1397_v46, %v1395_v42  ;;  %v1663_v34 = vld [vmem:[%s6756_s4 + $0x68] sm:$0xff] }
 0x390   :  { %v4147_v30 = vpack.i.bf16 %v1494_v48, %v1492_v37  ;;  %v1498_v45 = vsel %vm188_vm0, %v1495_v51, %v1497_v41  ;;  %1666 = vmatpush.msrb.mxu2 %v1665_v52  ;;  %v1662_v48 = vld [vmem:[%s6756_s4 + $0x60] sm:$0xff]  ;;  %v1499_v28 = vrot.slane %v1397_v46, 1  ;;  %v1401_v46 = vld [vmem:[#allocation2 + $0x70] ss:$2 sm:$0xff] }
 0x391   :  { %vm1517_vm13 = vcmp.ne.s32.totalorder %v5275_v23, 31  ;;  %v1399_v42 = vld [vmem:[#allocation2 + $0x60] ss:$2 sm:$0xff]  ;;  %v1503_v52 = vrot.slane %v1401_v46, 1 }
 0x392   :  { %4148 = vrot.lane.b32.xlu0 %v4147_v30, %s4222_s26  ;;  %1667 = vmatpush.msrb.mxu2 %v1664_v49  ;;  %v1541_v37 = vsel %vm1517_vm13, %v1498_v45, 0.0  ;;  %v1661_v30 = vld [vmem:[%s6756_s4 + $0x58] sm:$0xff]  ;;  %v1500_v51 = vsel %vm188_vm0, %v1497_v41, %v1499_v28  ;;  %v1659_v41 = vld [vmem:[%s6756_s4 + $0x48] sm:$0xff] }
 0x393   :  { %v1657_v45 = vld [vmem:[%s6756_s4 + $0x38] sm:$0xff] }
 0x394   :  { %1668 = vmatpush.msrb.mxu2 %v1663_v34  ;;  %v1654_v34 = vld [vmem:[%s6756_s4 + $0x20] sm:$0xff] }
 0x396   :  { %1669 = vmatpush.msrb.mxu2 %v1662_v48  ;;  %v1652_v48 = vld [vmem:[%s6756_s4 + $0x10] sm:$0xff] }
 0x397   :  { %4158 = vrot.lane.b32.xlu2 %v4157_v62, %s4221_s14  ;;  %4153 = vrot.lane.b32.xlu1 %v4152_v58, %s4220_s30  ;;  %v1660_v62 = vld [vmem:[%s6756_s4 + $0x50] sm:$0xff]  ;;  %v1501_v58 = vrot.slane %v1399_v42, 1 }
 0x398   :  { %1670 = vmatpush.msrb.mxu2 %v1661_v30  ;;  %v1651_v30 = vld [vmem:[%s6756_s4 + $0x8] sm:$0xff] }
 0x399   :  { %v1504_v49 = vsel %vm188_vm0, %v1501_v58, %v1503_v52 }
 0x39a   :  { %1606 = vrot.lane.b32.xlu0 %v1496_v31, %s4222_s26  ;;  %1671 = vmatpush.msrb.mxu2 %v1660_v62  ;;  %v1502_v31 = vsel %vm188_vm0, %v1499_v28, %v1501_v58  ;;  %v1650_v28 = vld [vmem:[%s6756_s4] sm:$0xff] }
 0x39c   :  { %1672 = vmatpush.msrb.mxu2 %v1659_v41 }
 0x39f   :  { %4163 = vrot.lane.b32.xlu2 %v4162_v15, %s4220_s30  ;;  %1608 = vrot.lane.b32.xlu1 %v1541_v37, %s4222_s26  ;;  %v1655_v15 = vld [vmem:[%s6756_s4 + $0x28] sm:$0xff]  ;;  %v1653_v37 = vld [vmem:[%s6756_s4 + $0x18] sm:$0xff] }
 0x3a2   :  { %1578 = vrot.lane.b32.xlu0 %v5232_v13, %s4221_s14 }
 0x3a7   :  { %1580 = vrot.lane.b32.xlu2 %v5235_v57, %s4221_s14  ;;  %1610 = vrot.lane.b32.xlu1 %v1500_v51, %s4222_s26  ;;  %v1513_v57 = vsel %vm188_vm0, %v1503_v52, 0.0 }
 0x3aa   :  { %1612 = vrot.lane.b32.xlu0 %v1502_v31, %s4222_s26 }
 0x3af   :  { %1582 = vrot.lane.b32.xlu2 %v5238_v6, %s4221_s14  ;;  %1558 = vrot.lane.b32.xlu1 %v1399_v42, %s4220_s30  ;;  %v1658_v6 = vld [vmem:[%s6756_s4 + $0x40] sm:$0xff]  ;;  %v1426_v42 = vrot.slane %v5240_v36, 7 }
 0x3b0   :  { %1673 = vmatpush.msrb.mxu2 %v1658_v6 }
 0x3b2   :  { %1614 = vrot.lane.b32.xlu0 %v1504_v49, %s4222_s26  ;;  %1674 = vmatpush.msrb.mxu2 %v1657_v45 }
 0x3b7   :  { %1584 = vrot.lane.b32.xlu2 %v5248_v17, %s4221_s14  ;;  %1560 = vrot.lane.b32.xlu1 %v1401_v46, %s4220_s30  ;;  %v1656_v17 = vld [vmem:[%s6756_s4 + $0x30] sm:$0xff]  ;;  %v1449_v46 = vsel %vm58_vm2, 0.0, %v1426_v42 }
 0x3b8   :  { %1675 = vmatpush.msrb.mxu2 %v1656_v17 }
 0x3ba   :  { %1616 = vrot.lane.b32.xlu0 %v1513_v57, %s4222_s26  ;;  %1676 = vmatpush.msrb.mxu2 %v1655_v15  ;;  %v1427_v57 = vrot.slane %v5250_v54, 7 }
 0x3bc   :  { %1677 = vmatpush.msrb.mxu2 %v1654_v34  ;;  %v1428_v36 = vsel %vm58_vm2, %v1426_v42, %v1427_v57 }
 0x3be   :  { %1678 = vmatpush.msrb.mxu2 %v1653_v37 }
 0x3c0   :  { %1679 = vmatpush.msrb.mxu2 %v1652_v48 }
 0x3c2   :  { %1680 = vmatpush.msrb.mxu2 %v1651_v30 }
 0x3c4   :  { %1681 = vmatpush.msrb.mxu2 %v1650_v28  ;;  %v1429_v28 = vrot.slane %v5266_v43, 7 }
 0x3e9   :  { %v4144_v62 = vpop.permute.xlu2 %4143 }
 0x3ea   :  { %v4145_v31 = vunpack.i.l.bf16 %v4144_v62  ;;  %v4146_v34 = vunpack.i.h.bf16 %v4144_v62  ;;  %v1431_v62 = vrot.slane %v5268_v55, 7 }
 0x3ec   :  { %v1432_v43 = vsel %vm58_vm2, %v1429_v28, %v1431_v62 }
 0x3f1   :  { %v4159_v54 = vpop.permute.xlu2 %4158 }
 0x401   :  { %v4139_v58 = vpop.permute.xlu1 %4138 }
 0x402   :  { %v4140_v51 = vunpack.i.l.bf16 %v4139_v58  ;;  %v4141_v41 = vunpack.i.h.bf16 %v4139_v58 }
 0x404   :  { %v4149_v52 = vpop.permute.xlu0 %4148  ;;  %v1626_v49 = vsel %vm413_vm3, %v1449_v46, %v4140_v51  ;;  %v1627_v15 = vsel %vm413_vm3, %v1428_v36, %v4141_v41  ;;  %v4161_v36 = vunpack.i.h.bf16 %v4159_v54 }
 0x405   :  { %v4150_v6 = vunpack.i.l.bf16 %v4149_v52  ;;  %v1634_v45 = vsel %vm430_vm5, %v1626_v49, %v4145_v31  ;;  %v4151_v48 = vunpack.i.h.bf16 %v4149_v52  ;;  %v1635_v30 = vsel %vm430_vm5, %v1627_v15, %v4146_v34  ;;  %v4164_v15 = vpop.permute.xlu2 %4163 }
 0x406   :  { %v1430_v31 = vsel %vm58_vm2, %v1427_v57, %v1429_v28  ;;  %v4160_v49 = vunpack.i.l.bf16 %v4159_v54  ;;  %v5370_v57 = vadd.s32 32, %v4343_v25  ;;  %v4165_v55 = vunpack.i.l.bf16 %v4164_v15 }
 0x407   :  { %v1642_v17 = vsel %vm459_vm4, %v1634_v45, %v4150_v6  ;;  %v1643_v58 = vsel %vm459_vm4, %v1635_v30, %v4151_v48 }
 0x408   :  { %1682 = vmatmul.f32.vlgmr.msrb.gmra.mxu2 %v1642_v17  ;;  %vm1454_vm14 = vcmp.ne.s32.totalorder %v5370_v57, 32 }
 0x409   :  { %v4154_v37 = vpop.permute.xlu1 %4153 }
 0x40a   :  { %v4155_v51 = vunpack.i.l.bf16 %v4154_v37  ;;  %v4156_v52 = vunpack.i.h.bf16 %v4154_v37  ;;  %v1434_v37 = vsel %vm58_vm2, %v1431_v62, %v1433_v40 }
 0x40c   :  { %v1628_v46 = vsel %vm413_vm3, %v1430_v31, %v4155_v51  ;;  %v1607_v42 = vpop.permute.xlu0 %1606  ;;  %v1629_v17 = vsel %vm413_vm3, %v1432_v43, %v4156_v52  ;;  %v1478_v51 = vsel %vm1454_vm14, %v1434_v37, 0.0 }
 0x40d   :  { %v1636_v41 = vsel %vm430_vm5, %v1628_v46, %v4160_v49  ;;  %v1637_v48 = vsel %vm430_vm5, %v1629_v17, %v4161_v36  ;;  %v1630_v54 = vsel %vm413_vm3, %v1478_v51, %v4165_v55  ;;  %v1581_v31 = vpop.permute.xlu2 %1580 }
 0x40e   :  { %v1644_v6 = vsel %vm459_vm4, %v1636_v41, %v1607_v42  ;;  %v4166_v42 = vunpack.i.h.bf16 %v4164_v15 }
 0x410   :  { %1685 = vmatmul.f32.gmra.mxu2 %v1643_v58  ;;  %v1631_v13 = vsel %vm413_vm3, %v5246_v11, %v4166_v42 }
 0x411   :  { %v1609_v45 = vpop.permute.xlu1 %1608  ;;  %v1639_v40 = vsel %vm430_vm5, %v1631_v13, %v1581_v31 }
 0x412   :  { %v1645_v30 = vsel %vm459_vm4, %v1637_v48, %v1609_v45 }
 0x414   :  { %v1579_v34 = vpop.permute.xlu0 %1578 }
 0x415   :  { %v1638_v58 = vsel %vm430_vm5, %v1630_v54, %v1579_v34  ;;  %v1583_v52 = vpop.permute.xlu2 %1582 }
 0x418   :  { %1688 = vmatmul.f32.gmra.mxu2 %v1644_v6 }
 0x419   :  { %v1611_v28 = vpop.permute.xlu1 %1610 }
 0x41a   :  { %v1646_v46 = vsel %vm459_vm4, %v1638_v58, %v1611_v28 }
 0x41c   :  { %v1613_v49 = vpop.permute.xlu0 %1612 }
 0x41d   :  { %v1647_v62 = vsel %vm459_vm4, %v1639_v40, %v1613_v49  ;;  %v1585_v11 = vpop.permute.xlu2 %1584 }
 0x420   :  { %1691 = vmatmul.f32.gmra.mxu2 %v1645_v30 }
 0x421   :  { %v1559_v41 = vpop.permute.xlu1 %1558 }
 0x422   :  { %v1632_v6 = vsel %vm413_vm3, %v5254_v63, %v1559_v41 }
 0x423   :  { %v1640_v43 = vsel %vm430_vm5, %v1632_v6, %v1583_v52 }
 0x424   :  { %v1615_v45 = vpop.permute.xlu0 %1614 }
 0x425   :  { %v1648_v36 = vsel %vm459_vm4, %v1640_v43, %v1615_v45 }
 0x428   :  { %1694 = vmatmul.f32.gmra.mxu2 %v1646_v46 }
 0x429   :  { %v1561_v17 = vpop.permute.xlu1 %1560 }
 0x42a   :  { %v1633_v15 = vsel %vm413_vm3, %v5259_v35, %v1561_v17 }
 0x42b   :  { %v1641_v48 = vsel %vm430_vm5, %v1633_v15, %v1585_v11 }
 0x42c   :  { %v1617_v34 = vpop.permute.xlu0 %1616 }
 0x42d   :  { %v1649_v30 = vsel %vm459_vm4, %v1641_v48, %v1617_v34 }
 0x430   :  { %1697 = vmatmul.f32.gmra.mxu2 %v1647_v62 }
 0x438   :  { %1700 = vmatmul.f32.gmra.mxu2 %v1648_v36 }
 0x440   :  { %1703 = vmatmul.f32.gmra.mxu2 %v1649_v30 }
 0x48b   :  { %v1683_v55 = vpop.f32.mrf.mxu2 }
 0x48c   :  { %v1709_v31 = vsel %vm413_vm3, %v1683_v55, 0.0 }
 0x493   :  { %v1686_v37 = vpop.f32.mrf.mxu2 }
 0x494   :  { %v1710_v58 = vsel %vm413_vm3, %v1686_v37, 0.0 }
 0x495   :  { %v1711_v35 = vadd.f32 %v1710_v58, %v1709_v31 }
 0x49b   :  { %v1689_v63 = vpop.f32.mrf.mxu2 }
 0x49c   :  { %v1712_v46 = vsel %vm413_vm3, %v1689_v63, 0.0 }
 0x49d   :  { %v1713_v42 = vadd.f32 %v1712_v46, %v1711_v35 }
 0x4a3   :  { %v1692_v28 = vpop.f32.mrf.mxu2 }
 0x4a4   :  { %v1714_v49 = vsel %vm413_vm3, %v1692_v28, 0.0 }
 0x4a5   :  { %v1715_v40 = vadd.f32 %v1714_v49, %v1713_v42 }
 0x4ab   :  { %v1695_v51 = vpop.f32.mrf.mxu2 }
 0x4ac   :  { %v1716_v13 = vsel %vm413_vm3, %v1695_v51, 0.0 }
 0x4ad   :  { %v1717_v52 = vadd.f32 %v1716_v13, %v1715_v40 }
 0x4b3   :  { %v1698_v54 = vpop.f32.mrf.mxu2 }
 0x4b4   :  { %v1718_v62 = vsel %vm413_vm3, %v1698_v54, 0.0 }
 0x4b5   :  { %v1719_v45 = vadd.f32 %v1718_v62, %v1717_v52 }
 0x4bb   :  { %v1701_v41 = vpop.f32.mrf.mxu2 }
 0x4bc   :  { %v1720_v6 = vsel %vm413_vm3, %v1701_v41, 0.0 }
 0x4bd   :  { %v1721_v43 = vadd.f32 %v1720_v6, %v1719_v45 }
 0x4c3   :  { %v1704_v17 = vpop.f32.mrf.mxu2 }
 0x4c4   :  { %v1722_v36 = vsel %vm413_vm3, %v1704_v17, 0.0 }
 0x4c5   :  { %v1723_v15 = vadd.f32 %v1722_v36, %v1721_v43 }
 0x4c7   :  { %v1724_v11 = vrot.slane %v1723_v15, 4 }
 0x4c9   :  { %v1725_v34 = vadd.f32 %v1724_v11, %v1723_v15 }
 0x4cb   :  { %v1726_v48 = vrot.slane %v1725_v34, 2 }
 0x4cd   :  { %v1727_v30 = vadd.f32 %v1726_v48, %v1725_v34 }
 0x4cf   :  { %v1728_v58 = vrot.slane %v1727_v30, 1 }
 0x4d1   :  { %v1729_v31 = vadd.f32 %v1728_v58, %v1727_v30 }
 0x4d3   :  { %v1730_v46 = vmul.f32 0.015625, %v1729_v31 }
 0x4d5   :  { %v1731_v35 = vsub.f32 %v1683_v55, %v1730_v46  ;;  %v1732_v49 = vsub.f32 %v1686_v37, %v1730_v46  ;;  %v1733_v42 = vsub.f32 %v1689_v63, %v1730_v46  ;;  %v1734_v7 = vsub.f32 %v1692_v28, %v1730_v46 }
 0x4d6   :  { %v1735_v13 = vsub.f32 %v1695_v51, %v1730_v46  ;;  %v1736_v52 = vsub.f32 %v1698_v54, %v1730_v46  ;;  %v1737_v15 = vsub.f32 %v1701_v41, %v1730_v46  ;;  %v1738_v55 = vsub.f32 %v1704_v17, %v1730_v46 }
 0x4d7   :  { %v1739_v40 = vmul.f32 %v1731_v35, %v1731_v35  ;;  %v1740_v22 = vmul.f32 %v1732_v49, %v1732_v49  ;;  %v1741_v62 = vmul.f32 %v1733_v42, %v1733_v42  ;;  %v1742_v6 = vmul.f32 %v1734_v7, %v1734_v7 }
 0x4d8   :  { %v1743_v11 = vmul.f32 %v1735_v13, %v1735_v13  ;;  %v1744_v37 = vmul.f32 %v1736_v52, %v1736_v52  ;;  %v1745_v51 = vmul.f32 %v1737_v15, %v1737_v15  ;;  %v1746_v58 = vmul.f32 %v1738_v55, %v1738_v55 }
 0x4d9   :  { %v1747_v45 = vsel %vm413_vm3, %v1739_v40, 0.0  ;;  %v1748_v43 = vsel %vm413_vm3, %v1740_v22, 0.0  ;;  %v1750_v34 = vsel %vm413_vm3, %v1741_v62, 0.0  ;;  %v1752_v63 = vsel %vm413_vm3, %v1742_v6, 0.0 }
 0x4da   :  { %v1749_v36 = vadd.f32 %v1748_v43, %v1747_v45  ;;  %v1754_v30 = vsel %vm413_vm3, %v1743_v11, 0.0  ;;  %v1756_v31 = vsel %vm413_vm3, %v1744_v37, 0.0  ;;  %v1758_v22 = vsel %vm413_vm3, %v1745_v51, 0.0 }
 0x4db   :  { %v1760_v45 = vsel %vm413_vm3, %v1746_v58, 0.0  ;;  %v4176_v58 = vld [vmem:[%s6757_s5] ss:$0 sm:$0xff] }
 0x4dc   :  { %v1751_v48 = vadd.f32 %v1750_v34, %v1749_v36 }
 0x4de   :  { %v1753_v28 = vadd.f32 %v1752_v63, %v1751_v48 }
 0x4e0   :  { %v1755_v54 = vadd.f32 %v1754_v30, %v1753_v28 }
 0x4e2   :  { %v1757_v40 = vadd.f32 %v1756_v31, %v1755_v54 }
 0x4e4   :  { %v1759_v41 = vadd.f32 %v1758_v22, %v1757_v40 }
 0x4e6   :  { %v1761_v62 = vadd.f32 %v1760_v45, %v1759_v41 }
 0x4e8   :  { %v1762_v43 = vrot.slane %v1761_v62, 4 }
 0x4ea   :  { %v1763_v17 = vadd.f32 %v1762_v43, %v1761_v62  ;;  %v4177_v62 = vld [vmem:[%s6758_s6] ss:$0 sm:$0xff] }
 0x4ec   :  { %v1764_v46 = vrot.slane %v1763_v17, 2 }
 0x4ee   :  { %v1765_v36 = vadd.f32 %v1764_v46, %v1763_v17 }
 0x4f0   :  { %v1766_v6 = vrot.slane %v1765_v36, 1 }
 0x4f2   :  { %v1767_v34 = vadd.f32 %v1766_v6, %v1765_v36 }
 0x4f4   :  { %v1768_v48 = vmul.f32 0.015625, %v1767_v34 }
 0x4f6   :  { %v1769_v63 = vadd.f32 1e-05, %v1768_v48 }
 0x4f8   :  { %4200 = vrsqrt.f32 %v1769_v63  ;;  %vm1776_vm7 = vweird.f32 %v1769_v63 }
 0x4fe   :  { %v4201_v11 = vpop.eup %4200 }
 0x4ff   :  { %v1771_v28 = vmul.f32 %v4201_v11, %v1769_v63  ;;  %vm1777_vm15 = vweird.f32 %v4201_v11 }
 0x500   :  { %vm1778_vm8 = vmor %vm1776_vm7, %vm1777_vm15  ;;  %vm2101_vm7 = vcmp.ne.s32.totalorder %v4343_v25, 7 }
 0x501   :  { %v1772_v30 = vmul.f32 %v4201_v11, %v1771_v28 }
 0x503   :  { %v1773_v37 = vmul.f32 0.5, %v1772_v30 }
 0x505   :  { %v1774_v54 = vsub.f32 1.5, %v1773_v37 }
 0x507   :  { %v1775_v51 = vmul.f32 %v4201_v11, %v1774_v54 }
 0x509   :  { %v1779_v31 = vsel %vm1778_vm8, %v4201_v11, %v1775_v51 }
 0x50a   :  { %v1780_v40 = vmul.f32 %v1779_v31, %v1731_v35  ;;  %v1781_v22 = vmul.f32 %v1779_v31, %v1732_v49  ;;  %v1782_v41 = vmul.f32 %v1779_v31, %v1733_v42  ;;  %v1783_v45 = vmul.f32 %v1779_v31, %v1734_v7 }
 0x50b   :  { %v1784_v43 = vmul.f32 %v1779_v31, %v1735_v13  ;;  %v1785_v17 = vmul.f32 %v1779_v31, %v1736_v52  ;;  %v1786_v46 = vmul.f32 %v1779_v31, %v1737_v15  ;;  %v1787_v36 = vmul.f32 %v1779_v31, %v1738_v55 }
 0x50c   :  { %v1791_v6 = vmul.f32 %v4176_v58, %v1780_v40  ;;  %v1792_v34 = vmul.f32 %v4176_v58, %v1781_v22  ;;  %v1793_v48 = vmul.f32 %v4176_v58, %v1782_v41  ;;  %v1794_v63 = vmul.f32 %v4176_v58, %v1783_v45 }
 0x50d   :  { %v1795_v28 = vmul.f32 %v4176_v58, %v1784_v43  ;;  %v1796_v30 = vmul.f32 %v4176_v58, %v1785_v17  ;;  %v1797_v37 = vmul.f32 %v4176_v58, %v1786_v46  ;;  %v1798_v11 = vmul.f32 %v4176_v58, %v1787_v36 }
 0x50e   :  { %v5417_v35 = vadd.f32 %v4177_v62, %v1791_v6  ;;  %v5419_v49 = vadd.f32 %v4177_v62, %v1792_v34  ;;  %v5421_v7 = vadd.f32 %v4177_v62, %v1794_v63  ;;  %v5434_v58 = vadd.f32 %v4177_v62, %v1793_v48 }
 0x50f   :  { %v5423_v42 = vadd.f32 %v4177_v62, %v1795_v28  ;;  %v5425_v13 = vadd.f32 %v4177_v62, %v1796_v30  ;;  %v5427_v52 = vadd.f32 %v4177_v62, %v1797_v37  ;;  %v5429_v15 = vadd.f32 %v4177_v62, %v1798_v11 }
 0x510   :  { %v6781_v55 = vmax.f32 %v5417_v35, 0.0  ;;  %v6783_v54 = vmax.f32 %v5419_v49, 0.0  ;;  %v6782_v51 = vmax.f32 %v5421_v7, 0.0  ;;  %v6780_v45 = vmax.f32 %v5434_v58, 0.0 }
 0x511   :  { %v6779_v31 = vmax.f32 %v5423_v42, 0.0  ;;  %v6778_v40 = vmax.f32 %v5425_v13, 0.0  ;;  %v6777_v22 = vmax.f32 %v5427_v52, 0.0  ;;  %v6776_v41 = vmax.f32 %v5429_v15, 0.0 }
 0x512   :  { %1818 = vst.msk [vmem:[#allocation2] sm:$0xff] %vm413_vm3, %v6781_v55  ;;  %v5470_v17 = vadd.s32 8, %v4343_v25 }
 0x513   :  { %1819 = vst.msk [vmem:[#allocation2 + $0x8] sm:$0xff] %vm413_vm3, %v6783_v54 }
 0x514   :  { %1821 = vst.msk [vmem:[#allocation2 + $0x18] sm:$0xff] %vm413_vm3, %v6782_v51  ;;  %vm1883_vm9 = vcmp.ne.s32.totalorder %v5470_v17, 15  ;;  %vm2086_vm8 = vcmp.ne.s32.totalorder %v5470_v17, 8  ;;  %v4050_v17 = vld [vmem:[%s6753_s1 + $0x1d0] sm:$0xff] }
 0x515   :  { %1822 = vst.msk [vmem:[#allocation2 + $0x20] sm:$0xff] %vm413_vm3, %v6779_v31 }
 0x516   :  { %1823 = vst.msk [vmem:[#allocation2 + $0x28] sm:$0xff] %vm413_vm3, %v6778_v40 }
 0x517   :  { %1824 = vst.msk [vmem:[#allocation2 + $0x30] sm:$0xff] %vm413_vm3, %v6777_v22 }
 0x518   :  { %1825 = vst.msk [vmem:[#allocation2 + $0x38] sm:$0xff] %vm413_vm3, %v6776_v41 }
 0x519   :  { %1820 = vst.msk [vmem:[#allocation2 + $0x10] sm:$0xff] %vm413_vm3, %v6780_v45 }
 0x51a   :  { %v5465_v62 = vld [vmem:[#allocation2 + $0x1] ss:$2 sm:$0xff]  ;;  %v1826_v43 = vld [vmem:[#allocation2] ss:$2 sm:$0xff] }
 0x51b   :  { %1910 = vrot.lane.b32.xlu2 %v5465_v62, %s4221_s14  ;;  %v1870_v34 = vrot.slane %v1826_v43, 1 }
 0x51d   :  { %v1828_v46 = vld [vmem:[#allocation2 + $0x20] ss:$2 sm:$0xff]  ;;  %v5472_v36 = vld [vmem:[#allocation2 + $0x21] ss:$2 sm:$0xff] }
 0x51e   :  { %v1841_v6 = vrot.slane %v5472_v36, 7  ;;  %v1873_v48 = vrot.slane %v1828_v46, 1 }
 0x51f   :  { %v1833_v63 = vld [vmem:[#allocation2 + $0x31] ss:$2 sm:$0xff] }
 0x520   :  { %v1827_v28 = vld [vmem:[#allocation2 + $0x10] ss:$2 sm:$0xff]  ;;  %v1843_v30 = vrot.slane %v1833_v63, 7  ;;  %v5488_v8 = vld [vmem:[#allocation2 + $0x11] ss:$2 sm:$0xff] }
 0x521   :  { %v4167_v37 = vpack.i.bf16 %v1827_v28, %v1826_v43  ;;  %v1871_v11 = vrot.slane %v1827_v28, 1  ;;  %v1829_v43 = vld [vmem:[#allocation2 + $0x30] ss:$2 sm:$0xff] }
 0x522   :  { %v5479_v16 = vsel %vm58_vm2, %v1841_v6, %v1843_v30  ;;  %v1875_v28 = vrot.slane %v1829_v43, 1  ;;  %v3947_v30 = vld [vmem:[%s6756_s4 + $0xd0] sm:$0xff] }
 0x523   :  { %4168 = vrot.lane.b32.xlu1 %v4167_v37, %s4220_s30  ;;  %v1872_v14 = vsel %vm188_vm0, %v1870_v34, %v1871_v11  ;;  %v1874_v27 = vsel %vm188_vm0, %v1871_v11, %v1873_v48  ;;  %v3946_v37 = vld [vmem:[%s6756_s4 + $0xc8] sm:$0xff]  ;;  %v3945_v11 = vld [vmem:[%s6756_s4 + $0xc0] sm:$0xff] }
 0x524   :  { %1926 = vrot.lane.b32.xlu0 %v1872_v14, %s4222_s26  ;;  %v1895_v33 = vsel %vm1883_vm9, %v1874_v27, 0.0  ;;  %v1876_v34 = vsel %vm188_vm0, %v1873_v48, %v1875_v28  ;;  %v1881_v27 = vsel %vm188_vm0, %v1875_v28, 0.0  ;;  %v3951_v14 = vld [vmem:[%s6756_s4 + $0xf0] sm:$0xff]  ;;  %v3949_v48 = vld [vmem:[%s6756_s4 + $0xe0] sm:$0xff] }
 0x525   :  { %1928 = vrot.lane.b32.xlu2 %v1895_v33, %s4222_s26  ;;  %v3952_v33 = vld [vmem:[%s6756_s4 + $0xf8] sm:$0xff]  ;;  %v3943_v28 = vld [vmem:[%s6756_s4 + $0xb0] sm:$0xff] }
 0x526   :  { %1967 = vmatpush.msra.mxu3 %v3952_v33  ;;  %v3940_v33 = vld [vmem:[%s6756_s4 + $0x98] sm:$0xff] }
 0x528   :  { %1968 = vmatpush.msra.mxu3 %v3951_v14  ;;  %v3939_v14 = vld [vmem:[%s6756_s4 + $0x90] sm:$0xff] }
 0x52b   :  { %1912 = vrot.lane.b32.xlu1 %v5488_v8, %s4221_s14 }
 0x52c   :  { %1902 = vrot.lane.b32.xlu0 %v1828_v46, %s4220_s30  ;;  %v3950_v46 = vld [vmem:[%s6756_s4 + $0xe8] sm:$0xff] }
 0x52d   :  { %1930 = vrot.lane.b32.xlu2 %v1876_v34, %s4222_s26  ;;  %1969 = vmatpush.msra.mxu3 %v3950_v46  ;;  %v3942_v34 = vld [vmem:[%s6756_s4 + $0xa8] sm:$0xff] }
 0x52e   :  { %v3938_v46 = vld [vmem:[%s6756_s4 + $0x88] sm:$0xff] }
 0x52f   :  { %1970 = vmatpush.msra.mxu3 %v3949_v48  ;;  %v3937_v48 = vld [vmem:[%s6756_s4 + $0x80] sm:$0xff] }
 0x533   :  { %1914 = vrot.lane.b32.xlu1 %v5472_v36, %s4221_s14 }
 0x534   :  { %1904 = vrot.lane.b32.xlu0 %v1829_v43, %s4220_s30  ;;  %v3944_v43 = vld [vmem:[%s6756_s4 + $0xb8] sm:$0xff] }
 0x535   :  { %1932 = vrot.lane.b32.xlu2 %v1881_v27, %s4222_s26  ;;  %v3941_v27 = vld [vmem:[%s6756_s4 + $0xa0] sm:$0xff] }
 0x53b   :  { %1916 = vrot.lane.b32.xlu1 %v1833_v63, %s4221_s14  ;;  %v3948_v63 = vld [vmem:[%s6756_s4 + $0xd8] sm:$0xff] }
 0x53c   :  { %1971 = vmatpush.msra.mxu3 %v3948_v63 }
 0x53e   :  { %1972 = vmatpush.msra.mxu3 %v3947_v30  ;;  %v1838_v30 = vrot.slane %v5465_v62, 7 }
 0x540   :  { %1973 = vmatpush.msra.mxu3 %v3946_v37 }
 0x542   :  { %1974 = vmatpush.msra.mxu3 %v3945_v11 }
 0x544   :  { %1975 = vmatpush.msra.mxu3 %v3944_v43 }
 0x546   :  { %1976 = vmatpush.msra.mxu3 %v3943_v28  ;;  %v1849_v28 = vsel %vm58_vm2, 0.0, %v1838_v30 }
 0x548   :  { %1977 = vmatpush.msra.mxu3 %v3942_v34 }
 0x54a   :  { %1978 = vmatpush.msra.mxu3 %v3941_v27  ;;  %v1839_v27 = vrot.slane %v5488_v8, 7 }
 0x54c   :  { %1979 = vmatpush.msra.mxu3 %v3940_v33  ;;  %v1842_v8 = vsel %vm58_vm2, %v1839_v27, %v1841_v6 }
 0x54e   :  { %1980 = vmatpush.msra.mxu3 %v3939_v14 }
 0x550   :  { %1981 = vmatpush.msra.mxu3 %v3938_v46 }
 0x552   :  { %1982 = vmatpush.msra.mxu3 %v3937_v48  ;;  %v1840_v48 = vsel %vm58_vm2, %v1838_v30, %v1839_v27 }
 0x575   :  { %v1911_v63 = vpop.permute.xlu2 %1910 }
 0x57f   :  { %v1929_v46 = vpop.permute.xlu2 %1928 }
 0x595   :  { %v4169_v37 = vpop.permute.xlu1 %4168 }
 0x596   :  { %v4170_v11 = vunpack.i.l.bf16 %v4169_v37  ;;  %v1927_v43 = vpop.permute.xlu0 %1926  ;;  %v4171_v14 = vunpack.i.h.bf16 %v4169_v37 }
 0x598   :  { %v1938_v34 = vsel %vm413_vm3, %v1849_v28, %v4170_v11  ;;  %v1939_v62 = vsel %vm413_vm3, %v1840_v48, %v4171_v14 }
 0x599   :  { %v1942_v33 = vsel %vm430_vm5, %v1938_v34, %v1911_v63  ;;  %v1864_v63 = vsel %vm1852_vm10, %v1842_v8, 0.0 }
 0x59a   :  { %v1946_v29 = vsel %vm459_vm4, %v1942_v33, %v1927_v43  ;;  %v1931_v43 = vpop.permute.xlu2 %1930 }
 0x59b   :  { %1983 = vmatmul.f32.vlgmr.msra.gmra.mxu3 %v1946_v29 }
 0x59d   :  { %v1913_v0 = vpop.permute.xlu1 %1912 }
 0x59e   :  { %v1943_v9 = vsel %vm430_vm5, %v1939_v62, %v1913_v0  ;;  %v1903_v11 = vpop.permute.xlu0 %1902 }
 0x59f   :  { %v1947_v29 = vsel %vm459_vm4, %v1943_v9, %v1929_v46  ;;  %v1940_v37 = vsel %vm413_vm3, %v1864_v63, %v1903_v11 }
 0x5a2   :  { %v1933_v27 = vpop.permute.xlu2 %1932 }
 0x5a3   :  { %1986 = vmatmul.f32.gmra.mxu3 %v1947_v29 }
 0x5a5   :  { %v1915_v30 = vpop.permute.xlu1 %1914 }
 0x5a6   :  { %v1944_v28 = vsel %vm430_vm5, %v1940_v37, %v1915_v30  ;;  %v1905_v34 = vpop.permute.xlu0 %1904 }
 0x5a7   :  { %v1948_v0 = vsel %vm459_vm4, %v1944_v28, %v1931_v43  ;;  %v1941_v6 = vsel %vm413_vm3, %v5479_v16, %v1905_v34 }
 0x5ab   :  { %1989 = vmatmul.f32.gmra.mxu3 %v1948_v0 }
 0x5ad   :  { %v1917_v36 = vpop.permute.xlu1 %1916 }
 0x5ae   :  { %v1945_v9 = vsel %vm430_vm5, %v1941_v6, %v1917_v36 }
 0x5af   :  { %v1949_v33 = vsel %vm459_vm4, %v1945_v9, %v1933_v27 }
 0x5b3   :  { %1992 = vmatmul.f32.gmra.mxu3 %v1949_v33 }
 0x61e   :  { %v1984_v14 = vpop.f32.mrf.mxu3 }
 0x61f   :  { %v2000_v11 = vsel %vm413_vm3, %v1984_v14, 0.0 }
 0x626   :  { %v1987_v46 = vpop.f32.mrf.mxu3 }
 0x627   :  { %v2001_v62 = vsel %vm413_vm3, %v1987_v46, 0.0 }
 0x628   :  { %v2002_v29 = vadd.f32 %v2001_v62, %v2000_v11 }
 0x62e   :  { %v1990_v48 = vpop.f32.mrf.mxu3 }
 0x62f   :  { %v2003_v8 = vsel %vm413_vm3, %v1990_v48, 0.0 }
 0x630   :  { %v2004_v63 = vadd.f32 %v2003_v8, %v2002_v29 }
 0x636   :  { %v1993_v30 = vpop.f32.mrf.mxu3 }
 0x637   :  { %v2005_v16 = vsel %vm413_vm3, %v1993_v30, 0.0 }
 0x638   :  { %v2006_v37 = vadd.f32 %v2005_v16, %v2004_v63 }
 0x63a   :  { %v2007_v43 = vrot.slane %v2006_v37, 4 }
 0x63c   :  { %v2008_v28 = vadd.f32 %v2007_v43, %v2006_v37 }
 0x63e   :  { %v2009_v0 = vrot.slane %v2008_v28, 2 }
 0x640   :  { %v2010_v34 = vadd.f32 %v2009_v0, %v2008_v28 }
 0x642   :  { %v2011_v36 = vrot.slane %v2010_v34, 1 }
 0x644   :  { %v2012_v6 = vadd.f32 %v2011_v36, %v2010_v34 }
 0x646   :  { %v2013_v9 = vmul.f32 0.03125, %v2012_v6 }
 0x648   :  { %v2014_v27 = vsub.f32 %v1984_v14, %v2013_v9  ;;  %v2015_v33 = vsub.f32 %v1987_v46, %v2013_v9  ;;  %v2016_v50 = vsub.f32 %v1990_v48, %v2013_v9  ;;  %v2017_v10 = vsub.f32 %v1993_v30, %v2013_v9 }
 0x64a   :  { %v2018_v53 = vmul.f32 %v2014_v27, %v2014_v27  ;;  %v2019_v61 = vmul.f32 %v2015_v33, %v2015_v33  ;;  %v2020_v20 = vmul.f32 %v2016_v50, %v2016_v50  ;;  %v2021_v62 = vmul.f32 %v2017_v10, %v2017_v10 }
 0x64c   :  { %v2022_v11 = vsel %vm413_vm3, %v2018_v53, 0.0  ;;  %v2023_v8 = vsel %vm413_vm3, %v2019_v61, 0.0  ;;  %v2025_v63 = vsel %vm413_vm3, %v2020_v20, 0.0  ;;  %v2027_v37 = vsel %vm413_vm3, %v2021_v62, 0.0  ;;  %v4178_v62 = vld [vmem:[%s6757_s5 + $0x1] ss:$0 sm:$0xff] }
 0x64d   :  { %v2024_v29 = vadd.f32 %v2023_v8, %v2022_v11 }
 0x64f   :  { %v2026_v16 = vadd.f32 %v2025_v63, %v2024_v29  ;;  %v3970_v29 = vld [vmem:[%s6756_s4 + $0x178] sm:$0xff]  ;;  %v3969_v63 = vld [vmem:[%s6756_s4 + $0x170] sm:$0xff] }
 0x650   :  { %2152 = vmatpush.msrb.mxu3 %v3970_v29 }
 0x651   :  { %v2028_v43 = vadd.f32 %v2027_v37, %v2026_v16 }
 0x652   :  { %2153 = vmatpush.msrb.mxu3 %v3969_v63 }
 0x653   :  { %v2029_v28 = vrot.slane %v2028_v43, 4 }
 0x655   :  { %v2030_v14 = vadd.f32 %v2029_v28, %v2028_v43 }
 0x657   :  { %v2031_v46 = vrot.slane %v2030_v14, 2 }
 0x659   :  { %v2032_v48 = vadd.f32 %v2031_v46, %v2030_v14  ;;  %v4179_v14 = vld [vmem:[%s6758_s6 + $0x1] ss:$0 sm:$0xff]  ;;  %v3968_v46 = vld [vmem:[%s6756_s4 + $0x168] sm:$0xff] }
 0x65a   :  { %2154 = vmatpush.msrb.mxu3 %v3968_v46  ;;  %v3964_v46 = vld [vmem:[%s6756_s4 + $0x148] sm:$0xff] }
 0x65b   :  { %v2033_v30 = vrot.slane %v2032_v48, 1 }
 0x65d   :  { %v2034_v0 = vadd.f32 %v2033_v30, %v2032_v48 }
 0x65f   :  { %v2035_v34 = vmul.f32 0.03125, %v2034_v0 }
 0x661   :  { %v2036_v36 = vadd.f32 1e-05, %v2035_v34 }
 0x663   :  { %4202 = vrsqrt.f32 %v2036_v36  ;;  %vm2043_vm12 = vweird.f32 %v2036_v36 }
 0x669   :  { %v4203_v6 = vpop.eup %4202 }
 0x66a   :  { %v2038_v53 = vmul.f32 %v4203_v6, %v2036_v36  ;;  %vm2044_vm11 = vweird.f32 %v4203_v6 }
 0x66b   :  { %vm2045_vm15 = vmor %vm2043_vm12, %vm2044_vm11 }
 0x66c   :  { %v2039_v9 = vmul.f32 %v4203_v6, %v2038_v53 }
 0x66e   :  { %v2040_v61 = vmul.f32 0.5, %v2039_v9 }
 0x670   :  { %v2041_v11 = vsub.f32 1.5, %v2040_v61 }
 0x672   :  { %v2042_v20 = vmul.f32 %v4203_v6, %v2041_v11 }
 0x674   :  { %v2046_v8 = vsel %vm2045_vm15, %v4203_v6, %v2042_v20  ;;  %v3966_v6 = vld [vmem:[%s6756_s4 + $0x158] sm:$0xff] }
 0x675   :  { %v2047_v16 = vmul.f32 %v2046_v8, %v2014_v27  ;;  %v2048_v37 = vmul.f32 %v2046_v8, %v2015_v33  ;;  %v2049_v43 = vmul.f32 %v2046_v8, %v2016_v50  ;;  %v2050_v28 = vmul.f32 %v2046_v8, %v2017_v10  ;;  %v3967_v27 = vld [vmem:[%s6756_s4 + $0x160] sm:$0xff] }
 0x676   :  { %2155 = vmatpush.msrb.mxu3 %v3967_v27  ;;  %v3959_v27 = vld [vmem:[%s6756_s4 + $0x120] sm:$0xff] }
 0x677   :  { %v2054_v48 = vmul.f32 %v4178_v62, %v2047_v16  ;;  %v2055_v30 = vmul.f32 %v4178_v62, %v2048_v37  ;;  %v2056_v0 = vmul.f32 %v4178_v62, %v2049_v43  ;;  %v2057_v34 = vmul.f32 %v4178_v62, %v2050_v28 }
 0x678   :  { %2156 = vmatpush.msrb.mxu3 %v3966_v6  ;;  %v3958_v6 = vld [vmem:[%s6756_s4 + $0x118] sm:$0xff] }
 0x679   :  { %v5601_v50 = vadd.f32 %v4179_v14, %v2054_v48  ;;  %v5603_v10 = vadd.f32 %v4179_v14, %v2055_v30  ;;  %v5605_v33 = vadd.f32 %v4179_v14, %v2056_v0  ;;  %v5607_v36 = vadd.f32 %v4179_v14, %v2057_v34  ;;  %v3965_v14 = vld [vmem:[%s6756_s4 + $0x150] sm:$0xff]  ;;  %v3963_v48 = vld [vmem:[%s6756_s4 + $0x140] sm:$0xff]  ;;  %v3962_v30 = vld [vmem:[%s6756_s4 + $0x138] sm:$0xff] }
 0x67a   :  { %2157 = vmatpush.msrb.mxu3 %v3965_v14  ;;  %v3961_v0 = vld [vmem:[%s6756_s4 + $0x130] sm:$0xff]  ;;  %v3960_v34 = vld [vmem:[%s6756_s4 + $0x128] sm:$0xff] }
 0x67b   :  { %v6786_v53 = vmax.f32 %v5601_v50, 0.0  ;;  %v2066_v9 = vmax.f32 %v5603_v10, 0.0  ;;  %v2068_v61 = vmax.f32 %v5607_v36, 0.0  ;;  %v2067_v11 = vmax.f32 %v5605_v33, 0.0 }
 0x67c   :  { %2158 = vmatpush.msrb.mxu3 %v3964_v46 }
 0x67d   :  { %2072 = vst.msk [vmem:[#allocation2 + $0x18] sm:$0xff] %vm413_vm3, %v2068_v61 }
 0x67e   :  { %2069 = vst.msk [vmem:[#allocation2] sm:$0xff] %vm413_vm3, %v6786_v53  ;;  %2159 = vmatpush.msrb.mxu3 %v3963_v48 }
 0x67f   :  { %2070 = vst.msk [vmem:[#allocation2 + $0x8] sm:$0xff] %vm413_vm3, %v2066_v9 }
 0x680   :  { %2071 = vst.msk [vmem:[#allocation2 + $0x10] sm:$0xff] %vm413_vm3, %v2067_v11  ;;  %2160 = vmatpush.msrb.mxu3 %v3962_v30 }
 0x682   :  { %2161 = vmatpush.msrb.mxu3 %v3961_v0 }
 0x684   :  { %2162 = vmatpush.msrb.mxu3 %v3960_v34 }
 0x686   :  { %v2075_v20 = vld [vmem:[#allocation2 + $0x1] ss:$2 sm:$0xff]  ;;  %v2073_v62 = vld [vmem:[#allocation2] ss:$2 sm:$0xff]  ;;  %2163 = vmatpush.msrb.mxu3 %v3959_v27 }
 0x687   :  { %2115 = vrot.lane.b32.xlu1 %v2075_v20, %s4221_s14  ;;  %2109 = vrot.lane.b32.xlu0 %v2073_v62, %s4220_s30  ;;  %v2074_v8 = vld [vmem:[#allocation2 + $0x10] ss:$2 sm:$0xff]  ;;  %v2095_v29 = vrot.slane %v2073_v62, 1  ;;  %v2076_v43 = vld [vmem:[#allocation2 + $0x11] ss:$2 sm:$0xff] }
 0x688   :  { %v2096_v63 = vrot.slane %v2074_v8, 1  ;;  %v3957_v62 = vld [vmem:[%s6756_s4 + $0x110] sm:$0xff]  ;;  %2164 = vmatpush.msrb.mxu3 %v3958_v6  ;;  %v2080_v46 = vrot.slane %v2076_v43, 7 }
 0x68a   :  { %v2097_v16 = vsel %vm188_vm0, %v2095_v29, %v2096_v63  ;;  %v2100_v28 = vsel %vm188_vm0, %v2096_v63, 0.0  ;;  %2165 = vmatpush.msrb.mxu3 %v3957_v62  ;;  %v3955_v29 = vld [vmem:[%s6756_s4 + $0x100] sm:$0xff]  ;;  %v2079_v63 = vrot.slane %v2075_v20, 7 }
 0x68b   :  { %v2107_v37 = vsel %vm2101_vm7, %v2097_v16, 0.0 }
 0x68c   :  { %2123 = vrot.lane.b32.xlu2 %v2107_v37, %s4222_s26  ;;  %v2081_v34 = vsel %vm58_vm2, %v2079_v63, %v2080_v46 }
 0x68d   :  { %v2092_v20 = vsel %vm2086_vm8, %v2081_v34, 0.0 }
 0x68f   :  { %2117 = vrot.lane.b32.xlu1 %v2076_v43, %s4221_s14  ;;  %2111 = vrot.lane.b32.xlu0 %v2074_v8, %s4220_s30  ;;  %v3956_v8 = vld [vmem:[%s6756_s4 + $0x108] sm:$0xff] }
 0x690   :  { %2166 = vmatpush.msrb.mxu3 %v3956_v8 }
 0x692   :  { %2167 = vmatpush.msrb.mxu3 %v3955_v29 }
 0x694   :  { %2125 = vrot.lane.b32.xlu2 %v2100_v28, %s4222_s26  ;;  %v2084_v28 = vsel %vm58_vm2, 0.0, %v2079_v63 }
 0x6e6   :  { %v2124_v16 = vpop.permute.xlu2 %2123 }
 0x6ee   :  { %v2126_v8 = vpop.permute.xlu2 %2125 }
 0x6f9   :  { %v2116_v37 = vpop.permute.xlu1 %2115  ;;  %v2110_v14 = vpop.permute.xlu0 %2109 }
 0x6fa   :  { %v2129_v48 = vsel %vm413_vm3, %v2084_v28, %v2110_v14 }
 0x6fb   :  { %v2131_v30 = vsel %vm430_vm5, %v2129_v48, %v2116_v37 }
 0x6fc   :  { %v2133_v0 = vsel %vm459_vm4, %v2131_v30, %v2124_v16 }
 0x6fd   :  { %2168 = vmatmul.f32.vlgmr.msrb.gmra.mxu3 %v2133_v0 }
 0x701   :  { %v2118_v27 = vpop.permute.xlu1 %2117  ;;  %v2112_v6 = vpop.permute.xlu0 %2111 }
 0x702   :  { %v2130_v62 = vsel %vm413_vm3, %v2092_v20, %v2112_v6 }
 0x703   :  { %v2132_v43 = vsel %vm430_vm5, %v2130_v62, %v2118_v27 }
 0x704   :  { %v2134_v29 = vsel %vm459_vm4, %v2132_v43, %v2126_v8 }
 0x705   :  { %2171 = vmatmul.f32.gmra.mxu3 %v2134_v29 }
 0x780   :  { %v2169_v37 = vpop.f32.mrf.mxu3 }
 0x781   :  { %v2179_v28 = vsel %vm413_vm3, %v2169_v37, 0.0 }
 0x788   :  { %v2172_v16 = vpop.f32.mrf.mxu3 }
 0x789   :  { %v2180_v63 = vsel %vm413_vm3, %v2172_v16, 0.0 }
 0x78a   :  { %v2181_v14 = vadd.f32 %v2180_v63, %v2179_v28 }
 0x78c   :  { %v2182_v46 = vrot.slane %v2181_v14, 4 }
 0x78e   :  { %v2183_v48 = vadd.f32 %v2182_v46, %v2181_v14  ;;  %v3988_v46 = vld [vmem:[%s6756_s4 + $0x1f8] sm:$0xff] }
 0x78f   :  { %2278 = vmatpush.msra.mxu1 %v3988_v46 }
 0x790   :  { %v2184_v30 = vrot.slane %v2183_v48, 2 }
 0x792   :  { %v2185_v0 = vadd.f32 %v2184_v30, %v2183_v48 }
 0x794   :  { %v2186_v34 = vrot.slane %v2185_v0, 1 }
 0x796   :  { %v2187_v41 = vadd.f32 %v2186_v34, %v2185_v0  ;;  %v3984_v0 = vld [vmem:[%s6756_s4 + $0x1d8] sm:$0xff] }
 0x798   :  { %v2188_v20 = vmul.f32 0.0625, %v2187_v41  ;;  %v3987_v41 = vld [vmem:[%s6756_s4 + $0x1f0] sm:$0xff] }
 0x799   :  { %2279 = vmatpush.msra.mxu1 %v3987_v41  ;;  %v4181_v41 = vld [vmem:[%s6758_s6 + $0x2] ss:$0 sm:$0xff] }
 0x79a   :  { %v2189_v6 = vsub.f32 %v2169_v37, %v2188_v20  ;;  %v2190_v22 = vsub.f32 %v2172_v16, %v2188_v20  ;;  %v3983_v20 = vld [vmem:[%s6756_s4 + $0x1d0] sm:$0xff] }
 0x79c   :  { %v2191_v27 = vmul.f32 %v2189_v6, %v2189_v6  ;;  %v2192_v62 = vmul.f32 %v2190_v22, %v2190_v22 }
 0x79e   :  { %v2193_v8 = vsel %vm413_vm3, %v2191_v27, 0.0  ;;  %v2194_v43 = vsel %vm413_vm3, %v2192_v62, 0.0  ;;  %v3982_v62 = vld [vmem:[%s6756_s4 + $0x1c8] sm:$0xff] }
 0x79f   :  { %v2195_v29 = vadd.f32 %v2194_v43, %v2193_v8  ;;  %v3981_v43 = vld [vmem:[%s6756_s4 + $0x1c0] sm:$0xff] }
 0x7a1   :  { %v2196_v40 = vrot.slane %v2195_v29, 4 }
 0x7a3   :  { %v2197_v31 = vadd.f32 %v2196_v40, %v2195_v29  ;;  %v3985_v40 = vld [vmem:[%s6756_s4 + $0x1e0] sm:$0xff] }
 0x7a4   :  { %v4180_v29 = vld [vmem:[%s6757_s5 + $0x2] ss:$0 sm:$0xff] }
 0x7a5   :  { %v2198_v45 = vrot.slane %v2197_v31, 2 }
 0x7a7   :  { %v2199_v28 = vadd.f32 %v2198_v45, %v2197_v31  ;;  %v3986_v31 = vld [vmem:[%s6756_s4 + $0x1e8] sm:$0xff] }
 0x7a8   :  { %2280 = vmatpush.msra.mxu1 %v3986_v31 }
 0x7a9   :  { %v2200_v63 = vrot.slane %v2199_v28, 1 }
 0x7aa   :  { %2281 = vmatpush.msra.mxu1 %v3985_v40 }
 0x7ab   :  { %v2201_v14 = vadd.f32 %v2200_v63, %v2199_v28  ;;  %v3980_v63 = vld [vmem:[%s6756_s4 + $0x1b8] sm:$0xff] }
 0x7ac   :  { %2282 = vmatpush.msra.mxu1 %v3984_v0  ;;  %v3976_v0 = vld [vmem:[%s6756_s4 + $0x198] sm:$0xff] }
 0x7ad   :  { %v2202_v37 = vmul.f32 0.0625, %v2201_v14 }
 0x7ae   :  { %2283 = vmatpush.msra.mxu1 %v3983_v20 }
 0x7af   :  { %v2203_v16 = vadd.f32 1e-05, %v2202_v37  ;;  %v3979_v37 = vld [vmem:[%s6756_s4 + $0x1b0] sm:$0xff] }
 0x7b0   :  { %2284 = vmatpush.msra.mxu1 %v3982_v62 }
 0x7b1   :  { %4204 = vrsqrt.f32 %v2203_v16  ;;  %vm2210_vm12 = vweird.f32 %v2203_v16 }
 0x7b2   :  { %2285 = vmatpush.msra.mxu1 %v3981_v43 }
 0x7b4   :  { %2286 = vmatpush.msra.mxu1 %v3980_v63 }
 0x7b6   :  { %2287 = vmatpush.msra.mxu1 %v3979_v37 }
 0x7b7   :  { %v4205_v48 = vpop.eup %4204 }
 0x7b8   :  { %v2205_v30 = vmul.f32 %v4205_v48, %v2203_v16  ;;  %vm2211_vm11 = vweird.f32 %v4205_v48 }
 0x7b9   :  { %vm2212_vm15 = vmor %vm2210_vm12, %vm2211_vm11  ;;  %vm2244_vm11 = vcmp.ne.s32.totalorder %v4343_v25, 3  ;;  %vm2236_vm12 = vcmp.ne.s32.totalorder %v4343_v25, 4 }
 0x7ba   :  { %v2206_v45 = vmul.f32 %v4205_v48, %v2205_v30 }
 0x7bc   :  { %v2207_v34 = vmul.f32 0.5, %v2206_v45 }
 0x7be   :  { %v2208_v27 = vsub.f32 1.5, %v2207_v34  ;;  %v3975_v34 = vld [vmem:[%s6756_s4 + $0x190] sm:$0xff] }
 0x7c0   :  { %v2209_v8 = vmul.f32 %v4205_v48, %v2208_v27 }
 0x7c2   :  { %v2213_v28 = vsel %vm2212_vm15, %v4205_v48, %v2209_v8  ;;  %v3978_v48 = vld [vmem:[%s6756_s4 + $0x1a8] sm:$0xff] }
 0x7c3   :  { %v2214_v14 = vmul.f32 %v2213_v28, %v2189_v6  ;;  %v2215_v46 = vmul.f32 %v2213_v28, %v2190_v22  ;;  %v3977_v22 = vld [vmem:[%s6756_s4 + $0x1a0] sm:$0xff]  ;;  %2288 = vmatpush.msra.mxu1 %v3978_v48 }
 0x7c4   :  { %v3973_v28 = vld [vmem:[%s6756_s4 + $0x180] sm:$0xff] }
 0x7c5   :  { %v2219_v16 = vmul.f32 %v4180_v29, %v2214_v14  ;;  %v2220_v30 = vmul.f32 %v4180_v29, %v2215_v46  ;;  %2289 = vmatpush.msra.mxu1 %v3977_v22  ;;  %v3974_v29 = vld [vmem:[%s6756_s4 + $0x188] sm:$0xff] }
 0x7c7   :  { %v5726_v31 = vadd.f32 %v4181_v41, %v2219_v16  ;;  %v5728_v6 = vadd.f32 %v4181_v41, %v2220_v30  ;;  %2290 = vmatpush.msra.mxu1 %v3976_v0 }
 0x7c9   :  { %v2226_v40 = vmax.f32 %v5726_v31, 0.0  ;;  %v2227_v45 = vmax.f32 %v5728_v6, 0.0  ;;  %2291 = vmatpush.msra.mxu1 %v3975_v34  ;;  %v4035_v6 = vld [vmem:[%s6753_s1 + $0x178] sm:$0xff] }
 0x7cb   :  { %2228 = vst.msk [vmem:[#allocation2] sm:$0xff] %vm413_vm3, %v2226_v40  ;;  %2292 = vmatpush.msra.mxu1 %v3974_v29 }
 0x7cc   :  { %2229 = vst.msk [vmem:[#allocation2 + $0x8] sm:$0xff] %vm413_vm3, %v2227_v45 }
 0x7cd   :  { %2293 = vmatpush.msra.mxu1 %v3973_v28 }
 0x7d3   :  { %v2231_v20 = vld [vmem:[#allocation2 + $0x1] ss:$2 sm:$0xff]  ;;  %v2230_v27 = vld [vmem:[#allocation2] ss:$2 sm:$0xff] }
 0x7d4   :  { %2251 = vrot.lane.b32.xlu1 %v2231_v20, %s4221_s14  ;;  %2248 = vrot.lane.b32.xlu0 %v2230_v27, %s4220_s30  ;;  %v2241_v62 = vrot.slane %v2230_v27, 1  ;;  %v2233_v63 = vrot.slane %v2231_v20, 7 }
 0x7d6   :  { %v2243_v8 = vsel %vm188_vm0, %v2241_v62, 0.0  ;;  %v2235_v14 = vsel %vm58_vm2, 0.0, %v2233_v63 }
 0x7d7   :  { %v2247_v43 = vsel %vm2244_vm11, %v2243_v8, 0.0  ;;  %v2239_v41 = vsel %vm2236_vm12, %v2235_v14, 0.0 }
 0x7d8   :  { %2255 = vrot.lane.b32.xlu2 %v2247_v43, %s4222_s26 }
 0x832   :  { %v2256_v30 = vpop.permute.xlu2 %2255 }
 0x846   :  { %v2252_v46 = vpop.permute.xlu1 %2251  ;;  %v2249_v37 = vpop.permute.xlu0 %2248 }
 0x847   :  { %v2258_v16 = vsel %vm413_vm3, %v2239_v41, %v2249_v37 }
 0x848   :  { %v2259_v48 = vsel %vm430_vm5, %v2258_v16, %v2252_v46 }
 0x849   :  { %v2260_v22 = vsel %vm459_vm4, %v2259_v48, %v2256_v30 }
 0x84a   :  { %2294 = vmatmul.f32.vlgmr.msra.gmra.mxu1 %v2260_v22 }
 0x8c7   :  { %v2295_v0 = vpop.f32.mrf.mxu1 }
 0x8c8   :  { %v2302_v34 = vsel %vm413_vm3, %v2295_v0, 0.0 }
 0x8c9   :  { %v2303_v20 = vrot.slane %v2302_v34, 4 }
 0x8cb   :  { %v2304_v27 = vadd.f32 %v2303_v20, %v2302_v34  ;;  %v4006_v34 = vld [vmem:[%s6756_s4 + $0x278] sm:$0xff] }
 0x8cc   :  { %2391 = vmatpush.msra.mxu3 %v4006_v34  ;;  %v4002_v34 = vld [vmem:[%s6756_s4 + $0x258] sm:$0xff] }
 0x8cd   :  { %v2305_v62 = vrot.slane %v2304_v27, 2 }
 0x8cf   :  { %v2306_v8 = vadd.f32 %v2305_v62, %v2304_v27  ;;  %v4003_v62 = vld [vmem:[%s6756_s4 + $0x260] sm:$0xff] }
 0x8d1   :  { %v2307_v43 = vrot.slane %v2306_v8, 1 }
 0x8d3   :  { %v2308_v29 = vadd.f32 %v2307_v43, %v2306_v8 }
 0x8d5   :  { %v2309_v28 = vmul.f32 0.125, %v2308_v29 }
 0x8d7   :  { %v2310_v63 = vsub.f32 %v2295_v0, %v2309_v28  ;;  %v4005_v0 = vld [vmem:[%s6756_s4 + $0x270] sm:$0xff]  ;;  %v4182_v28 = vld [vmem:[%s6757_s5 + $0x3] ss:$0 sm:$0xff] }
 0x8d8   :  { %2392 = vmatpush.msra.mxu3 %v4005_v0  ;;  %v4001_v0 = vld [vmem:[%s6756_s4 + $0x250] sm:$0xff] }
 0x8d9   :  { %v2311_v14 = vmul.f32 %v2310_v63, %v2310_v63 }
 0x8db   :  { %v2312_v41 = vsel %vm413_vm3, %v2311_v14, 0.0 }
 0x8dc   :  { %v2313_v37 = vrot.slane %v2312_v41, 4 }
 0x8de   :  { %v2314_v55 = vadd.f32 %v2313_v37, %v2312_v41  ;;  %v4183_v37 = vld [vmem:[%s6758_s6 + $0x3] ss:$0 sm:$0xff] }
 0x8e0   :  { %v2315_v46 = vrot.slane %v2314_v55, 2 }
 0x8e2   :  { %v2316_v16 = vadd.f32 %v2315_v46, %v2314_v55  ;;  %v4004_v55 = vld [vmem:[%s6756_s4 + $0x268] sm:$0xff] }
 0x8e3   :  { %2393 = vmatpush.msra.mxu3 %v4004_v55  ;;  %v3999_v55 = vld [vmem:[%s6756_s4 + $0x240] sm:$0xff] }
 0x8e4   :  { %v2317_v30 = vrot.slane %v2316_v16, 1 }
 0x8e5   :  { %2394 = vmatpush.msra.mxu3 %v4003_v62  ;;  %v3997_v62 = vld [vmem:[%s6756_s4 + $0x230] sm:$0xff] }
 0x8e6   :  { %v2318_v48 = vadd.f32 %v2317_v30, %v2316_v16 }
 0x8e7   :  { %2395 = vmatpush.msra.mxu3 %v4002_v34 }
 0x8e8   :  { %v2319_v22 = vmul.f32 0.125, %v2318_v48 }
 0x8e9   :  { %2396 = vmatpush.msra.mxu3 %v4001_v0 }
 0x8ea   :  { %v2320_v51 = vadd.f32 1e-05, %v2319_v22 }
 0x8ec   :  { %4206 = vrsqrt.f32 %v2320_v51  ;;  %vm2327_vm6 = vweird.f32 %v2320_v51 }
 0x8f2   :  { %v4207_v54 = vpop.eup %4206 }
 0x8f3   :  { %v2322_v20 = vmul.f32 %v4207_v54, %v2320_v51  ;;  %vm2328_vm15 = vweird.f32 %v4207_v54 }
 0x8f4   :  { %vm2329_vm1 = vmor %vm2327_vm6, %vm2328_vm15  ;;  %vm2355_vm6 = vcmask 1042432   ;;  %vm2348_vm15 = vcmp.ne.s32.totalorder %v4343_v25, 2 }
 0x8f5   :  { %v2323_v27 = vmul.f32 %v4207_v54, %v2322_v20  ;;  %v4000_v20 = vld [vmem:[%s6756_s4 + $0x248] sm:$0xff] }
 0x8f6   :  { %2397 = vmatpush.msra.mxu3 %v4000_v20 }
 0x8f7   :  { %v2324_v8 = vmul.f32 0.5, %v2323_v27  ;;  %v3998_v27 = vld [vmem:[%s6756_s4 + $0x238] sm:$0xff] }
 0x8f8   :  { %2398 = vmatpush.msra.mxu3 %v3999_v55 }
 0x8f9   :  { %v2325_v43 = vsub.f32 1.5, %v2324_v8  ;;  %v3996_v8 = vld [vmem:[%s6756_s4 + $0x228] sm:$0xff] }
 0x8fa   :  { %2399 = vmatpush.msra.mxu3 %v3998_v27 }
 0x8fb   :  { %v2326_v29 = vmul.f32 %v4207_v54, %v2325_v43  ;;  %v3995_v43 = vld [vmem:[%s6756_s4 + $0x220] sm:$0xff] }
 0x8fc   :  { %2400 = vmatpush.msra.mxu3 %v3997_v62 }
 0x8fd   :  { %v2330_v14 = vsel %vm2329_vm1, %v4207_v54, %v2326_v29  ;;  %vm2357_vm1 = vcmp.ne.s32.totalorder %v4343_v25, 1  ;;  %v3994_v29 = vld [vmem:[%s6756_s4 + $0x218] sm:$0xff]  ;;  %v4033_v25 = vld [vmem:[%s6753_s1 + $0x168] sm:$0xff] }
 0x8fe   :  { %v2331_v41 = vmul.f32 %v2330_v14, %v2310_v63  ;;  %2401 = vmatpush.msra.mxu3 %v3996_v8  ;;  %v3992_v14 = vld [vmem:[%s6756_s4 + $0x208] sm:$0xff] }
 0x900   :  { %v2335_v46 = vmul.f32 %v4182_v28, %v2331_v41  ;;  %2402 = vmatpush.msra.mxu3 %v3995_v43  ;;  %v3993_v28 = vld [vmem:[%s6756_s4 + $0x210] sm:$0xff]  ;;  %v3991_v41 = vld [vmem:[%s6756_s4 + $0x200] sm:$0xff] }
 0x902   :  { %v5787_v16 = vadd.f32 %v4183_v37, %v2335_v46  ;;  %2403 = vmatpush.msra.mxu3 %v3994_v29 }
 0x904   :  { %v2340_v30 = vmax.f32 %v5787_v16, 0.0  ;;  %2404 = vmatpush.msra.mxu3 %v3993_v28 }
 0x906   :  { %2341 = vst.msk [vmem:[#allocation2] sm:$0xff] %vm413_vm3, %v2340_v30  ;;  %2405 = vmatpush.msra.mxu3 %v3992_v14 }
 0x908   :  { %2406 = vmatpush.msra.mxu3 %v3991_v41 }
 0x90a   :  { %2630 = vmatpush.msrb.mxu3 %v4035_v6 }
 0x90d   :  { %v2343_v51 = vld [vmem:[#allocation2 + $0x1] ss:$2 sm:$0xf]  ;;  %v2342_v48 = vld [vmem:[#allocation2] ss:$2 sm:$0xf] }
 0x90e   :  { %2364 = vrot.lane.b32.xlu1 %v2343_v51, %s4221_s14  ;;  %2361 = vrot.lane.b32.xlu0 %v2342_v48, %s4220_s30  ;;  %v2353_v54 = vrot.slane %v2342_v48, 1  ;;  %v2345_v37 = vrot.slane %v2343_v51, 7 }
 0x910   :  { %v2356_v63 = vsel %vm2355_vm6, %v2353_v54, 0.0  ;;  %v2347_v46 = vsel %vm58_vm2, 0.0, %v2345_v37  ;;  %vm2415_vm6 = vcmask 257024  }
 0x911   :  { %v2360_v22 = vsel %vm2357_vm1, %v2356_v63, 0.0  ;;  %v2351_v54 = vsel %vm2348_vm15, %v2347_v46, 0.0 }
 0x912   :  { %2368 = vrot.lane.b32.xlu2 %v2360_v22, %s4222_s26 }
 0x96c   :  { %v2369_v34 = vpop.permute.xlu2 %2368 }
 0x980   :  { %v2365_v48 = vpop.permute.xlu1 %2364  ;;  %v2362_v63 = vpop.permute.xlu0 %2361 }
 0x981   :  { %v2371_v22 = vsel %vm413_vm3, %v2351_v54, %v2362_v63 }
 0x982   :  { %v2372_v0 = vsel %vm430_vm5, %v2371_v22, %v2365_v48 }
 0x983   :  { %v2373_v20 = vsel %vm459_vm4, %v2372_v0, %v2369_v34 }
 0x984   :  { %2407 = vmatmul.f32.vlgmr.msra.gmra.mxu3 %v2373_v20 }
 0xa07   :  { %v2408_v55 = vpop.f32.mrf.mxu3 }
 0xa08   :  { %v2416_v27 = vsel %vm2415_vm6, %v2408_v55, 0.0 }
 0xa09   :  { %v2417_v62 = vrot.slane %v2416_v27, 4 }
 0xa0b   :  { %v2418_v51 = vadd.f32 %v2417_v62, %v2416_v27  ;;  %v4020_v27 = vld [vmem:[%s6753_s1 + $0x118] sm:$0xff]  ;;  %v4019_v62 = vld [vmem:[%s6753_s1 + $0x110] sm:$0xff] }
 0xa0c   :  { %2505 = vmatpush.msra.mxu2 %v4020_v27 }
 0xa0d   :  { %v2419_v8 = vrot.slane %v2418_v51, 2 }
 0xa0e   :  { %2506 = vmatpush.msra.mxu2 %v4019_v62  ;;  %v4011_v62 = vld [vmem:[%s6753_s1 + $0xd0] sm:$0xff] }
 0xa0f   :  { %v2420_v43 = vadd.f32 %v2419_v8, %v2418_v51 }
 0xa11   :  { %v2421_v29 = vrot.slane %v2420_v43, 1 }
 0xa13   :  { %v2422_v28 = vadd.f32 %v2421_v29, %v2420_v43  ;;  %v4017_v43 = vld [vmem:[%s6753_s1 + $0x100] sm:$0xff] }
 0xa15   :  { %v2423_v14 = vmul.f32 0.25, %v2422_v28  ;;  %v4016_v28 = vld [vmem:[%s6753_s1 + $0xf8] sm:$0xff] }
 0xa17   :  { %v2424_v41 = vsub.f32 %v2408_v55, %v2423_v14 }
 0xa19   :  { %v2425_v37 = vmul.f32 %v2424_v41, %v2424_v41 }
 0xa1b   :  { %v2426_v46 = vsel %vm2415_vm6, %v2425_v37, 0.0  ;;  %v4015_v37 = vld [vmem:[%s6753_s1 + $0xf0] sm:$0xff] }
 0xa1c   :  { %v2427_v54 = vrot.slane %v2426_v46, 4 }
 0xa1e   :  { %v2428_v63 = vadd.f32 %v2427_v54, %v2426_v46  ;;  %v4014_v54 = vld [vmem:[%s6753_s1 + $0xe8] sm:$0xff] }
 0xa20   :  { %v2429_v53 = vrot.slane %v2428_v63, 2 }
 0xa22   :  { %v2430_v48 = vadd.f32 %v2429_v53, %v2428_v63  ;;  %v4018_v53 = vld [vmem:[%s6753_s1 + $0x108] sm:$0xff]  ;;  %v4184_v63 = vld [vmem:[%s6757_s5 + $0x4] ss:$0 sm:$0xff] }
 0xa23   :  { %2507 = vmatpush.msra.mxu2 %v4018_v53 }
 0xa24   :  { %v2431_v22 = vrot.slane %v2430_v48, 1 }
 0xa25   :  { %2508 = vmatpush.msra.mxu2 %v4017_v43 }
 0xa26   :  { %v2432_v34 = vadd.f32 %v2431_v22, %v2430_v48  ;;  %v4013_v22 = vld [vmem:[%s6753_s1 + $0xe0] sm:$0xff] }
 0xa27   :  { %2509 = vmatpush.msra.mxu2 %v4016_v28 }
 0xa28   :  { %v2433_v0 = vmul.f32 0.25, %v2432_v34 }
 0xa29   :  { %2510 = vmatpush.msra.mxu2 %v4015_v37 }
 0xa2a   :  { %v2434_v20 = vadd.f32 1e-05, %v2433_v0  ;;  %v4185_v0 = vld [vmem:[%s6758_s6 + $0x4] ss:$0 sm:$0xff] }
 0xa2b   :  { %2511 = vmatpush.msra.mxu2 %v4014_v54 }
 0xa2c   :  { %4208 = vrsqrt.f32 %v2434_v20  ;;  %vm2441_vm15 = vweird.f32 %v2434_v20 }
 0xa2d   :  { %2512 = vmatpush.msra.mxu2 %v4013_v22 }
 0xa32   :  { %v4209_v55 = vpop.eup %4208 }
 0xa33   :  { %v2436_v51 = vmul.f32 %v4209_v55, %v2434_v20  ;;  %vm2442_vm1 = vweird.f32 %v4209_v55  ;;  %v4012_v20 = vld [vmem:[%s6753_s1 + $0xd8] sm:$0xff] }
 0xa34   :  { %vm2443_vm6 = vmor %vm2441_vm15, %vm2442_vm1  ;;  %2513 = vmatpush.msra.mxu2 %v4012_v20  ;;  %vm2460_vm1 = vcmask 1041408   ;;  %vm2462_vm15 = vcmask 1043456  }
 0xa35   :  { %v2437_v8 = vmul.f32 %v4209_v55, %v2436_v51 }
 0xa36   :  { %2514 = vmatpush.msra.mxu2 %v4011_v62 }
 0xa37   :  { %v2438_v29 = vmul.f32 0.5, %v2437_v8 }
 0xa39   :  { %v2439_v14 = vsub.f32 1.5, %v2438_v29 }
 0xa3b   :  { %v2440_v46 = vmul.f32 %v4209_v55, %v2439_v14 }
 0xa3d   :  { %v2444_v48 = vsel %vm2443_vm6, %v4209_v55, %v2440_v46  ;;  %vm2464_vm6 = vcmask 1045504  }
 0xa3e   :  { %v2445_v34 = vmul.f32 %v2444_v48, %v2424_v41  ;;  %v4010_v41 = vld [vmem:[%s6753_s1 + $0xc8] sm:$0xff] }
 0xa3f   :  { %2515 = vmatpush.msra.mxu2 %v4010_v41 }
 0xa40   :  { %v2449_v27 = vmul.f32 %v4184_v63, %v2445_v34  ;;  %v4009_v63 = vld [vmem:[%s6753_s1 + $0xc0] sm:$0xff] }
 0xa41   :  { %2516 = vmatpush.msra.mxu2 %v4009_v63 }
 0xa42   :  { %v2453_v55 = vadd.f32 %v4185_v0, %v2449_v27 }
 0xa44   :  { %v2454_v51 = vmax.f32 %v2453_v55, 0.0 }
 0xa46   :  { %v2456_v53 = vrot.slane %v2454_v51, 6  ;;  %v2458_v8 = vrot.slane %v2454_v51, 4 }
 0xa48   :  { %v2461_v43 = vsel %vm2460_vm1, %v2454_v51, %v2456_v53 }
 0xa49   :  { %v2463_v29 = vsel %vm2462_vm15, %v2461_v43, %v2456_v53 }
 0xa4a   :  { %v2465_v28 = vsel %vm2464_vm6, %v2463_v29, %v2458_v8 }
 0xa4b   :  { %v2466_v14 = vadd.f32 %v2465_v28, %v2340_v30 }
 0xa4d   :  { %2476 = vrot.lane.b32.xlu0 %v2466_v14, %s4220_s30  ;;  %v2472_v37 = vrot.slane %v2466_v14, 1  ;;  %v2468_v48 = vrot.slane %v2466_v14, 7 }
 0xa4f   :  { %v2474_v46 = vsel %vm188_vm0, %v2472_v37, 0.0  ;;  %v2470_v22 = vsel %vm58_vm2, 0.0, %v2468_v48 }
 0xa50   :  { %v2475_v54 = vsel %vm2244_vm11, %v2474_v46, 0.0  ;;  %v2471_v30 = vsel %vm2236_vm12, %v2470_v22, 0.0 }
 0xa51   :  { %2480 = vrot.lane.b32.xlu1 %v2475_v54, %s4221_s14 }
 0xabf   :  { %v2477_v16 = vpop.permute.xlu0 %2476 }
 0xac0   :  { %v2483_v34 = vsel %vm413_vm3, %v2471_v30, %v2477_v16 }
 0xac3   :  { %v2481_v0 = vpop.permute.xlu1 %2480 }
 0xac4   :  { %v2484_v20 = vsel %vm430_vm5, %v2483_v34, %v2481_v0 }
 0xac5   :  { %4021 = vmatmul.msk.f32.vlgmr.msra.gmra.mxu2 %vm459_vm4, %v2484_v20 }
 0xb48   :  { %v2518_v27 = vpop.f32.mrf.mxu2 }
 0xb49   :  { %v2525_v62 = vsel %vm413_vm3, %v2518_v27, 0.0 }
 0xb4a   :  { %v2526_v55 = vrot.slane %v2525_v62, 4 }
 0xb4c   :  { %v2527_v41 = vadd.f32 %v2526_v55, %v2525_v62 }
 0xb4e   :  { %v2528_v51 = vrot.slane %v2527_v41, 2 }
 0xb50   :  { %v2529_v53 = vadd.f32 %v2528_v51, %v2527_v41 }
 0xb52   :  { %v2530_v8 = vrot.slane %v2529_v53, 1 }
 0xb54   :  { %v2531_v43 = vadd.f32 %v2530_v8, %v2529_v53 }
 0xb56   :  { %v2532_v29 = vmul.f32 0.125, %v2531_v43  ;;  %v4187_v43 = vld [vmem:[%s6755_s3 + $0x2] ss:$0 sm:$0xff] }
 0xb58   :  { %v2533_v28 = vsub.f32 %v2518_v27, %v2532_v29  ;;  %v4186_v27 = vld [vmem:[%s6754_s2 + $0x2] ss:$0 sm:$0xff] }
 0xb5a   :  { %v2534_v14 = vmul.f32 %v2533_v28, %v2533_v28 }
 0xb5c   :  { %v2535_v37 = vsel %vm413_vm3, %v2534_v14, 0.0 }
 0xb5d   :  { %v2536_v46 = vrot.slane %v2535_v37, 4 }
 0xb5f   :  { %v2537_v54 = vadd.f32 %v2536_v46, %v2535_v37 }
 0xb61   :  { %v2538_v63 = vrot.slane %v2537_v54, 2 }
 0xb63   :  { %v2539_v48 = vadd.f32 %v2538_v63, %v2537_v54 }
 0xb65   :  { %v2540_v22 = vrot.slane %v2539_v48, 1 }
 0xb67   :  { %v2541_v16 = vadd.f32 %v2540_v22, %v2539_v48 }
 0xb69   :  { %v2542_v30 = vmul.f32 0.125, %v2541_v16 }
 0xb6b   :  { %v2543_v34 = vadd.f32 1e-05, %v2542_v30 }
 0xb6d   :  { %4210 = vrsqrt.f32 %v2543_v34  ;;  %vm2550_vm12 = vweird.f32 %v2543_v34 }
 0xb73   :  { %v4211_v0 = vpop.eup %4210 }
 0xb74   :  { %v2545_v20 = vmul.f32 %v4211_v0, %v2543_v34  ;;  %vm2551_vm11 = vweird.f32 %v4211_v0 }
 0xb75   :  { %vm2552_vm1 = vmor %vm2550_vm12, %vm2551_vm11  ;;  %vm6810_vm12 = vcmp.ne.s32.totalorder %v4364_v32, 63  ;;  %v4087_v32 = vld [vmem:[%s6753_s1 + $0x278] sm:$0xff] }
 0xb76   :  { %v2546_v62 = vmul.f32 %v4211_v0, %v2545_v20 }
 0xb78   :  { %v2547_v55 = vmul.f32 0.5, %v2546_v62 }
 0xb7a   :  { %v2548_v41 = vsub.f32 1.5, %v2547_v55  ;;  %v4031_v55 = vld [vmem:[%s6753_s1 + $0x158] sm:$0xff] }
 0xb7c   :  { %v2549_v51 = vmul.f32 %v4211_v0, %v2548_v41  ;;  %v4030_v41 = vld [vmem:[%s6753_s1 + $0x150] sm:$0xff] }
 0xb7e   :  { %v2553_v53 = vsel %vm2552_vm1, %v4211_v0, %v2549_v51  ;;  %v4029_v51 = vld [vmem:[%s6753_s1 + $0x148] sm:$0xff] }
 0xb7f   :  { %v2554_v8 = vmul.f32 %v2553_v53, %v2533_v28  ;;  %v4027_v53 = vld [vmem:[%s6753_s1 + $0x138] sm:$0xff] }
 0xb81   :  { %v2558_v29 = vmul.f32 %v4186_v27, %v2554_v8  ;;  %v4028_v27 = vld [vmem:[%s6753_s1 + $0x140] sm:$0xff]  ;;  %v4026_v8 = vld [vmem:[%s6753_s1 + $0x130] sm:$0xff] }
 0xb83   :  { %v2562_v14 = vadd.f32 %v4187_v43, %v2558_v29  ;;  %v4025_v43 = vld [vmem:[%s6753_s1 + $0x128] sm:$0xff]  ;;  %v4024_v29 = vld [vmem:[%s6753_s1 + $0x120] sm:$0xff] }
 0xb85   :  { %v2563_v37 = vmax.f32 %v2562_v14, 0.0 }
 0xb87   :  { %v2565_v46 = vrot.slane %v2563_v37, 4 }
 0xb89   :  { %v2568_v54 = vsel %vm2462_vm15, %v2565_v46, %v2563_v37  ;;  %v2567_v63 = vsel %vm2462_vm15, %v2563_v37, %v2565_v46 }
 0xb8a   :  { %v2570_v48 = vadd.f32 %v2568_v54, %v2227_v45  ;;  %v2569_v22 = vadd.f32 %v2567_v63, %v2226_v40  ;;  %v4034_v40 = vld [vmem:[%s6753_s1 + $0x170] sm:$0xff]  ;;  %v4032_v45 = vld [vmem:[%s6753_s1 + $0x160] sm:$0xff] }
 0xb8b   :  { %2631 = vmatpush.msrb.mxu3 %v4034_v40 }
 0xb8c   :  { %2591 = vrot.lane.b32.xlu1 %v2570_v48, %s4220_s30  ;;  %v2574_v28 = vrot.slane %v2570_v48, 7  ;;  %2589 = vrot.lane.b32.xlu2 %v2569_v22, %s4220_s30  ;;  %v2581_v16 = vrot.slane %v2569_v22, 1  ;;  %v2582_v30 = vrot.slane %v2570_v48, 1  ;;  %v2573_v34 = vrot.slane %v2569_v22, 7 }
 0xb8d   :  { %2632 = vmatpush.msrb.mxu3 %v4033_v25 }
 0xb8e   :  { %v2583_v0 = vsel %vm188_vm0, %v2581_v16, %v2582_v30  ;;  %v2575_v20 = vsel %vm58_vm2, %v2573_v34, %v2574_v28  ;;  %v2586_v31 = vsel %vm188_vm0, %v2582_v30, 0.0  ;;  %v2578_v37 = vsel %vm58_vm2, 0.0, %v2573_v34 }
 0xb8f   :  { %v2587_v62 = vsel %vm2101_vm7, %v2583_v0, 0.0  ;;  %2633 = vmatpush.msrb.mxu3 %v4032_v45  ;;  %v2580_v22 = vsel %vm2086_vm8, %v2575_v20, 0.0 }
 0xb90   :  { %2597 = vrot.lane.b32.xlu0 %v2587_v62, %s4221_s14 }
 0xb91   :  { %2634 = vmatpush.msrb.mxu3 %v4031_v55 }
 0xb93   :  { %2635 = vmatpush.msrb.mxu3 %v4030_v41 }
 0xb94   :  { %2599 = vrot.lane.b32.xlu2 %v2586_v31, %s4221_s14 }
 0xb95   :  { %2636 = vmatpush.msrb.mxu3 %v4029_v51 }
 0xb97   :  { %2637 = vmatpush.msrb.mxu3 %v4028_v27 }
 0xb99   :  { %2638 = vmatpush.msrb.mxu3 %v4027_v53 }
 0xb9b   :  { %2639 = vmatpush.msrb.mxu3 %v4026_v8 }
 0xb9d   :  { %2640 = vmatpush.msrb.mxu3 %v4025_v43 }
 0xb9f   :  { %2641 = vmatpush.msrb.mxu3 %v4024_v29 }
 0xbe6   :  { %v2590_v14 = vpop.permute.xlu2 %2589 }
 0xbe7   :  { %v2603_v46 = vsel %vm413_vm3, %v2578_v37, %v2590_v14 }
 0xbee   :  { %v2600_v16 = vpop.permute.xlu2 %2599 }
 0xbfe   :  { %v2592_v48 = vpop.permute.xlu1 %2591 }
 0xbff   :  { %v2604_v28 = vsel %vm413_vm3, %v2580_v22, %v2592_v48 }
 0xc00   :  { %v2606_v30 = vsel %vm430_vm5, %v2604_v28, %v2600_v16 }
 0xc02   :  { %v2598_v54 = vpop.permute.xlu0 %2597 }
 0xc03   :  { %v2605_v63 = vsel %vm430_vm5, %v2603_v46, %v2598_v54 }
 0xc04   :  { %4036 = vmatmul.msk.f32.vlgmr.msrb.gmra.mxu3 %vm459_vm4, %v2605_v63 }
 0xc0c   :  { %4037 = vmatmul.msk.f32.gmra.mxu3 %vm459_vm4, %v2606_v30 }
 0xc87   :  { %v2643_v0 = vpop.f32.mrf.mxu3 }
 0xc88   :  { %v2653_v62 = vsel %vm413_vm3, %v2643_v0, 0.0 }
 0xc8f   :  { %v2646_v34 = vpop.f32.mrf.mxu3 }
 0xc90   :  { %v2654_v31 = vsel %vm413_vm3, %v2646_v34, 0.0 }
 0xc91   :  { %v2655_v6 = vadd.f32 %v2654_v31, %v2653_v62 }
 0xc93   :  { %v2656_v40 = vrot.slane %v2655_v6, 4 }
 0xc95   :  { %v2657_v25 = vadd.f32 %v2656_v40, %v2655_v6 }
 0xc97   :  { %v2658_v45 = vrot.slane %v2657_v25, 2 }
 0xc99   :  { %v2659_v55 = vadd.f32 %v2658_v45, %v2657_v25  ;;  %v4188_v25 = vld [vmem:[%s6754_s2 + $0x3] ss:$0 sm:$0xff] }
 0xc9b   :  { %v2660_v41 = vrot.slane %v2659_v55, 1 }
 0xc9d   :  { %v2661_v20 = vadd.f32 %v2660_v41, %v2659_v55 }
 0xc9f   :  { %v2662_v51 = vmul.f32 0.0625, %v2661_v20  ;;  %v4189_v20 = vld [vmem:[%s6755_s3 + $0x3] ss:$0 sm:$0xff] }
 0xca1   :  { %v2663_v27 = vsub.f32 %v2643_v0, %v2662_v51  ;;  %v2664_v53 = vsub.f32 %v2646_v34, %v2662_v51 }
 0xca3   :  { %v2665_v8 = vmul.f32 %v2663_v27, %v2663_v27  ;;  %v2666_v43 = vmul.f32 %v2664_v53, %v2664_v53 }
 0xca5   :  { %v2667_v29 = vsel %vm413_vm3, %v2665_v8, 0.0  ;;  %v2668_v14 = vsel %vm413_vm3, %v2666_v43, 0.0 }
 0xca6   :  { %v2669_v37 = vadd.f32 %v2668_v14, %v2667_v29 }
 0xca8   :  { %v2670_v46 = vrot.slane %v2669_v37, 4 }
 0xcaa   :  { %v2671_v54 = vadd.f32 %v2670_v46, %v2669_v37 }
 0xcac   :  { %v2672_v63 = vrot.slane %v2671_v54, 2 }
 0xcae   :  { %v2673_v48 = vadd.f32 %v2672_v63, %v2671_v54 }
 0xcb0   :  { %v2674_v22 = vrot.slane %v2673_v48, 1 }
 0xcb2   :  { %v2675_v28 = vadd.f32 %v2674_v22, %v2673_v48 }
 0xcb4   :  { %v2676_v16 = vmul.f32 0.0625, %v2675_v28 }
 0xcb6   :  { %v2677_v30 = vadd.f32 1e-05, %v2676_v16 }
 0xcb8   :  { %4212 = vrsqrt.f32 %v2677_v30  ;;  %vm2684_vm8 = vweird.f32 %v2677_v30 }
 0xcbe   :  { %v4213_v62 = vpop.eup %4212 }
 0xcbf   :  { %v2679_v31 = vmul.f32 %v4213_v62, %v2677_v30  ;;  %vm2685_vm7 = vweird.f32 %v4213_v62 }
 0xcc0   :  { %vm2686_vm15 = vmor %vm2684_vm8, %vm2685_vm7 }
 0xcc1   :  { %v2680_v0 = vmul.f32 %v4213_v62, %v2679_v31 }
 0xcc3   :  { %v2681_v34 = vmul.f32 0.5, %v2680_v0 }
 0xcc5   :  { %v2682_v6 = vsub.f32 1.5, %v2681_v34 }
 0xcc7   :  { %v2683_v40 = vmul.f32 %v4213_v62, %v2682_v6  ;;  %v4051_v6 = vld [vmem:[%s6753_s1 + $0x1d8] sm:$0xff] }
 0xcc8   :  { %2807 = vmatpush.msrb.mxu2 %v4051_v6 }
 0xcc9   :  { %v2687_v45 = vsel %vm2686_vm15, %v4213_v62, %v2683_v40  ;;  %v4049_v40 = vld [vmem:[%s6753_s1 + $0x1c8] sm:$0xff] }
 0xcca   :  { %v2688_v55 = vmul.f32 %v2687_v45, %v2663_v27  ;;  %v2689_v41 = vmul.f32 %v2687_v45, %v2664_v53  ;;  %v6787_v53 = vmax.f32 %v5601_v50, 0.0  ;;  %2808 = vmatpush.msrb.mxu2 %v4050_v17  ;;  %v4047_v45 = vld [vmem:[%s6753_s1 + $0x1b8] sm:$0xff] }
 0xccc   :  { %v2693_v51 = vmul.f32 %v4188_v25, %v2688_v55  ;;  %v2694_v8 = vmul.f32 %v4188_v25, %v2689_v41  ;;  %v4048_v25 = vld [vmem:[%s6753_s1 + $0x1c0] sm:$0xff]  ;;  %2809 = vmatpush.msrb.mxu2 %v4049_v40  ;;  %v4046_v55 = vld [vmem:[%s6753_s1 + $0x1b0] sm:$0xff]  ;;  %v4045_v41 = vld [vmem:[%s6753_s1 + $0x1a8] sm:$0xff] }
 0xcce   :  { %v2699_v43 = vadd.f32 %v4189_v20, %v2694_v8  ;;  %v2698_v29 = vadd.f32 %v4189_v20, %v2693_v51  ;;  %2810 = vmatpush.msrb.mxu2 %v4048_v25  ;;  %v4044_v20 = vld [vmem:[%s6753_s1 + $0x1a0] sm:$0xff]  ;;  %v4043_v51 = vld [vmem:[%s6753_s1 + $0x198] sm:$0xff]  ;;  %v4042_v8 = vld [vmem:[%s6753_s1 + $0x190] sm:$0xff] }
 0xcd0   :  { %v2701_v14 = vmax.f32 %v2699_v43, 0.0  ;;  %v2700_v37 = vmax.f32 %v2698_v29, 0.0  ;;  %2811 = vmatpush.msrb.mxu2 %v4047_v45  ;;  %v4041_v43 = vld [vmem:[%s6753_s1 + $0x188] sm:$0xff]  ;;  %v4040_v29 = vld [vmem:[%s6753_s1 + $0x180] sm:$0xff] }
 0xcd2   :  { %v2704_v46 = vadd.f32 %v2701_v14, %v2067_v11  ;;  %v2705_v54 = vadd.f32 %v2701_v14, %v2068_v61  ;;  %v2703_v27 = vadd.f32 %v2700_v37, %v2066_v9  ;;  %v2702_v63 = vadd.f32 %v2700_v37, %v6787_v53  ;;  %2812 = vmatpush.msrb.mxu2 %v4046_v55 }
 0xcd4   :  { %2744 = vrot.lane.b32.xlu2 %v2703_v27, %s4220_s30  ;;  %2742 = vrot.lane.b32.xlu0 %v2702_v63, %s4220_s30  ;;  %v2726_v48 = vrot.slane %v2702_v63, 1  ;;  %v2727_v22 = vrot.slane %v2703_v27, 1  ;;  %v2729_v28 = vrot.slane %v2704_v46, 1  ;;  %v2710_v16 = vrot.slane %v2702_v63, 7 }
 0xcd5   :  { %v2711_v30 = vrot.slane %v2703_v27, 7  ;;  %v2713_v33 = vrot.slane %v2704_v46, 7  ;;  %v2715_v11 = vrot.slane %v2705_v54, 7  ;;  %v2731_v10 = vrot.slane %v2705_v54, 1  ;;  %2813 = vmatpush.msrb.mxu2 %v4045_v41 }
 0xcd6   :  { %v2728_v36 = vsel %vm188_vm0, %v2726_v48, %v2727_v22  ;;  %v2730_v61 = vsel %vm188_vm0, %v2727_v22, %v2729_v28  ;;  %v2721_v37 = vsel %vm58_vm2, 0.0, %v2710_v16 }
 0xcd7   :  { %2758 = vrot.lane.b32.xlu1 %v2728_v36, %s4221_s14  ;;  %v2712_v9 = vsel %vm58_vm2, %v2710_v16, %v2711_v30  ;;  %v2714_v50 = vsel %vm58_vm2, %v2711_v30, %v2713_v33  ;;  %v2716_v62 = vsel %vm58_vm2, %v2713_v33, %v2715_v11  ;;  %v2732_v31 = vsel %vm188_vm0, %v2729_v28, %v2731_v10 }
 0xcd8   :  { %v2739_v0 = vsel %vm1883_vm9, %v2730_v61, 0.0  ;;  %v2737_v34 = vsel %vm188_vm0, %v2731_v10, 0.0  ;;  %2814 = vmatpush.msrb.mxu2 %v4044_v20  ;;  %v2724_v30 = vsel %vm1852_vm10, %v2714_v50, 0.0 }
 0xcda   :  { %2815 = vmatpush.msrb.mxu2 %v4043_v51 }
 0xcdc   :  { %2762 = vrot.lane.b32.xlu2 %v2732_v31, %s4221_s14  ;;  %2760 = vrot.lane.b32.xlu0 %v2739_v0, %s4221_s14 }
 0xcdd   :  { %2816 = vmatpush.msrb.mxu2 %v4042_v8 }
 0xcdf   :  { %2746 = vrot.lane.b32.xlu1 %v2704_v46, %s4220_s30  ;;  %2817 = vmatpush.msrb.mxu2 %v4041_v43 }
 0xce1   :  { %2818 = vmatpush.msrb.mxu2 %v4040_v29 }
 0xce4   :  { %2748 = vrot.lane.b32.xlu0 %v2705_v54, %s4220_s30 }
 0xce7   :  { %2764 = vrot.lane.b32.xlu1 %v2737_v34, %s4221_s14 }
 0xd2e   :  { %v2745_v53 = vpop.permute.xlu2 %2744 }
 0xd2f   :  { %v2771_v48 = vsel %vm413_vm3, %v2712_v9, %v2745_v53 }
 0xd36   :  { %v2763_v33 = vpop.permute.xlu2 %2762 }
 0xd46   :  { %v2743_v14 = vpop.permute.xlu0 %2742 }
 0xd47   :  { %v2770_v46 = vsel %vm413_vm3, %v2721_v37, %v2743_v14 }
 0xd49   :  { %v2759_v54 = vpop.permute.xlu1 %2758 }
 0xd4a   :  { %v2774_v27 = vsel %vm430_vm5, %v2770_v46, %v2759_v54 }
 0xd4b   :  { %4052 = vmatmul.msk.f32.vlgmr.msrb.gmra.mxu2 %vm459_vm4, %v2774_v27 }
 0xd4e   :  { %v2761_v63 = vpop.permute.xlu0 %2760 }
 0xd4f   :  { %v2775_v22 = vsel %vm430_vm5, %v2771_v48, %v2761_v63 }
 0xd51   :  { %v2747_v28 = vpop.permute.xlu1 %2746 }
 0xd52   :  { %v2772_v16 = vsel %vm413_vm3, %v2724_v30, %v2747_v28 }
 0xd53   :  { %4053 = vmatmul.msk.f32.gmra.mxu2 %vm459_vm4, %v2775_v22  ;;  %v2776_v11 = vsel %vm430_vm5, %v2772_v16, %v2763_v33 }
 0xd56   :  { %v2749_v36 = vpop.permute.xlu0 %2748 }
 0xd57   :  { %v2773_v61 = vsel %vm413_vm3, %v2716_v62, %v2749_v36 }
 0xd59   :  { %v2765_v10 = vpop.permute.xlu1 %2764 }
 0xd5a   :  { %v2777_v9 = vsel %vm430_vm5, %v2773_v61, %v2765_v10 }
 0xd5b   :  { %4054 = vmatmul.msk.f32.gmra.mxu2 %vm459_vm4, %v2776_v11 }
 0xd63   :  { %4055 = vmatmul.msk.f32.gmra.mxu2 %vm459_vm4, %v2777_v9 }
 0xdce   :  { %v2820_v31 = vpop.f32.mrf.mxu2 }
 0xdcf   :  { %v2836_v50 = vsel %vm413_vm3, %v2820_v31, 0.0 }
 0xdd6   :  { %v2823_v0 = vpop.f32.mrf.mxu2 }
 0xdd7   :  { %v2837_v21 = vsel %vm413_vm3, %v2823_v0, 0.0 }
 0xdd8   :  { %v2838_v17 = vadd.f32 %v2837_v21, %v2836_v50 }
 0xdde   :  { %v2826_v34 = vpop.f32.mrf.mxu2 }
 0xddf   :  { %v2839_v6 = vsel %vm413_vm3, %v2826_v34, 0.0 }
 0xde0   :  { %v2840_v40 = vadd.f32 %v2839_v6, %v2838_v17 }
 0xde6   :  { %v2829_v25 = vpop.f32.mrf.mxu2 }
 0xde7   :  { %v2841_v45 = vsel %vm413_vm3, %v2829_v25, 0.0 }
 0xde8   :  { %v2842_v55 = vadd.f32 %v2841_v45, %v2840_v40 }
 0xdea   :  { %v2843_v62 = vrot.slane %v2842_v55, 4 }
 0xdec   :  { %v2844_v41 = vadd.f32 %v2843_v62, %v2842_v55  ;;  %v4190_v62 = vld [vmem:[%s6754_s2 + $0x4] ss:$0 sm:$0xff] }
 0xdee   :  { %v2845_v20 = vrot.slane %v2844_v41, 2 }
 0xdf0   :  { %v2846_v51 = vadd.f32 %v2845_v20, %v2844_v41 }
 0xdf2   :  { %v2847_v8 = vrot.slane %v2846_v51, 1 }
 0xdf4   :  { %v2848_v43 = vadd.f32 %v2847_v8, %v2846_v51  ;;  %v4191_v51 = vld [vmem:[%s6755_s3 + $0x4] ss:$0 sm:$0xff] }
 0xdf6   :  { %v2849_v29 = vmul.f32 0.03125, %v2848_v43 }
 0xdf8   :  { %v2850_v14 = vsub.f32 %v2820_v31, %v2849_v29  ;;  %v2851_v37 = vsub.f32 %v2823_v0, %v2849_v29  ;;  %v2852_v46 = vsub.f32 %v2826_v34, %v2849_v29  ;;  %v2853_v54 = vsub.f32 %v2829_v25, %v2849_v29 }
 0xdfa   :  { %v2854_v27 = vmul.f32 %v2850_v14, %v2850_v14  ;;  %v2855_v53 = vmul.f32 %v2851_v37, %v2851_v37  ;;  %v2856_v63 = vmul.f32 %v2852_v46, %v2852_v46  ;;  %v2857_v48 = vmul.f32 %v2853_v54, %v2853_v54 }
 0xdfc   :  { %v2858_v22 = vsel %vm413_vm3, %v2854_v27, 0.0  ;;  %v2859_v28 = vsel %vm413_vm3, %v2855_v53, 0.0  ;;  %v2861_v16 = vsel %vm413_vm3, %v2856_v63, 0.0  ;;  %v2863_v11 = vsel %vm413_vm3, %v2857_v48, 0.0 }
 0xdfd   :  { %v2860_v30 = vadd.f32 %v2859_v28, %v2858_v22 }
 0xdff   :  { %v2862_v33 = vadd.f32 %v2861_v16, %v2860_v30 }
 0xe01   :  { %v2864_v36 = vadd.f32 %v2863_v11, %v2862_v33 }
 0xe03   :  { %v2865_v10 = vrot.slane %v2864_v36, 4 }
 0xe05   :  { %v2866_v61 = vadd.f32 %v2865_v10, %v2864_v36 }
 0xe07   :  { %v2867_v9 = vrot.slane %v2866_v61, 2 }
 0xe09   :  { %v2868_v31 = vadd.f32 %v2867_v9, %v2866_v61  ;;  %v6789_v9 = vmax.f32 %v5421_v7, 0.0  ;;  %v6793_v7 = vmax.f32 %v5425_v13, 0.0 }
 0xe0b   :  { %v2869_v0 = vrot.slane %v2868_v31, 1 }
 0xe0d   :  { %v2870_v34 = vadd.f32 %v2869_v0, %v2868_v31  ;;  %v6791_v31 = vmax.f32 %v5434_v58, 0.0 }
 0xe0f   :  { %v2871_v21 = vmul.f32 0.03125, %v2870_v34  ;;  %v6792_v34 = vmax.f32 %v5423_v42, 0.0  ;;  %v6795_v42 = vmax.f32 %v5429_v15, 0.0 }
 0xe11   :  { %v2872_v50 = vadd.f32 1e-05, %v2871_v21 }
 0xe13   :  { %4214 = vrsqrt.f32 %v2872_v50  ;;  %vm2879_vm10 = vweird.f32 %v2872_v50 }
 0xe19   :  { %v4215_v6 = vpop.eup %4214 }
 0xe1a   :  { %v2874_v17 = vmul.f32 %v4215_v6, %v2872_v50  ;;  %vm2880_vm9 = vweird.f32 %v4215_v6 }
 0xe1b   :  { %vm2881_vm6 = vmor %vm2879_vm10, %vm2880_vm9 }
 0xe1c   :  { %v2875_v40 = vmul.f32 %v4215_v6, %v2874_v17 }
 0xe1e   :  { %v2876_v25 = vmul.f32 0.5, %v2875_v40 }
 0xe20   :  { %v2877_v45 = vsub.f32 1.5, %v2876_v25 }
 0xe22   :  { %v2878_v55 = vmul.f32 %v4215_v6, %v2877_v45 }
 0xe24   :  { %v2882_v41 = vsel %vm2881_vm6, %v4215_v6, %v2878_v55 }
 0xe25   :  { %v2886_v20 = vmul.f32 %v2882_v41, %v2853_v54  ;;  %v2884_v8 = vmul.f32 %v2882_v41, %v2851_v37  ;;  %v2883_v43 = vmul.f32 %v2882_v41, %v2850_v14  ;;  %v2885_v29 = vmul.f32 %v2882_v41, %v2852_v46 }
 0xe26   :  { %v6788_v54 = vmax.f32 %v5419_v49, 0.0  ;;  %v6790_v14 = vmax.f32 %v5417_v35, 0.0  ;;  %v6794_v35 = vmax.f32 %v5427_v52, 0.0 }
 0xe27   :  { %v2893_v27 = vmul.f32 %v4190_v62, %v2886_v20  ;;  %v2891_v53 = vmul.f32 %v4190_v62, %v2884_v8  ;;  %v2890_v63 = vmul.f32 %v4190_v62, %v2883_v43  ;;  %v2892_v48 = vmul.f32 %v4190_v62, %v2885_v29 }
 0xe29   :  { %v2900_v22 = vadd.f32 %v4191_v51, %v2893_v27  ;;  %v2898_v28 = vadd.f32 %v4191_v51, %v2891_v53  ;;  %v2897_v30 = vadd.f32 %v4191_v51, %v2890_v63  ;;  %v2899_v16 = vadd.f32 %v4191_v51, %v2892_v48 }
 0xe2b   :  { %v2902_v33 = vmax.f32 %v2898_v28, 0.0  ;;  %v2901_v11 = vmax.f32 %v2897_v30, 0.0  ;;  %v2903_v36 = vmax.f32 %v2899_v16, 0.0  ;;  %v2904_v10 = vmax.f32 %v2900_v22, 0.0 }
 0xe2d   :  { %v2906_v61 = vadd.f32 %v2902_v33, %v6788_v54  ;;  %v2908_v37 = vadd.f32 %v2902_v33, %v6789_v9  ;;  %v6068_v46 = vadd.f32 %v2901_v11, %v6790_v14  ;;  %v2907_v0 = vadd.f32 %v2901_v11, %v6791_v31  ;;  %v4068_v14 = vld [vmem:[%s6753_s1 + $0x230] sm:$0xff]  ;;  %v4067_v31 = vld [vmem:[%s6753_s1 + $0x228] sm:$0xff] }
 0xe2e   :  { %v2909_v21 = vadd.f32 %v2903_v36, %v6792_v34  ;;  %v2910_v6 = vadd.f32 %v2904_v10, %v6793_v7  ;;  %v2911_v17 = vadd.f32 %v2903_v36, %v6794_v35  ;;  %v2912_v45 = vadd.f32 %v2904_v10, %v6795_v42  ;;  %v4065_v34 = vld [vmem:[%s6753_s1 + $0x218] sm:$0xff]  ;;  %v4059_v35 = vld [vmem:[%s6753_s1 + $0x1e8] sm:$0xff] }
 0xe2f   :  { %2987 = vrot.lane.b32.xlu1 %v2906_v61, %s4220_s30  ;;  %2985 = vrot.lane.b32.xlu2 %v6068_v46, %s4220_s30  ;;  %v2953_v49 = vrot.slane %v6068_v46, 1  ;;  %v2954_v50 = vrot.slane %v2906_v61, 1  ;;  %v2956_v40 = vrot.slane %v2907_v0, 1  ;;  %v2958_v25 = vrot.slane %v2908_v37, 1  ;;  %v4061_v7 = vld [vmem:[%s6753_s1 + $0x1f8] sm:$0xff] }
 0xe30   :  { %v2928_v55 = vrot.slane %v2909_v21, 7  ;;  %v2921_v62 = vrot.slane %v6068_v46, 7  ;;  %v2924_v41 = vrot.slane %v2907_v0, 7  ;;  %v2926_v20 = vrot.slane %v2908_v37, 7 }
 0xe31   :  { %v2955_v58 = vsel %vm188_vm0, %v2953_v49, %v2954_v50  ;;  %v2922_v51 = vrot.slane %v2906_v61, 7  ;;  %v2930_v13 = vrot.slane %v2910_v6, 7  ;;  %v2959_v8 = vsel %vm188_vm0, %v2956_v40, %v2958_v25  ;;  %v4063_v49 = vld [vmem:[%s6753_s1 + $0x208] sm:$0xff] }
 0xe32   :  { %3017 = vrot.lane.b32.xlu0 %v2955_v58, %s4221_s14  ;;  %v2957_v52 = vsel %vm188_vm0, %v2954_v50, %v2956_v40  ;;  %v2932_v43 = vrot.slane %v2911_v17, 7  ;;  %v2934_v29 = vrot.slane %v2912_v45, 7  ;;  %v6090_v27 = vsel %vm58_vm2, %v2924_v41, %v2926_v20  ;;  %v4062_v50 = vld [vmem:[%s6753_s1 + $0x200] sm:$0xff] }
 0xe33   :  { %v2923_v15 = vsel %vm58_vm2, %v2921_v62, %v2922_v51  ;;  %v6096_v53 = vsel %vm58_vm2, %v2922_v51, %v2924_v41  ;;  %v6099_v63 = vsel %vm58_vm2, %v2926_v20, %v2928_v55  ;;  %v6107_v22 = vsel %vm58_vm2, %v2928_v55, %v2930_v13 }
 0xe34   :  { %v6104_v48 = vsel %vm58_vm2, %v2930_v13, %v2932_v43  ;;  %v6110_v28 = vsel %vm58_vm2, %v2932_v43, %v2934_v29  ;;  %v2960_v30 = vrot.slane %v2909_v21, 1  ;;  %v2962_v11 = vrot.slane %v2910_v6, 1 }
 0xe35   :  { %v2964_v36 = vrot.slane %v2911_v17, 1  ;;  %v2966_v61 = vrot.slane %v2912_v45, 1  ;;  %v2944_v40 = vsel %vm58_vm2, 0.0, %v2921_v62 }
 0xe36   :  { %v2961_v16 = vsel %vm188_vm0, %v2958_v25, %v2960_v30  ;;  %v2963_v54 = vsel %vm188_vm0, %v2960_v30, %v2962_v11 }
 0xe37   :  { %3021 = vrot.lane.b32.xlu1 %v2959_v8, %s4221_s14  ;;  %3019 = vrot.lane.b32.xlu2 %v2957_v52, %s4221_s14  ;;  %v2980_v33 = vsel %vm1517_vm13, %v2961_v16, 0.0  ;;  %v2965_v10 = vsel %vm188_vm0, %v2962_v11, %v2964_v36  ;;  %v2967_v23 = vsel %vm188_vm0, %v2964_v36, %v2966_v61  ;;  %v2976_v9 = vsel %vm188_vm0, %v2966_v61, 0.0 }
 0xe38   :  { %v2949_v16 = vsel %vm1454_vm14, %v6099_v63, 0.0 }
 0xe3a   :  { %2989 = vrot.lane.b32.xlu0 %v2907_v0, %s4220_s30  ;;  %v4066_v0 = vld [vmem:[%s6753_s1 + $0x220] sm:$0xff] }
 0xe3f   :  { %2993 = vrot.lane.b32.xlu1 %v2909_v21, %s4220_s30  ;;  %2991 = vrot.lane.b32.xlu2 %v2908_v37, %s4220_s30  ;;  %v4069_v37 = vld [vmem:[%s6753_s1 + $0x238] sm:$0xff]  ;;  %v4064_v21 = vld [vmem:[%s6753_s1 + $0x210] sm:$0xff] }
 0xe40   :  { %3098 = vmatpush.msra.mxu3 %v4069_v37 }
 0xe42   :  { %3023 = vrot.lane.b32.xlu0 %v2980_v33, %s4221_s14  ;;  %3099 = vmatpush.msra.mxu3 %v4068_v14 }
 0xe44   :  { %3100 = vmatpush.msra.mxu3 %v4067_v31 }
 0xe46   :  { %3101 = vmatpush.msra.mxu3 %v4066_v0 }
 0xe47   :  { %3027 = vrot.lane.b32.xlu1 %v2965_v10, %s4221_s14  ;;  %3025 = vrot.lane.b32.xlu2 %v2963_v54, %s4221_s14 }
 0xe48   :  { %3102 = vmatpush.msra.mxu3 %v4065_v34 }
 0xe4a   :  { %2995 = vrot.lane.b32.xlu0 %v2910_v6, %s4220_s30  ;;  %3103 = vmatpush.msra.mxu3 %v4064_v21  ;;  %v4060_v6 = vld [vmem:[%s6753_s1 + $0x1f0] sm:$0xff] }
 0xe4c   :  { %3104 = vmatpush.msra.mxu3 %v4063_v49 }
 0xe4e   :  { %3105 = vmatpush.msra.mxu3 %v4062_v50 }
 0xe4f   :  { %2999 = vrot.lane.b32.xlu1 %v2912_v45, %s4220_s30  ;;  %2997 = vrot.lane.b32.xlu2 %v2911_v17, %s4220_s30  ;;  %v4058_v17 = vld [vmem:[%s6753_s1 + $0x1e0] sm:$0xff] }
 0xe50   :  { %3106 = vmatpush.msra.mxu3 %v4061_v7 }
 0xe52   :  { %3029 = vrot.lane.b32.xlu0 %v2967_v23, %s4221_s14  ;;  %3107 = vmatpush.msra.mxu3 %v4060_v6 }
 0xe54   :  { %3108 = vmatpush.msra.mxu3 %v4059_v35 }
 0xe56   :  { %3109 = vmatpush.msra.mxu3 %v4058_v17 }
 0xe57   :  { %3031 = vrot.lane.b32.xlu2 %v2976_v9, %s4221_s14 }
 0xe89   :  { %v2986_v58 = vpop.permute.xlu2 %2985 }
 0xe8a   :  { %v3041_v25 = vsel %vm413_vm3, %v2944_v40, %v2986_v58 }
 0xe91   :  { %v3020_v20 = vpop.permute.xlu2 %3019 }
 0xe99   :  { %v2992_v52 = vpop.permute.xlu2 %2991 }
 0xe9a   :  { %v3044_v29 = vsel %vm413_vm3, %v6090_v27, %v2992_v52 }
 0xea1   :  { %v2988_v55 = vpop.permute.xlu1 %2987  ;;  %v3026_v33 = vpop.permute.xlu2 %3025 }
 0xea2   :  { %v3042_v41 = vsel %vm413_vm3, %v2923_v15, %v2988_v55 }
 0xea3   :  { %v3050_v51 = vsel %vm430_vm5, %v3042_v41, %v3020_v20 }
 0xea4   :  { %v3018_v42 = vpop.permute.xlu0 %3017 }
 0xea5   :  { %v3049_v45 = vsel %vm430_vm5, %v3041_v25, %v3018_v42 }
 0xea6   :  { %4070 = vmatmul.msk.f32.vlgmr.msra.gmra.mxu3 %vm459_vm4, %v3049_v45 }
 0xea9   :  { %v3022_v62 = vpop.permute.xlu1 %3021  ;;  %v2998_v61 = vpop.permute.xlu2 %2997 }
 0xeaa   :  { %v3047_v57 = vsel %vm413_vm3, %v6104_v48, %v2998_v61 }
 0xeac   :  { %v2990_v13 = vpop.permute.xlu0 %2989 }
 0xead   :  { %v3043_v46 = vsel %vm413_vm3, %v6096_v53, %v2990_v13 }
 0xeae   :  { %4071 = vmatmul.msk.f32.gmra.mxu3 %vm459_vm4, %v3050_v51  ;;  %v3051_v8 = vsel %vm430_vm5, %v3043_v46, %v3022_v62 }
 0xeb1   :  { %v2994_v30 = vpop.permute.xlu1 %2993  ;;  %v3032_v14 = vpop.permute.xlu2 %3031 }
 0xeb2   :  { %v3045_v53 = vsel %vm413_vm3, %v2949_v16, %v2994_v30 }
 0xeb3   :  { %v3053_v11 = vsel %vm430_vm5, %v3045_v53, %v3026_v33 }
 0xeb4   :  { %v3024_v43 = vpop.permute.xlu0 %3023 }
 0xeb5   :  { %v3052_v15 = vsel %vm430_vm5, %v3044_v29, %v3024_v43 }
 0xeb6   :  { %4072 = vmatmul.msk.f32.gmra.mxu3 %vm459_vm4, %v3051_v8 }
 0xeb9   :  { %v3028_v10 = vpop.permute.xlu1 %3027 }
 0xebc   :  { %v2996_v36 = vpop.permute.xlu0 %2995 }
 0xebd   :  { %v3046_v27 = vsel %vm413_vm3, %v6107_v22, %v2996_v36 }
 0xebe   :  { %4073 = vmatmul.msk.f32.gmra.mxu3 %vm459_vm4, %v3052_v15  ;;  %v3054_v54 = vsel %vm430_vm5, %v3046_v27, %v3028_v10 }
 0xec1   :  { %v3000_v9 = vpop.permute.xlu1 %2999 }
 0xec2   :  { %v3048_v37 = vsel %vm413_vm3, %v6110_v28, %v3000_v9 }
 0xec3   :  { %v3056_v22 = vsel %vm430_vm5, %v3048_v37, %v3032_v14 }
 0xec4   :  { %v3030_v23 = vpop.permute.xlu0 %3029 }
 0xec5   :  { %v3055_v63 = vsel %vm430_vm5, %v3047_v57, %v3030_v23 }
 0xec6   :  { %4074 = vmatmul.msk.f32.gmra.mxu3 %vm459_vm4, %v3053_v11 }
 0xece   :  { %4075 = vmatmul.msk.f32.gmra.mxu3 %vm459_vm4, %v3054_v54 }
 0xed6   :  { %4076 = vmatmul.msk.f32.gmra.mxu3 %vm459_vm4, %v3055_v63 }
 0xede   :  { %4077 = vmatmul.msk.f32.gmra.mxu3 %vm459_vm4, %v3056_v22 }
 0xf29   :  { %v3111_v31 = vpop.f32.mrf.mxu3 }
 0xf2a   :  { %v3139_v7 = vsel %vm413_vm3, %v3111_v31, 0.0 }
 0xf31   :  { %v3114_v0 = vpop.f32.mrf.mxu3 }
 0xf32   :  { %v3140_v48 = vsel %vm413_vm3, %v3114_v0, 0.0 }
 0xf33   :  { %v3141_v35 = vadd.f32 %v3140_v48, %v3139_v7 }
 0xf39   :  { %v3117_v34 = vpop.f32.mrf.mxu3 }
 0xf3a   :  { %v3142_v6 = vsel %vm413_vm3, %v3117_v34, 0.0 }
 0xf3b   :  { %v3143_v17 = vadd.f32 %v3142_v6, %v3141_v35 }
 0xf41   :  { %v3120_v21 = vpop.f32.mrf.mxu3 }
 0xf42   :  { %v3144_v28 = vsel %vm413_vm3, %v3120_v21, 0.0 }
 0xf43   :  { %v3145_v25 = vadd.f32 %v3144_v28, %v3143_v17 }
 0xf49   :  { %v3123_v49 = vpop.f32.mrf.mxu3 }
 0xf4a   :  { %v3146_v40 = vsel %vm413_vm3, %v3123_v49, 0.0 }
 0xf4b   :  { %v3147_v45 = vadd.f32 %v3146_v40, %v3145_v25 }
 0xf51   :  { %v3126_v50 = vpop.f32.mrf.mxu3 }
 0xf52   :  { %v3148_v42 = vsel %vm413_vm3, %v3126_v50, 0.0 }
 0xf53   :  { %v3149_v41 = vadd.f32 %v3148_v42, %v3147_v45 }
 0xf59   :  { %v3129_v58 = vpop.f32.mrf.mxu3 }
 0xf5a   :  { %v3150_v55 = vsel %vm413_vm3, %v3129_v58, 0.0 }
 0xf5b   :  { %v3151_v20 = vadd.f32 %v3150_v55, %v3149_v41 }
 0xf61   :  { %v3132_v51 = vpop.f32.mrf.mxu3 }
 0xf62   :  { %v3152_v13 = vsel %vm413_vm3, %v3132_v51, 0.0 }
 0xf63   :  { %v3153_v46 = vadd.f32 %v3152_v13, %v3151_v20 }
 0xf65   :  { %v3154_v62 = vrot.slane %v3153_v46, 4 }
 0xf67   :  { %v3155_v8 = vadd.f32 %v3154_v62, %v3153_v46 }
 0xf69   :  { %v3156_v52 = vrot.slane %v3155_v8, 2 }
 0xf6b   :  { %v3157_v43 = vadd.f32 %v3156_v52, %v3155_v8 }
 0xf6d   :  { %v3158_v29 = vrot.slane %v3157_v43, 1 }
 0xf6f   :  { %v3159_v15 = vadd.f32 %v3158_v29, %v3157_v43 }
 0xf71   :  { %v3160_v30 = vmul.f32 0.015625, %v3159_v15 }
 0xf73   :  { %v3161_v16 = vsub.f32 %v3111_v31, %v3160_v30  ;;  %v3162_v53 = vsub.f32 %v3114_v0, %v3160_v30  ;;  %v3163_v33 = vsub.f32 %v3117_v34, %v3160_v30  ;;  %v3164_v11 = vsub.f32 %v3120_v21, %v3160_v30 }
 0xf74   :  { %v3165_v36 = vsub.f32 %v3123_v49, %v3160_v30  ;;  %v3166_v61 = vsub.f32 %v3126_v50, %v3160_v30  ;;  %v3167_v37 = vsub.f32 %v3129_v58, %v3160_v30  ;;  %v3168_v31 = vsub.f32 %v3132_v51, %v3160_v30  ;;  %v4192_v30 = vld [vmem:[%s6754_s2 + $0x5] ss:$0 sm:$0xff] }
 0xf75   :  { %v3169_v27 = vmul.f32 %v3161_v16, %v3161_v16  ;;  %v3170_v10 = vmul.f32 %v3162_v53, %v3162_v53  ;;  %v3171_v54 = vmul.f32 %v3163_v33, %v3163_v33  ;;  %v3172_v23 = vmul.f32 %v3164_v11, %v3164_v11 }
 0xf76   :  { %v3173_v14 = vmul.f32 %v3165_v36, %v3165_v36  ;;  %v3174_v0 = vmul.f32 %v3166_v61, %v3166_v61  ;;  %v3175_v49 = vmul.f32 %v3167_v37, %v3167_v37  ;;  %v3176_v6 = vmul.f32 %v3168_v31, %v3168_v31 }
 0xf77   :  { %v3177_v57 = vsel %vm413_vm3, %v3169_v27, 0.0  ;;  %v3178_v63 = vsel %vm413_vm3, %v3170_v10, 0.0  ;;  %v3180_v22 = vsel %vm413_vm3, %v3171_v54, 0.0  ;;  %v3182_v34 = vsel %vm413_vm3, %v3172_v23, 0.0 }
 0xf78   :  { %v3179_v9 = vadd.f32 %v3178_v63, %v3177_v57  ;;  %v3184_v7 = vsel %vm413_vm3, %v3173_v14, 0.0  ;;  %v3186_v35 = vsel %vm413_vm3, %v3174_v0, 0.0  ;;  %v3188_v17 = vsel %vm413_vm3, %v3175_v49, 0.0  ;;  %v4193_v57 = vld [vmem:[%s6755_s3 + $0x5] ss:$0 sm:$0xff] }
 0xf79   :  { %v3190_v40 = vsel %vm413_vm3, %v3176_v6, 0.0 }
 0xf7a   :  { %v3181_v48 = vadd.f32 %v3180_v22, %v3179_v9 }
 0xf7c   :  { %v3183_v21 = vadd.f32 %v3182_v34, %v3181_v48 }
 0xf7e   :  { %v3185_v50 = vadd.f32 %v3184_v7, %v3183_v21 }
 0xf80   :  { %v3187_v28 = vadd.f32 %v3186_v35, %v3185_v50 }
 0xf82   :  { %v3189_v58 = vadd.f32 %v3188_v17, %v3187_v28 }
 0xf84   :  { %v3191_v25 = vadd.f32 %v3190_v40, %v3189_v58 }
 0xf86   :  { %v3192_v42 = vrot.slane %v3191_v25, 4 }
 0xf88   :  { %v3193_v45 = vadd.f32 %v3192_v42, %v3191_v25  ;;  %v6796_v42 = vmax.f32 %v5133_v26, 0.0 }
 0xf8a   :  { %v3194_v55 = vrot.slane %v3193_v45, 2 }
 0xf8c   :  { %v3195_v41 = vadd.f32 %v3194_v55, %v3193_v45 }
 0xf8e   :  { %v3196_v20 = vrot.slane %v3195_v41, 1 }
 0xf90   :  { %v3197_v51 = vadd.f32 %v3196_v20, %v3195_v41  ;;  %v6797_v20 = vmax.f32 %v5131_v24, 0.0 }
 0xf92   :  { %v3198_v13 = vmul.f32 0.015625, %v3197_v51 }
 0xf94   :  { %v3199_v46 = vadd.f32 1e-05, %v3198_v13  ;;  %v6798_v13 = vmax.f32 %v5198_v19, 0.0  ;;  %v6801_v19 = vmax.f32 %v5168_v18, 0.0 }
 0xf96   :  { %4216 = vrsqrt.f32 %v3199_v46  ;;  %vm3206_vm14 = vweird.f32 %v3199_v46 }
 0xf9c   :  { %v4217_v62 = vpop.eup %4216 }
 0xf9d   :  { %v3201_v8 = vmul.f32 %v4217_v62, %v3199_v46  ;;  %vm3207_vm13 = vweird.f32 %v4217_v62 }
 0xf9e   :  { %vm3208_vm11 = vmor %vm3206_vm14, %vm3207_vm13 }
 0xf9f   :  { %v3202_v52 = vmul.f32 %v4217_v62, %v3201_v8 }
 0xfa1   :  { %v3203_v43 = vmul.f32 0.5, %v3202_v52 }
 0xfa3   :  { %v3204_v29 = vsub.f32 1.5, %v3203_v43  ;;  %v6800_v43 = vmax.f32 %v5147_v2, 0.0 }
 0xfa5   :  { %v3205_v15 = vmul.f32 %v4217_v62, %v3204_v29 }
 0xfa7   :  { %v3209_v27 = vsel %vm3208_vm11, %v4217_v62, %v3205_v15  ;;  %v6799_v62 = vmax.f32 %v5135_v39, 0.0 }
 0xfa8   :  { %v3214_v10 = vmul.f32 %v3209_v27, %v3165_v36  ;;  %v3215_v54 = vmul.f32 %v3209_v27, %v3166_v61  ;;  %v3217_v23 = vmul.f32 %v3209_v27, %v3168_v31  ;;  %v3211_v63 = vmul.f32 %v3209_v27, %v3162_v53 }
 0xfa9   :  { %v3210_v9 = vmul.f32 %v3209_v27, %v3161_v16  ;;  %v3212_v14 = vmul.f32 %v3209_v27, %v3163_v33  ;;  %v3213_v22 = vmul.f32 %v3209_v27, %v3164_v11  ;;  %v3216_v48 = vmul.f32 %v3209_v27, %v3167_v37 }
 0xfaa   :  { %v3228_v0 = vmul.f32 %v4192_v30, %v3217_v23  ;;  %v3222_v34 = vmul.f32 %v4192_v30, %v3211_v63  ;;  %v3225_v21 = vmul.f32 %v4192_v30, %v3214_v10  ;;  %v3226_v49 = vmul.f32 %v4192_v30, %v3215_v54 }
 0xfab   :  { %v3221_v7 = vmul.f32 %v4192_v30, %v3210_v9  ;;  %v3223_v50 = vmul.f32 %v4192_v30, %v3212_v14  ;;  %v3224_v6 = vmul.f32 %v4192_v30, %v3213_v22  ;;  %v3227_v35 = vmul.f32 %v4192_v30, %v3216_v48 }
 0xfac   :  { %v6223_v36 = vadd.f32 %v4193_v57, %v3228_v0  ;;  %v3233_v61 = vadd.f32 %v4193_v57, %v3222_v34  ;;  %v3236_v31 = vadd.f32 %v4193_v57, %v3225_v21  ;;  %v3237_v28 = vadd.f32 %v4193_v57, %v3226_v49 }
 0xfad   :  { %v3232_v17 = vadd.f32 %v4193_v57, %v3221_v7  ;;  %v3234_v58 = vadd.f32 %v4193_v57, %v3223_v50  ;;  %v3235_v53 = vadd.f32 %v4193_v57, %v3224_v6  ;;  %v6225_v40 = vadd.f32 %v4193_v57, %v3227_v35 }
 0xfae   :  { %v3241_v16 = vmax.f32 %v3233_v61, 0.0  ;;  %v3247_v25 = vmax.f32 %v6223_v36, 0.0  ;;  %v3244_v55 = vmax.f32 %v3236_v31, 0.0  ;;  %v3245_v41 = vmax.f32 %v3237_v28, 0.0  ;;  %v4082_v36 = vld [vmem:[%s6753_s1 + $0x250] sm:$0xff] }
 0xfaf   :  { %v3240_v33 = vmax.f32 %v3232_v17, 0.0  ;;  %v3242_v11 = vmax.f32 %v3234_v58, 0.0  ;;  %v3243_v37 = vmax.f32 %v3235_v53, 0.0  ;;  %v3246_v29 = vmax.f32 %v6225_v40, 0.0 }
 0xfb0   :  { %v3249_v45 = vadd.f32 %v3241_v16, %v6796_v42  ;;  %v6253_v39 = vadd.f32 %v3247_v25, %v6801_v19  ;;  %v6802_v30 = vmax.f32 %v5153_v47, 0.0  ;;  %v6803_v27 = vmax.f32 %v5156_v59, 0.0 }
 0xfb1   :  { %v6232_v51 = vadd.f32 %v3240_v33, %v6797_v20  ;;  %v3250_v46 = vadd.f32 %v3242_v11, %v6798_v13  ;;  %v6238_v8 = vadd.f32 %v3243_v37, %v6799_v62  ;;  %v6243_v26 = vadd.f32 %v3243_v37, %v6800_v43 }
 0xfb2   :  { %3410 = vrot.lane.b32.xlu2 %v3249_v45, %s4220_s30  ;;  %v3345_v52 = vrot.slane %v3249_v45, 1  ;;  %v6258_v2 = vadd.f32 %v3244_v55, %v6802_v30  ;;  %v6262_v10 = vadd.f32 %v3245_v41, %v6803_v27  ;;  %v6804_v63 = vmax.f32 %v5138_v44, 0.0 }
 0xfb3   :  { %3408 = vrot.lane.b32.xlu0 %v6232_v51, %s4220_s30  ;;  %v3344_v24 = vrot.slane %v6232_v51, 1  ;;  %v3357_v15 = vrot.slane %v6243_v26, 1  ;;  %v3347_v23 = vrot.slane %v3250_v46, 1  ;;  %v3349_v57 = vrot.slane %v6238_v8, 1 }
 0xfb4   :  { %v3359_v18 = vrot.slane %v6258_v2, 1  ;;  %v3252_v9 = vadd.f32 %v3240_v33, %v6804_v63  ;;  %v3361_v47 = vrot.slane %v6262_v10, 1  ;;  %v6805_v14 = vmax.f32 %v5162_v60, 0.0 }
 0xfb5   :  { %v3346_v54 = vsel %vm188_vm0, %v3344_v24, %v3345_v52  ;;  %v6806_v22 = vmax.f32 %v5174_v56, 0.0  ;;  %v6807_v0 = vmax.f32 %v5145_v38, 0.0  ;;  %v3365_v21 = vrot.slane %v6253_v39, 1 }
 0xfb6   :  { %3472 = vrot.lane.b32.xlu1 %v3346_v54, %s4221_s14  ;;  %v6275_v59 = vadd.f32 %v3246_v29, %v6805_v14  ;;  %v6288_v44 = vsel %vm188_vm0, %v3357_v15, %v3359_v18  ;;  %v6808_v60 = vmax.f32 %v5180_v3, 0.0  ;;  %v3350_v7 = vsel %vm188_vm0, %v3347_v23, %v3349_v57 }
 0xfb7   :  { %v6279_v48 = vadd.f32 %v3244_v55, %v6806_v22  ;;  %v6283_v34 = vadd.f32 %v3242_v11, %v6807_v0  ;;  %v3362_v56 = vsel %vm188_vm0, %v3359_v18, %v3361_v47  ;;  %v6809_v6 = vmax.f32 %v5142_v12, 0.0 }
 0xfb8   :  { %v6293_v49 = vadd.f32 %v3245_v41, %v6808_v60  ;;  %v3363_v50 = vrot.slane %v6275_v59, 1  ;;  %v3348_v61 = vsel %vm188_vm0, %v3345_v52, %v3347_v23  ;;  %v3280_v3 = vrot.slane %v6232_v51, 7 }
 0xfb9   :  { %v3367_v38 = vrot.slane %v6279_v48, 1  ;;  %v3253_v35 = vadd.f32 %v3241_v16, %v6809_v6  ;;  %v3281_v12 = vrot.slane %v3249_v45, 7  ;;  %v3285_v16 = vrot.slane %v6238_v8, 7 }
 0xfba   :  { %3476 = vrot.lane.b32.xlu2 %v3350_v7, %s4221_s14  ;;  %v3369_v31 = vrot.slane %v6293_v49, 1  ;;  %v3364_v28 = vsel %vm188_vm0, %v3361_v47, %v3363_v50  ;;  %v6311_v58 = vsel %vm188_vm0, %v3363_v50, %v3365_v21  ;;  %v3351_v33 = vrot.slane %v3252_v9, 1  ;;  %v4091_v50 = vld [vmem:[%s6753_s1 + $0x298] sm:$0xff] }
 0xfbb   :  { %3474 = vrot.lane.b32.xlu0 %v3348_v61, %s4221_s14  ;;  %v6308_v17 = vsel %vm188_vm0, %v3365_v21, %v3367_v38  ;;  %v6322_v11 = vsel %vm58_vm2, %v3280_v3, %v3281_v12  ;;  %v3287_v37 = vrot.slane %v3252_v9, 7  ;;  %v3291_v42 = vrot.slane %v6283_v34, 7  ;;  %3617 = vmatpush.msrb.mxu0 %v4091_v50  ;;  %v4080_v61 = vld [vmem:[%s6753_s1 + $0x240] sm:$0xff] }
 0xfbc   :  { %v6316_v53 = vsel %vm188_vm0, %v3367_v38, %v3369_v31  ;;  %v3293_v45 = vrot.slane %v6243_v26, 7  ;;  %v3283_v55 = vrot.slane %v3250_v46, 7  ;;  %v3297_v41 = vrot.slane %v6262_v10, 7  ;;  %v4090_v38 = vld [vmem:[%s6753_s1 + $0x290] sm:$0xff] }
 0xfbd   :  { %v3299_v20 = vrot.slane %v6275_v59, 7  ;;  %v6330_v13 = vsel %vm58_vm2, %v3285_v16, %v3287_v37  ;;  %v3289_v62 = vrot.slane %v3253_v35, 7  ;;  %v3303_v52 = vrot.slane %v6279_v48, 7  ;;  %3618 = vmatpush.msrb.mxu0 %v4090_v38 }
 0xfbe   :  { %3412 = vrot.lane.b32.xlu1 %v3250_v46, %s4220_s30  ;;  %v3305_v43 = vrot.slane %v6293_v49, 7  ;;  %v6335_v24 = vsel %vm58_vm2, %v3291_v42, %v3293_v45  ;;  %v6338_v19 = vsel %vm58_vm2, %v3281_v12, %v3283_v55  ;;  %v6341_v46 = vsel %vm58_vm2, %v3283_v55, %v3285_v16 }
 0xfbf   :  { %v6344_v30 = vsel %vm58_vm2, %v3297_v41, %v3299_v20  ;;  %v6347_v27 = vsel %vm58_vm2, %v3287_v37, %v3289_v62  ;;  %v6350_v54 = vsel %vm58_vm2, %v3289_v62, %v3291_v42  ;;  %v3295_v18 = vrot.slane %v6258_v2, 7 }
 0xfc0   :  { %v6355_v23 = vsel %vm58_vm2, %v3303_v52, %v3305_v43  ;;  %v3301_v63 = vrot.slane %v6253_v39, 7  ;;  %v3352_v21 = vsel %vm188_vm0, %v3349_v57, %v3351_v33  ;;  %v3355_v60 = vrot.slane %v6283_v34, 1 }
 0xfc1   :  { %v6363_v47 = vsel %vm58_vm2, %v3293_v45, %v3295_v18  ;;  %v6366_v14 = vsel %vm58_vm2, %v3295_v18, %v3297_v41  ;;  %v3399_v6 = vsel %vm6810_vm12, %v6288_v44, 0.0 }
 0xfc2   :  { %3416 = vrot.lane.b32.xlu2 %v3252_v9, %s4220_s30  ;;  %v6369_v22 = vsel %vm58_vm2, %v3299_v20, %v3301_v63  ;;  %v6372_v0 = vsel %vm58_vm2, %v3301_v63, %v3303_v52  ;;  %v3353_v9 = vrot.slane %v3253_v35, 1  ;;  %v3358_v57 = vsel %vm188_vm0, %v3355_v60, %v3357_v15  ;;  %v4088_v15 = vld [vmem:[%s6753_s1 + $0x280] sm:$0xff] }
 0xfc3   :  { %3414 = vrot.lane.b32.xlu0 %v6238_v8, %s4220_s30 }
 0xfc4   :  { %v3356_v8 = vsel %vm188_vm0, %v3353_v9, %v3355_v60  ;;  %v3354_v7 = vsel %vm188_vm0, %v3351_v33, %v3353_v9 }
 0xfc6   :  { %3478 = vrot.lane.b32.xlu1 %v3352_v21, %s4221_s14 }
 0xfca   :  { %3482 = vrot.lane.b32.xlu2 %v3356_v8, %s4221_s14 }
 0xfcb   :  { %3480 = vrot.lane.b32.xlu0 %v3354_v7, %s4221_s14 }
 0xfce   :  { %3418 = vrot.lane.b32.xlu1 %v3253_v35, %s4220_s30 }
 0xfd2   :  { %3422 = vrot.lane.b32.xlu2 %v6243_v26, %s4220_s30  ;;  %v4089_v26 = vld [vmem:[%s6753_s1 + $0x288] sm:$0xff] }
 0xfd3   :  { %3420 = vrot.lane.b32.xlu0 %v6283_v34, %s4220_s30  ;;  %3619 = vmatpush.msrb.mxu0 %v4089_v26  ;;  %v6811_v34 = vmax.f32 %v5192_v4, 0.0  ;;  %v4083_v4 = vld [vmem:[%s6753_s1 + $0x258] sm:$0xff] }
 0xfd5   :  { %3620 = vmatpush.msrb.mxu0 %v4088_v15  ;;  %v6436_v44 = vadd.f32 %v3247_v25, %v6811_v34 }
 0xfd6   :  { %3484 = vrot.lane.b32.xlu1 %v3358_v57, %s4221_s14 }
 0xfd7   :  { %3621 = vmatpush.msrb.mxu0 %v4087_v32  ;;  %v3373_v40 = vrot.slane %v6436_v44, 1 }
 0xfda   :  { %3488 = vrot.lane.b32.xlu2 %v3362_v56, %s4221_s14  ;;  %v6812_v56 = vmax.f32 %v5186_v1, 0.0 }
 0xfdb   :  { %3486 = vrot.lane.b32.xlu0 %v3399_v6, %s4221_s14 }
 0xfdc   :  { %v6442_v35 = vadd.f32 %v3246_v29, %v6812_v56 }
 0xfde   :  { %3424 = vrot.lane.b32.xlu1 %v6258_v2, %s4220_s30  ;;  %v4086_v2 = vld [vmem:[%s6753_s1 + $0x270] sm:$0xff]  ;;  %v3371_v1 = vrot.slane %v6442_v35, 1 }
 0xfdf   :  { %3622 = vmatpush.msrb.mxu0 %v4086_v2 }
 0xfe0   :  { %v3374_v25 = vsel %vm188_vm0, %v3371_v1, %v3373_v40  ;;  %v3372_v29 = vsel %vm188_vm0, %v3369_v31, %v3371_v1 }
 0xfe2   :  { %3428 = vrot.lane.b32.xlu2 %v6275_v59, %s4220_s30  ;;  %v4084_v59 = vld [vmem:[%s6753_s1 + $0x260] sm:$0xff] }
 0xfe3   :  { %3426 = vrot.lane.b32.xlu0 %v6262_v10, %s4220_s30  ;;  %v4085_v10 = vld [vmem:[%s6753_s1 + $0x268] sm:$0xff] }
 0xfe4   :  { %3623 = vmatpush.msrb.mxu0 %v4085_v10 }
 0xfe6   :  { %3490 = vrot.lane.b32.xlu1 %v3364_v28, %s4221_s14  ;;  %3624 = vmatpush.msrb.mxu0 %v4084_v59  ;;  %v3327_v28 = vsel %vm58_vm2, 0.0, %v3280_v3 }
 0xfe8   :  { %3625 = vmatpush.msrb.mxu0 %v4083_v4 }
 0xfea   :  { %3494 = vrot.lane.b32.xlu2 %v6308_v17, %s4221_s14  ;;  %3626 = vmatpush.msrb.mxu0 %v4082_v36 }
 0xfeb   :  { %3492 = vrot.lane.b32.xlu0 %v6311_v58, %s4221_s14 }
 0xfee   :  { %3430 = vrot.lane.b32.xlu1 %v6253_v39, %s4220_s30  ;;  %v4081_v39 = vld [vmem:[%s6753_s1 + $0x248] sm:$0xff] }
 0xfef   :  { %3627 = vmatpush.msrb.mxu0 %v4081_v39 }
 0xff1   :  { %3628 = vmatpush.msrb.mxu0 %v4080_v61 }
 0xff2   :  { %3434 = vrot.lane.b32.xlu2 %v6293_v49, %s4220_s30 }
 0xff3   :  { %3432 = vrot.lane.b32.xlu0 %v6279_v48, %s4220_s30  ;;  %v3391_v48 = vsel %vm188_vm0, %v3373_v40, 0.0  ;;  %vm6813_vm0 = vcmp.ne.s32.totalorder %v4531_v5, 64 }
 0xff4   :  { %v3336_v26 = vsel %vm6813_vm0, %v6363_v47, 0.0 }
 0xff6   :  { %3496 = vrot.lane.b32.xlu1 %v6316_v53, %s4221_s14 }
 0xffa   :  { %3500 = vrot.lane.b32.xlu2 %v3374_v25, %s4221_s14 }
 0xffb   :  { %3498 = vrot.lane.b32.xlu0 %v3372_v29, %s4221_s14 }
 0xffe   :  { %3436 = vrot.lane.b32.xlu1 %v6442_v35, %s4220_s30 }
0x1003   :  { %3438 = vrot.lane.b32.xlu0 %v6436_v44, %s4220_s30 }
0x1006   :  { %3502 = vrot.lane.b32.xlu1 %v3391_v48, %s4221_s14 }
0x100c   :  { %v3411_v53 = vpop.permute.xlu2 %3410 }
0x100d   :  { %v3521_v33 = vsel %vm413_vm3, %v6322_v11, %v3411_v53 }
0x1014   :  { %v3477_v3 = vpop.permute.xlu2 %3476 }
0x101c   :  { %v3417_v62 = vpop.permute.xlu2 %3416 }
0x101d   :  { %v3524_v18 = vsel %vm413_vm3, %v6330_v13, %v3417_v62 }
0x1024   :  { %v3483_v9 = vpop.permute.xlu2 %3482 }
0x1025   :  { %v3409_v31 = vpop.permute.xlu0 %3408 }
0x1026   :  { %v3520_v17 = vsel %vm413_vm3, %v3327_v28, %v3409_v31 }
0x1028   :  { %v3473_v58 = vpop.permute.xlu1 %3472 }
0x1029   :  { %v3536_v12 = vsel %vm430_vm5, %v3520_v17, %v3473_v58 }
0x102a   :  { %4092 = vmatmul.msk.f32.vlgmr.msrb.gmra.mxu0 %vm459_vm4, %v3536_v12 }
0x102c   :  { %v3423_v50 = vpop.permute.xlu2 %3422 }
0x102d   :  { %v3475_v16 = vpop.permute.xlu0 %3474  ;;  %v3527_v38 = vsel %vm413_vm3, %v6335_v24, %v3423_v50 }
0x102e   :  { %v3537_v37 = vsel %vm430_vm5, %v3521_v33, %v3475_v16 }
0x1030   :  { %v3413_v42 = vpop.permute.xlu1 %3412 }
0x1031   :  { %v3522_v51 = vsel %vm413_vm3, %v6338_v19, %v3413_v42 }
0x1032   :  { %4093 = vmatmul.msk.f32.gmra.mxu0 %vm459_vm4, %v3537_v37  ;;  %v3538_v45 = vsel %vm430_vm5, %v3522_v51, %v3477_v3 }
0x1034   :  { %v3489_v15 = vpop.permute.xlu2 %3488 }
0x1035   :  { %v3415_v55 = vpop.permute.xlu0 %3414 }
0x1036   :  { %v3523_v20 = vsel %vm413_vm3, %v6341_v46, %v3415_v55 }
0x1038   :  { %v3479_v41 = vpop.permute.xlu1 %3478 }
0x1039   :  { %v3539_v11 = vsel %vm430_vm5, %v3523_v20, %v3479_v41 }
0x103a   :  { %4094 = vmatmul.msk.f32.gmra.mxu0 %vm459_vm4, %v3538_v45 }
0x103c   :  { %v3429_v34 = vpop.permute.xlu2 %3428 }
0x103d   :  { %v3481_v52 = vpop.permute.xlu0 %3480  ;;  %v3530_v5 = vsel %vm413_vm3, %v6344_v30, %v3429_v34 }
0x103e   :  { %v3540_v19 = vsel %vm430_vm5, %v3524_v18, %v3481_v52 }
0x1040   :  { %v3419_v63 = vpop.permute.xlu1 %3418 }
0x1041   :  { %v3525_v21 = vsel %vm413_vm3, %v6347_v27, %v3419_v63 }
0x1042   :  { %4095 = vmatmul.msk.f32.gmra.mxu0 %vm459_vm4, %v3539_v11  ;;  %v3541_v46 = vsel %vm430_vm5, %v3525_v21, %v3483_v9 }
0x1044   :  { %v3495_v1 = vpop.permute.xlu2 %3494 }
0x1045   :  { %v3421_v60 = vpop.permute.xlu0 %3420 }
0x1046   :  { %v3526_v7 = vsel %vm413_vm3, %v6350_v54, %v3421_v60 }
0x1048   :  { %v3485_v8 = vpop.permute.xlu1 %3484 }
0x1049   :  { %v3542_v13 = vsel %vm430_vm5, %v3526_v7, %v3485_v8 }
0x104a   :  { %4096 = vmatmul.msk.f32.gmra.mxu0 %vm459_vm4, %v3540_v19 }
0x104c   :  { %v3435_v39 = vpop.permute.xlu2 %3434 }
0x104d   :  { %v3487_v57 = vpop.permute.xlu0 %3486  ;;  %v3533_v61 = vsel %vm413_vm3, %v6355_v23, %v3435_v39  ;;  %v3309_v23 = vrot.slane %v6436_v44, 7 }
0x104e   :  { %v3543_v27 = vsel %vm430_vm5, %v3527_v38, %v3487_v57 }
0x1050   :  { %v3425_v6 = vpop.permute.xlu1 %3424 }
0x1051   :  { %v3528_v54 = vsel %vm413_vm3, %v3336_v26, %v3425_v6 }
0x1052   :  { %4097 = vmatmul.msk.f32.gmra.mxu0 %vm459_vm4, %v3541_v46  ;;  %v3544_v32 = vsel %vm430_vm5, %v3528_v54, %v3489_v15 }
0x1054   :  { %v3501_v58 = vpop.permute.xlu2 %3500 }
0x1055   :  { %v3427_v2 = vpop.permute.xlu0 %3426 }
0x1056   :  { %v3529_v24 = vsel %vm413_vm3, %v6366_v14, %v3427_v2 }
0x1058   :  { %v3491_v10 = vpop.permute.xlu1 %3490 }
0x1059   :  { %v3545_v59 = vsel %vm430_vm5, %v3529_v24, %v3491_v10 }
0x105a   :  { %4098 = vmatmul.msk.f32.gmra.mxu0 %vm459_vm4, %v3542_v13 }
0x105d   :  { %v3493_v56 = vpop.permute.xlu0 %3492 }
0x105e   :  { %v3546_v47 = vsel %vm430_vm5, %v3530_v5, %v3493_v56 }
0x1060   :  { %v3431_v4 = vpop.permute.xlu1 %3430 }
0x1061   :  { %v3531_v36 = vsel %vm413_vm3, %v6369_v22, %v3431_v4  ;;  %v3307_v22 = vrot.slane %v6442_v35, 7 }
0x1062   :  { %4099 = vmatmul.msk.f32.gmra.mxu0 %vm459_vm4, %v3543_v27  ;;  %v3547_v14 = vsel %vm430_vm5, %v3531_v36, %v3495_v1 }
0x1063   :  { %v3310_v16 = vsel %vm58_vm2, %v3307_v22, %v3309_v23 }
0x1065   :  { %v3433_v40 = vpop.permute.xlu0 %3432 }
0x1066   :  { %v3532_v29 = vsel %vm413_vm3, %v6372_v0, %v3433_v40  ;;  %v3308_v0 = vsel %vm58_vm2, %v3305_v43, %v3307_v22 }
0x1068   :  { %v3497_v25 = vpop.permute.xlu1 %3496 }
0x1069   :  { %v3548_v30 = vsel %vm430_vm5, %v3532_v29, %v3497_v25 }
0x106a   :  { %4100 = vmatmul.msk.f32.gmra.mxu0 %vm459_vm4, %v3544_v32 }
0x106d   :  { %v3499_v48 = vpop.permute.xlu0 %3498 }
0x106e   :  { %v3549_v31 = vsel %vm430_vm5, %v3533_v61, %v3499_v48 }
0x1070   :  { %v3437_v28 = vpop.permute.xlu1 %3436 }
0x1071   :  { %v3534_v17 = vsel %vm413_vm3, %v3308_v0, %v3437_v28 }
0x1072   :  { %4101 = vmatmul.msk.f32.gmra.mxu0 %vm459_vm4, %v3545_v59  ;;  %v3550_v12 = vsel %vm430_vm5, %v3534_v17, %v3501_v58 }
0x1075   :  { %v3439_v53 = vpop.permute.xlu0 %3438 }
0x1076   :  { %v3535_v33 = vsel %vm413_vm3, %v3310_v16, %v3439_v53 }
0x1078   :  { %v3503_v35 = vpop.permute.xlu1 %3502 }
0x1079   :  { %v3551_v37 = vsel %vm430_vm5, %v3535_v33, %v3503_v35 }
0x107a   :  { %4102 = vmatmul.msk.f32.gmra.mxu0 %vm459_vm4, %v3546_v47 }
0x1082   :  { %4103 = vmatmul.msk.f32.gmra.mxu0 %vm459_vm4, %v3547_v14 }
0x108a   :  { %4104 = vmatmul.msk.f32.gmra.mxu0 %vm459_vm4, %v3548_v30 }
0x1092   :  { %4105 = vmatmul.msk.f32.gmra.mxu0 %vm459_vm4, %v3549_v31 }
0x109a   :  { %4106 = vmatmul.msk.f32.gmra.mxu0 %vm459_vm4, %v3550_v12 }
0x10a2   :  { %4107 = vmatmul.msk.f32.gmra.mxu0 %vm459_vm4, %v3551_v37 }
0x10a7   :  { %v3630_v49 = vpop.f32.mrf.mxu0 }
0x10a8   :  { %v3682_v18 = vsel %vm413_vm3, %v3630_v49, 0.0 }
0x10af   :  { %v3633_v43 = vpop.f32.mrf.mxu0 }
0x10b0   :  { %v3683_v52 = vsel %vm413_vm3, %v3633_v43, 0.0 }
0x10b1   :  { %v3684_v63 = vadd.f32 %v3683_v52, %v3682_v18 }
0x10b7   :  { %v3636_v42 = vpop.f32.mrf.mxu0 }
0x10b8   :  { %v3685_v19 = vsel %vm413_vm3, %v3636_v42, 0.0 }
0x10b9   :  { %v3686_v9 = vadd.f32 %v3685_v19, %v3684_v63 }
0x10bf   :  { %v3639_v51 = vpop.f32.mrf.mxu0 }
0x10c0   :  { %v3687_v21 = vsel %vm413_vm3, %v3639_v51, 0.0 }
0x10c1   :  { %v3688_v8 = vadd.f32 %v3687_v21, %v3686_v9 }
0x10c7   :  { %v3642_v3 = vpop.f32.mrf.mxu0 }
0x10c8   :  { %v3689_v60 = vsel %vm413_vm3, %v3642_v3, 0.0 }
0x10c9   :  { %v3690_v13 = vadd.f32 %v3689_v60, %v3688_v8 }
0x10cf   :  { %v3645_v45 = vpop.f32.mrf.mxu0 }
0x10d0   :  { %v3691_v7 = vsel %vm413_vm3, %v3645_v45, 0.0 }
0x10d1   :  { %v3692_v57 = vadd.f32 %v3691_v7, %v3690_v13 }
0x10d7   :  { %v3648_v55 = vpop.f32.mrf.mxu0 }
0x10d8   :  { %v3693_v50 = vsel %vm413_vm3, %v3648_v55, 0.0 }
0x10d9   :  { %v3694_v27 = vadd.f32 %v3693_v50, %v3692_v57 }
0x10df   :  { %v6548_v41 = vpop.f32.mrf.mxu0 }
0x10e0   :  { %v3695_v38 = vsel %vm413_vm3, %v6548_v41, 0.0 }
0x10e1   :  { %v3696_v54 = vadd.f32 %v3695_v38, %v3694_v27 }
0x10e7   :  { %v6550_v44 = vpop.f32.mrf.mxu0 }
0x10e8   :  { %v3697_v26 = vsel %vm413_vm3, %v6550_v44, 0.0 }
0x10e9   :  { %v3698_v32 = vadd.f32 %v3697_v26, %v3696_v54 }
0x10ef   :  { %v6552_v20 = vpop.f32.mrf.mxu0 }
0x10f0   :  { %v3699_v15 = vsel %vm413_vm3, %v6552_v20, 0.0 }
0x10f1   :  { %v3700_v10 = vadd.f32 %v3699_v15, %v3698_v32 }
0x10f7   :  { %v6554_v11 = vpop.f32.mrf.mxu0 }
0x10f8   :  { %v3701_v2 = vsel %vm413_vm3, %v6554_v11, 0.0 }
0x10f9   :  { %v3702_v59 = vadd.f32 %v3701_v2, %v3700_v10 }
0x10ff   :  { %v6556_v62 = vpop.f32.mrf.mxu0 }
0x1100   :  { %v3703_v24 = vsel %vm413_vm3, %v6556_v62, 0.0 }
0x1101   :  { %v3704_v5 = vadd.f32 %v3703_v24, %v3702_v59 }
0x1107   :  { %v6562_v46 = vpop.f32.mrf.mxu0 }
0x1108   :  { %v3705_v56 = vsel %vm413_vm3, %v6562_v46, 0.0 }
0x1109   :  { %v3706_v4 = vadd.f32 %v3705_v56, %v3704_v5 }
0x110f   :  { %v6569_v6 = vpop.f32.mrf.mxu0 }
0x1110   :  { %v3707_v47 = vsel %vm413_vm3, %v6569_v6, 0.0 }
0x1111   :  { %v3708_v1 = vadd.f32 %v3707_v47, %v3706_v4 }
0x1117   :  { %v6579_v34 = vpop.f32.mrf.mxu0 }
0x1118   :  { %v3709_v36 = vsel %vm413_vm3, %v6579_v34, 0.0 }
0x1119   :  { %v3710_v14 = vadd.f32 %v3709_v36, %v3708_v1 }
0x111f   :  { %v3675_v40 = vpop.f32.mrf.mxu0 }
0x1120   :  { %v3711_v25 = vsel %vm413_vm3, %v3675_v40, 0.0 }
0x1121   :  { %v3712_v29 = vadd.f32 %v3711_v25, %v3710_v14 }
0x1123   :  { %v3713_v30 = vrot.slane %v3712_v29, 4 }
0x1125   :  { %v3714_v39 = vadd.f32 %v3713_v30, %v3712_v29 }
0x1127   :  { %v3715_v48 = vrot.slane %v3714_v39, 2 }
0x1129   :  { %v3716_v61 = vadd.f32 %v3715_v48, %v3714_v39 }
0x112b   :  { %v3717_v22 = vrot.slane %v3716_v61, 1 }
0x112d   :  { %v3718_v31 = vadd.f32 %v3717_v22, %v3716_v61 }
0x112f   :  { %v3719_v28 = vmul.f32 0.0078125, %v3718_v31 }
0x1131   :  { %v6588_v0 = vsub.f32 %v3630_v49, %v3719_v28  ;;  %v6590_v17 = vsub.f32 %v3633_v43, %v3719_v28  ;;  %v6592_v58 = vsub.f32 %v3636_v42, %v3719_v28  ;;  %v6594_v12 = vsub.f32 %v3639_v51, %v3719_v28 }
0x1132   :  { %v6600_v35 = vsub.f32 %v3642_v3, %v3719_v28  ;;  %v6604_v33 = vsub.f32 %v3645_v45, %v3719_v28  ;;  %v6610_v51 = vsub.f32 %v3648_v55, %v3719_v28  ;;  %v6616_v19 = vsub.f32 %v6548_v41, %v3719_v28 }
0x1133   :  { %v3736_v23 = vmul.f32 %v6588_v0, %v6588_v0  ;;  %v3737_v53 = vmul.f32 %v6590_v17, %v6590_v17  ;;  %v3738_v16 = vmul.f32 %v6592_v58, %v6592_v58  ;;  %v3739_v37 = vmul.f32 %v6594_v12, %v6594_v12 }
0x1134   :  { %v3740_v52 = vmul.f32 %v6600_v35, %v6600_v35  ;;  %v3741_v45 = vmul.f32 %v6604_v33, %v6604_v33  ;;  %v6622_v9 = vsub.f32 %v6550_v44, %v3719_v28  ;;  %v3742_v55 = vmul.f32 %v6610_v51, %v6610_v51 }
0x1135   :  { %v3752_v49 = vsel %vm413_vm3, %v3736_v23, 0.0  ;;  %v3753_v43 = vsel %vm413_vm3, %v3737_v53, 0.0  ;;  %v3755_v3 = vsel %vm413_vm3, %v3738_v16, 0.0  ;;  %v3757_v63 = vsel %vm413_vm3, %v3739_v37, 0.0 }
0x1136   :  { %v3754_v42 = vadd.f32 %v3753_v43, %v3752_v49  ;;  %v3759_v60 = vsel %vm413_vm3, %v3740_v52, 0.0  ;;  %v6628_v7 = vsub.f32 %v6552_v20, %v3719_v28  ;;  %v3743_v41 = vmul.f32 %v6616_v19, %v6616_v19 }
0x1137   :  { %v3761_v13 = vsel %vm413_vm3, %v3741_v45, 0.0  ;;  %v3730_v57 = vsub.f32 %v6554_v11, %v3719_v28  ;;  %v3744_v44 = vmul.f32 %v6622_v9, %v6622_v9  ;;  %v3763_v38 = vsel %vm413_vm3, %v3742_v55, 0.0 }
0x1138   :  { %v3756_v18 = vadd.f32 %v3755_v3, %v3754_v42  ;;  %v3731_v26 = vsub.f32 %v6556_v62, %v3719_v28  ;;  %v3745_v20 = vmul.f32 %v6628_v7, %v6628_v7  ;;  %v3765_v54 = vsel %vm413_vm3, %v3743_v41, 0.0 }
0x1139   :  { %v6642_v32 = vsub.f32 %v6562_v46, %v3719_v28  ;;  %v3746_v2 = vmul.f32 %v3730_v57, %v3730_v57  ;;  %v3767_v11 = vsel %vm413_vm3, %v3744_v44, 0.0  ;;  %v6646_v24 = vsub.f32 %v6569_v6, %v3719_v28 }
0x113a   :  { %v3758_v21 = vadd.f32 %v3757_v63, %v3756_v18  ;;  %v3747_v59 = vmul.f32 %v3731_v26, %v3731_v26  ;;  %v3769_v56 = vsel %vm413_vm3, %v3745_v20, 0.0  ;;  %v6650_v5 = vsub.f32 %v6579_v34, %v3719_v28 }
0x113b   :  { %v3748_v47 = vmul.f32 %v6642_v32, %v6642_v32  ;;  %v3771_v46 = vsel %vm413_vm3, %v3746_v2, 0.0  ;;  %v6655_v36 = vsub.f32 %v3675_v40, %v3719_v28  ;;  %v3749_v1 = vmul.f32 %v6646_v24, %v6646_v24 }
0x113c   :  { %v3760_v8 = vadd.f32 %v3759_v60, %v3758_v21  ;;  %v3773_v6 = vsel %vm413_vm3, %v3747_v59, 0.0  ;;  %v3750_v25 = vmul.f32 %v6650_v5, %v6650_v5 }
0x113d   :  { %v3775_v34 = vsel %vm413_vm3, %v3748_v47, 0.0  ;;  %v3751_v30 = vmul.f32 %v6655_v36, %v6655_v36  ;;  %v3777_v39 = vsel %vm413_vm3, %v3749_v1, 0.0 }
0x113e   :  { %v3762_v50 = vadd.f32 %v3761_v13, %v3760_v8  ;;  %v3779_v40 = vsel %vm413_vm3, %v3750_v25, 0.0  ;;  %v4194_v13 = vld [vmem:[%s6754_s2 + $0x6] ss:$0 sm:$0xff] }
0x113f   :  { %v3781_v22 = vsel %vm413_vm3, %v3751_v30, 0.0 }
0x1140   :  { %v3764_v27 = vadd.f32 %v3763_v38, %v3762_v50 }
0x1142   :  { %v3766_v15 = vadd.f32 %v3765_v54, %v3764_v27 }
0x1144   :  { %v3768_v10 = vadd.f32 %v3767_v11, %v3766_v15 }
0x1146   :  { %v3770_v62 = vadd.f32 %v3769_v56, %v3768_v10 }
0x1148   :  { %v3772_v4 = vadd.f32 %v3771_v46, %v3770_v62 }
0x114a   :  { %v3774_v14 = vadd.f32 %v3773_v6, %v3772_v4 }
0x114c   :  { %v3776_v29 = vadd.f32 %v3775_v34, %v3774_v14 }
0x114e   :  { %v3778_v48 = vadd.f32 %v3777_v39, %v3776_v29 }
0x1150   :  { %v3780_v61 = vadd.f32 %v3779_v40, %v3778_v48 }
0x1152   :  { %v3782_v31 = vadd.f32 %v3781_v22, %v3780_v61 }
0x1154   :  { %v3783_v28 = vrot.slane %v3782_v31, 4 }
0x1156   :  { %v3784_v23 = vadd.f32 %v3783_v28, %v3782_v31 }
0x1158   :  { %v3785_v53 = vrot.slane %v3784_v23, 2 }
0x115a   :  { %v3786_v16 = vadd.f32 %v3785_v53, %v3784_v23 }
0x115c   :  { %v3787_v37 = vrot.slane %v3786_v16, 1 }
0x115e   :  { %v3788_v49 = vadd.f32 %v3787_v37, %v3786_v16 }
0x1160   :  { %v3789_v43 = vmul.f32 0.0078125, %v3788_v49 }
0x1162   :  { %v3790_v42 = vadd.f32 1e-05, %v3789_v43 }
0x1164   :  { %4218 = vrsqrt.f32 %v3790_v42  ;;  %vm3797_vm4 = vweird.f32 %v3790_v42 }
0x116a   :  { %v4219_v52 = vpop.eup %4218 }
0x116b   :  { %v3792_v3 = vmul.f32 %v4219_v52, %v3790_v42  ;;  %vm3798_vm2 = vweird.f32 %v4219_v52 }
0x116c   :  { %vm3799_vm5 = vmor %vm3797_vm4, %vm3798_vm2 }
0x116d   :  { %v3793_v18 = vmul.f32 %v4219_v52, %v3792_v3 }
0x116f   :  { %v3794_v45 = vmul.f32 0.5, %v3793_v18 }
0x1171   :  { %v3795_v63 = vsub.f32 1.5, %v3794_v45 }
0x1173   :  { %v3796_v21 = vmul.f32 %v4219_v52, %v3795_v63 }
0x1175   :  { %v3800_v55 = vsel %vm3799_vm5, %v4219_v52, %v3796_v21 }
0x1176   :  { %v3801_v60 = vmul.f32 %v3800_v55, %v6588_v0  ;;  %v3802_v8 = vmul.f32 %v3800_v55, %v6590_v17  ;;  %v3803_v41 = vmul.f32 %v3800_v55, %v6592_v58  ;;  %v3804_v50 = vmul.f32 %v3800_v55, %v6594_v12  ;;  %v4195_v17 = vld [vmem:[%s6755_s3 + $0x6] ss:$0 sm:$0xff] }
0x1177   :  { %v3806_v44 = vmul.f32 %v3800_v55, %v6604_v33  ;;  %v3807_v38 = vmul.f32 %v3800_v55, %v6610_v51  ;;  %v3805_v27 = vmul.f32 %v3800_v55, %v6600_v35  ;;  %v3811_v20 = vmul.f32 %v3800_v55, %v3730_v57 }
0x1178   :  { %v3812_v54 = vmul.f32 %v3800_v55, %v3731_v26  ;;  %v3820_v15 = vmul.f32 %v4194_v13, %v3801_v60  ;;  %v3821_v0 = vmul.f32 %v4194_v13, %v3802_v8  ;;  %v3822_v2 = vmul.f32 %v4194_v13, %v3803_v41 }
0x1179   :  { %v3808_v58 = vmul.f32 %v3800_v55, %v6616_v19  ;;  %v3823_v11 = vmul.f32 %v4194_v13, %v3804_v50  ;;  %v3809_v12 = vmul.f32 %v3800_v55, %v6622_v9  ;;  %v3824_v10 = vmul.f32 %v4194_v13, %v3805_v27 }
0x117a   :  { %v3810_v33 = vmul.f32 %v3800_v55, %v6628_v7  ;;  %v3825_v51 = vmul.f32 %v4194_v13, %v3806_v44  ;;  %v3826_v59 = vmul.f32 %v4194_v13, %v3807_v38  ;;  %v3839_v35 = vadd.f32 %v4195_v17, %v3820_v15 }
0x117b   :  { %v3840_v57 = vadd.f32 %v4195_v17, %v3821_v0  ;;  %v3841_v26 = vadd.f32 %v4195_v17, %v3822_v2  ;;  %v3827_v56 = vmul.f32 %v4194_v13, %v3808_v58  ;;  %v3842_v62 = vadd.f32 %v4195_v17, %v3823_v11 }
0x117c   :  { %v3813_v47 = vmul.f32 %v3800_v55, %v6642_v32  ;;  %v3814_v46 = vmul.f32 %v3800_v55, %v6646_v24  ;;  %v3828_v4 = vmul.f32 %v4194_v13, %v3809_v12  ;;  %v3843_v1 = vadd.f32 %v4195_v17, %v3824_v10 }
0x117d   :  { %v3815_v19 = vmul.f32 %v3800_v55, %v6650_v5  ;;  %v3829_v6 = vmul.f32 %v4194_v13, %v3810_v33  ;;  %v3830_v9 = vmul.f32 %v4194_v13, %v3811_v20  ;;  %v3844_v14 = vadd.f32 %v4195_v17, %v3825_v51 }
0x117e   :  { %v3845_v25 = vadd.f32 %v4195_v17, %v3826_v59  ;;  %v3855_v7 = vmax.f32 %v3839_v35, 0.0  ;;  %v3856_v34 = vmax.f32 %v3840_v57, 0.0  ;;  %v3857_v29 = vmax.f32 %v3841_v26, 0.0 }
0x117f   :  { %v3816_v30 = vmul.f32 %v3800_v55, %v6655_v36  ;;  %v3831_v39 = vmul.f32 %v4194_v13, %v3812_v54  ;;  %v3846_v48 = vadd.f32 %v4195_v17, %v3827_v56  ;;  %v3858_v40 = vmax.f32 %v3842_v62, 0.0 }
0x1180   :  { %v3832_v61 = vmul.f32 %v4194_v13, %v3813_v47  ;;  %v3847_v32 = vadd.f32 %v4195_v17, %v3828_v4  ;;  %v3859_v22 = vmax.f32 %v3843_v1, 0.0  ;;  %3871 = vst.msk [vmem:[%s6759_s7] sm:$0xff] %vm413_vm3, %v3855_v7  ;;  %v3833_v24 = vmul.f32 %v4194_v13, %v3814_v46 }
0x1181   :  { %v3848_v5 = vadd.f32 %v4195_v17, %v3829_v6  ;;  %v3860_v31 = vmax.f32 %v3844_v14, 0.0  ;;  %3872 = vst.msk [vmem:[%s6759_s7 + $0x8] sm:$0xff] %vm413_vm3, %v3856_v34  ;;  %v3834_v36 = vmul.f32 %v4194_v13, %v3815_v19  ;;  %v3849_v28 = vadd.f32 %v4195_v17, %v3830_v9 }
0x1182   :  { %v3861_v23 = vmax.f32 %v3845_v25, 0.0  ;;  %3873 = vst.msk [vmem:[%s6759_s7 + $0x10] sm:$0xff] %vm413_vm3, %v3857_v29  ;;  %v3835_v53 = vmul.f32 %v4194_v13, %v3816_v30  ;;  %v3850_v16 = vadd.f32 %v4195_v17, %v3831_v39  ;;  %v3862_v37 = vmax.f32 %v3846_v48, 0.0 }
0x1183   :  { %3874 = vst.msk [vmem:[%s6759_s7 + $0x18] sm:$0xff] %vm413_vm3, %v3858_v40  ;;  %v3851_v49 = vadd.f32 %v4195_v17, %v3832_v61  ;;  %v3863_v43 = vmax.f32 %v3847_v32, 0.0  ;;  %v3852_v42 = vadd.f32 %v4195_v17, %v3833_v24  ;;  %v3864_v52 = vmax.f32 %v3848_v5, 0.0 }
0x1184   :  { %3875 = vst.msk [vmem:[%s6759_s7 + $0x20] sm:$0xff] %vm413_vm3, %v3859_v22  ;;  %v3853_v3 = vadd.f32 %v4195_v17, %v3834_v36  ;;  %v3865_v18 = vmax.f32 %v3849_v28, 0.0  ;;  %v3854_v45 = vadd.f32 %v4195_v17, %v3835_v53  ;;  %v3866_v63 = vmax.f32 %v3850_v16, 0.0 }
0x1185   :  { %3876 = vst.msk [vmem:[%s6759_s7 + $0x28] sm:$0xff] %vm413_vm3, %v3860_v31  ;;  %v3867_v21 = vmax.f32 %v3851_v49, 0.0  ;;  %v3868_v55 = vmax.f32 %v3852_v42, 0.0 }
0x1186   :  { %3877 = vst.msk [vmem:[%s6759_s7 + $0x30] sm:$0xff] %vm413_vm3, %v3861_v23  ;;  %v3869_v60 = vmax.f32 %v3853_v3, 0.0  ;;  %v3870_v8 = vmax.f32 %v3854_v45, 0.0 }
0x1187   :  { %3878 = vst.msk [vmem:[%s6759_s7 + $0x38] sm:$0xff] %vm413_vm3, %v3862_v37 }
0x1188   :  { %3879 = vst.msk [vmem:[%s6759_s7 + $0x40] sm:$0xff] %vm413_vm3, %v3863_v43 }
0x1189   :  { %3880 = vst.msk [vmem:[%s6759_s7 + $0x48] sm:$0xff] %vm413_vm3, %v3864_v52 }
0x118a   :  { %3881 = vst.msk [vmem:[%s6759_s7 + $0x50] sm:$0xff] %vm413_vm3, %v3865_v18 }
0x118b   :  { %3882 = vst.msk [vmem:[%s6759_s7 + $0x58] sm:$0xff] %vm413_vm3, %v3866_v63 }
0x118c   :  { %3883 = vst.msk [vmem:[%s6759_s7 + $0x60] sm:$0xff] %vm413_vm3, %v3867_v21 }
0x118d   :  { %3884 = vst.msk [vmem:[%s6759_s7 + $0x68] sm:$0xff] %vm413_vm3, %v3868_v55 }
0x118e   :  { %3885 = vst.msk [vmem:[%s6759_s7 + $0x70] sm:$0xff] %vm413_vm3, %v3869_v60 }
0x118f   :  { %3886 = vst.msk [vmem:[%s6759_s7 + $0x78] sm:$0xff] %vm413_vm3, %v3870_v8 }

</bundles_post_ra>
